<compile_context>
chip_gen: v6e
topology: v6e:2x2x1
jax: 0.10.0
libtpu: 0.0.40
codegen_flags: <defaults>
</compile_context>

<pallas_src>
import jax
import jax.numpy as jnp
from jax import lax
from jax.experimental import pallas as pl
from jax.experimental.pallas import tpu as pltpu

# ----------------------------- model config (small) -----------------------------
EMBED       = 32
HEADS       = 4
HEAD_DIM    = EMBED // HEADS
FFN_HIDDEN  = 4 * EMBED          # forward_expansion = 4
NUM_LAYERS  = 2
SRC_VOCAB   = 16
TGT_VOCAB   = 16
VOCAB_PAD   = 128                # lane-dense padded logits width
MAX_LEN     = 16
SRC_PAD_IDX = 0
TGT_PAD_IDX = 0
LN_EPS      = 1e-5


# ============================ in-kernel helper functions =========================

def _mha(q2d, k2d, v2d, keep_mask, n, lq, lk, wo, bo):
    """Multi-head attention on flattened activations.

    q2d: (n*lq, E), k2d/v2d: (n*lk, E), keep_mask: bool (n, lq, lk) (True = keep),
    wo: (E, E) pre-transposed, bo: (1, E).  Returns (n*lq, E).
    Matches: energy.masked_fill(mask==0, -1e20); softmax(energy / sqrt(embed)); @ V; fc_out.
    """
    q3 = q2d.reshape(n, lq, EMBED)
    k3 = k2d.reshape(n, lk, EMBED)
    v3 = v2d.reshape(n, lk, EMBED)
    scale = 1.0 / (float(EMBED) ** 0.5)        # module divides by sqrt(embed_size)
    head_outs = []
    # TODO(synk): heads stay a static 4-iteration loop (3-D one-batch-dim einsums);
    # a single 4-D batched dot_general is riskier to lower on Mosaic at this size.
    for h in range(HEADS):
        s = slice(h * HEAD_DIM, (h + 1) * HEAD_DIM)
        qh, kh, vh = q3[..., s], k3[..., s], v3[..., s]
        e = jnp.einsum('bqd,bkd->bqk', qh, kh, preferred_element_type=jnp.float32)
        e = jnp.where(keep_mask, e, jnp.float32(-1e20)) * scale
        m = jnp.max(e, axis=-1, keepdims=True)
        p = jnp.exp(e - m)
        p = p * pl.reciprocal(jnp.sum(p, axis=-1, keepdims=True), approx=True)
        head_outs.append(jnp.einsum('bqk,bkd->bqd', p, vh,
                                    preferred_element_type=jnp.float32))
    cat = jnp.concatenate(head_outs, axis=-1).reshape(n * lq, EMBED)
    return jnp.dot(cat, wo, preferred_element_type=jnp.float32) + bo


def _add_layernorm(a, b, g, beta):
    """LayerNorm(a + b) over last dim; a,b: (M, E); g,beta: (1, E)."""
    x = a + b
    mu = jnp.mean(x, axis=-1, keepdims=True)
    var = jnp.mean((x - mu) ** 2, axis=-1, keepdims=True)
    return (x - mu) * lax.rsqrt(var + LN_EPS) * g + beta


def _ffn(x, w1, b1, w2, b2):
    """ReLU(x @ W1 + b1) @ W2 + b2 ; weights pre-transposed to (in, out)."""
    h = jnp.maximum(jnp.dot(x, w1, preferred_element_type=jnp.float32) + b1, 0.0)
    return jnp.dot(h, w2, preferred_element_type=jnp.float32) + b2


# ================================ fused stack kernels ============================

def _encoder_stack_kernel(x_ref, keep_ref,
                          wqkv_ref, bqkv_ref, wo_ref, bo_ref,
                          g1_ref, b1_ref, g2_ref, b2_ref,
                          w1_ref, bf1_ref, w2_ref, bf2_ref,
                          out_ref):
    """grid=(NUM_LAYERS,).  out_ref (constant block index) is the resident activation."""
    n, ls, e = out_ref.shape

    @pl.when(pl.program_id(0) == 0)
    def _():
        out_ref[...] = x_ref[...]

    x2d = out_ref[...].reshape(n * ls, e)

    # fused QKV projection (q = k = v = x)
    qkv = jnp.dot(x2d, wqkv_ref[0], preferred_element_type=jnp.float32) + bqkv_ref[0]
    q, k, v = qkv[:, :e], qkv[:, e:2 * e], qkv[:, 2 * e:]

    keep = jnp.broadcast_to(keep_ref[...][:, None, :] != 0.0, (n, ls, ls))
    attn = _mha(q, k, v, keep, n, ls, ls, wo_ref[0], bo_ref[0])

    x1 = _add_layernorm(attn, x2d, g1_ref[0], b1_ref[0])
    f = _ffn(x1, w1_ref[0], bf1_ref[0], w2_ref[0], bf2_ref[0])
    x2 = _add_layernorm(f, x1, g2_ref[0], b2_ref[0])

    out_ref[...] = x2.reshape(n, ls, e)


def _decoder_stack_kernel(xdec_ref, enc_ref, keep_ref,
                          swqkv_ref, sbqkv_ref, swo_ref, sbo_ref, ng_ref, nb_ref,
                          cwq_ref, cbq_ref, cwkv_ref, cbkv_ref, cwo_ref, cbo_ref,
                          g1_ref, b1_ref, g2_ref, b2_ref,
                          w1_ref, bf1_ref, w2_ref, bf2_ref,
                          fcw_ref, fcb_ref,
                          out_ref, act_ref):
    """grid=(NUM_LAYERS,).  Activation lives in VMEM scratch; only the final padded
    lane-dense logits slab (N*Lt, 128) is written to out_ref on the last layer."""
    n, lt, e = xdec_ref.shape
    ls = enc_ref.shape[1]

    @pl.when(pl.program_id(0) == 0)
    def _():
        act_ref[...] = xdec_ref[...].reshape(n * lt, e)

    x2d = act_ref[...]

    # ---- masked (causal) self-attention, fused QKV ----
    qkv = jnp.dot(x2d, swqkv_ref[0], preferred_element_type=jnp.float32) + sbqkv_ref[0]
    q, k, v = qkv[:, :e], qkv[:, e:2 * e], qkv[:, 2 * e:]
    row = lax.broadcasted_iota(jnp.int32, (lt, lt), 0)
    col = lax.broadcasted_iota(jnp.int32, (lt, lt), 1)
    causal = jnp.broadcast_to((row >= col)[None, :, :], (n, lt, lt))
    sattn = _mha(q, k, v, causal, n, lt, lt, swo_ref[0], sbo_ref[0])
    query = _add_layernorm(sattn, x2d, ng_ref[0], nb_ref[0])

    # ---- cross-attention (K/V from encoder output), fused KV ----
    enc2d = enc_ref[...].reshape(n * ls, e)
    qc = jnp.dot(query, cwq_ref[0], preferred_element_type=jnp.float32) + cbq_ref[0]
    kvc = jnp.dot(enc2d, cwkv_ref[0], preferred_element_type=jnp.float32) + cbkv_ref[0]
    kc, vc = kvc[:, :e], kvc[:, e:]
    keep = jnp.broadcast_to(keep_ref[...][:, None, :] != 0.0, (n, lt, ls))
    cattn = _mha(qc, kc, vc, keep, n, lt, ls, cwo_ref[0], cbo_ref[0])

    x1 = _add_layernorm(cattn, query, g1_ref[0], b1_ref[0])
    f = _ffn(x1, w1_ref[0], bf1_ref[0], w2_ref[0], bf2_ref[0])
    x2 = _add_layernorm(f, x1, g2_ref[0], b2_ref[0])
    act_ref[...] = x2

    # ---- final vocab projection (padded to 128 lanes), last layer only ----
    @pl.when(pl.program_id(0) == pl.num_programs(0) - 1)
    def _():
        out_ref[...] = (jnp.dot(x2, fcw_ref[...], preferred_element_type=jnp.float32)
                        + fcb_ref[...])


# ================================ pallas_call wrappers ===========================

def _cspec(a):
    """Full-array block with a constant block index (resident across the layer grid)."""
    nd = a.ndim
    return pl.BlockSpec(a.shape, lambda *_: (0,) * nd)


def _wspec(a):
    """Per-layer stacked weight: block (1, *rest), indexed by the layer grid step."""
    nd = a.ndim
    return pl.BlockSpec((1,) + tuple(a.shape[1:]), lambda l: (l,) + (0,) * (nd - 1))


def run_encoder(x_emb, src_keep, enc_pack):
    n, ls, e = x_emb.shape
    in_specs = [_cspec(x_emb), _cspec(src_keep)] + [_wspec(w) for w in enc_pack]
    return pl.pallas_call(
        _encoder_stack_kernel,
        out_shape=jax.ShapeDtypeStruct((n, ls, e), jnp.float32),
        grid=(NUM_LAYERS,),
        in_specs=in_specs,
        out_specs=pl.BlockSpec((n, ls, e), lambda l: (0, 0, 0)),
        compiler_params=pltpu.CompilerParams(dimension_semantics=("arbitrary",)),
    )(x_emb, src_keep, *enc_pack)


def run_decoder(x_emb, enc_out, src_keep, dec_pack, fcw_pad, fcb_pad):
    n, lt, e = x_emb.shape
    in_specs = ([_cspec(x_emb), _cspec(enc_out), _cspec(src_keep)]
                + [_wspec(w) for w in dec_pack]
                + [_cspec(fcw_pad), _cspec(fcb_pad)])
    return pl.pallas_call(
        _decoder_stack_kernel,
        out_shape=jax.ShapeDtypeStruct((n * lt, VOCAB_PAD), jnp.float32),
        grid=(NUM_LAYERS,),
        in_specs=in_specs,
        out_specs=pl.BlockSpec((n * lt, VOCAB_PAD), lambda l: (0, 0)),
        scratch_shapes=[pltpu.VMEM((n * lt, e), jnp.float32)],
        compiler_params=pltpu.CompilerParams(dimension_semantics=("arbitrary",)),
    )(x_emb, enc_out, src_keep, *dec_pack, fcw_pad, fcb_pad)


# ============================== parameter init (det.) ===========================

def _init_linear(key, out_dim, in_dim):
    k1, k2 = jax.random.split(key)
    w = jax.random.normal(k1, (out_dim, in_dim), jnp.float32) * 0.02   # PyTorch (out,in)
    b = jax.random.normal(k2, (1, out_dim), jnp.float32) * 0.02
    return w, b


def _init_attention(key):
    ks = jax.random.split(key, 4)
    wv, bv = _init_linear(ks[0], EMBED, EMBED)
    wk, bk = _init_linear(ks[1], EMBED, EMBED)
    wq, bq = _init_linear(ks[2], EMBED, EMBED)
    wo, bo = _init_linear(ks[3], EMBED, EMBED)
    return (wv, bv, wk, bk, wq, bq, wo, bo)


def _init_tblock(key):
    ks = jax.random.split(key, 3)
    w1, b1 = _init_linear(ks[1], FFN_HIDDEN, EMBED)
    w2, b2 = _init_linear(ks[2], EMBED, FFN_HIDDEN)
    return dict(
        attn=_init_attention(ks[0]),
        n1_g=jnp.ones((1, EMBED), jnp.float32), n1_b=jnp.zeros((1, EMBED), jnp.float32),
        n2_g=jnp.ones((1, EMBED), jnp.float32), n2_b=jnp.zeros((1, EMBED), jnp.float32),
        ff_w1=w1, ff_b1=b1, ff_w2=w2, ff_b2=b2)


def _init_dblock(key):
    ks = jax.random.split(key, 2)
    return dict(
        attn=_init_attention(ks[0]),
        n_g=jnp.ones((1, EMBED), jnp.float32), n_b=jnp.zeros((1, EMBED), jnp.float32),
        tblock=_init_tblock(ks[1]))


def init_params(key):
    ks = jax.random.split(key, 6 + 2 * NUM_LAYERS)
    enc_word = jax.random.normal(ks[0], (SRC_VOCAB, EMBED), jnp.float32) * 0.02
    enc_pos  = jax.random.normal(ks[1], (MAX_LEN, EMBED), jnp.float32) * 0.02
    dec_word = jax.random.normal(ks[2], (TGT_VOCAB, EMBED), jnp.float32) * 0.02
    dec_pos  = jax.random.normal(ks[3], (MAX_LEN, EMBED), jnp.float32) * 0.02
    fc_w, fc_b = _init_linear(ks[4], TGT_VOCAB, EMBED)
    enc_layers = [_init_tblock(ks[6 + i]) for i in range(NUM_LAYERS)]
    dec_layers = [_init_dblock(ks[6 + NUM_LAYERS + i]) for i in range(NUM_LAYERS)]
    return dict(enc_word=enc_word, enc_pos=enc_pos, dec_word=dec_word, dec_pos=dec_pos,
                fc_w=fc_w, fc_b=fc_b, enc_layers=enc_layers, dec_layers=dec_layers)


# ------------------- host-side weight packing (pre-transpose + fuse) -------------

def _pack_encoder_layers(layers):
    def one(p):
        wv, bv, wk, bk, wq, bq, wo, bo = p['attn']
        wqkv = jnp.concatenate([wq.T, wk.T, wv.T], axis=1)       # (E, 3E), order q,k,v
        bqkv = jnp.concatenate([bq, bk, bv], axis=1)             # (1, 3E)
        return [wqkv, bqkv, wo.T, bo,
                p['n1_g'], p['n1_b'], p['n2_g'], p['n2_b'],
                p['ff_w1'].T, p['ff_b1'], p['ff_w2'].T, p['ff_b2']]
    per = [one(p) for p in layers]
    return [jnp.stack([per[l][i] for l in range(len(layers))], axis=0)
            for i in range(len(per[0]))]


def _pack_decoder_layers(layers):
    def one(p):
        swv, sbv, swk, sbk, swq, sbq, swo, sbo = p['attn']
        swqkv = jnp.concatenate([swq.T, swk.T, swv.T], axis=1)   # (E, 3E)
        sbqkv = jnp.concatenate([sbq, sbk, sbv], axis=1)
        tb = p['tblock']
        cwv, cbv, cwk, cbk, cwq, cbq, cwo, cbo = tb['attn']
        cwkv = jnp.concatenate([cwk.T, cwv.T], axis=1)           # (E, 2E), order k,v
        cbkv = jnp.concatenate([cbk, cbv], axis=1)
        return [swqkv, sbqkv, swo.T, sbo, p['n_g'], p['n_b'],
                cwq.T, cbq, cwkv, cbkv, cwo.T, cbo,
                tb['n1_g'], tb['n1_b'], tb['n2_g'], tb['n2_b'],
                tb['ff_w1'].T, tb['ff_b1'], tb['ff_w2'].T, tb['ff_b2']]
    per = [one(p) for p in layers]
    return [jnp.stack([per[l][i] for l in range(len(layers))], axis=0)
            for i in range(len(per[0]))]


def pack_params(params):
    fcw_pad = jnp.zeros((EMBED, VOCAB_PAD), jnp.float32).at[:, :TGT_VOCAB].set(params['fc_w'].T)
    fcb_pad = jnp.zeros((1, VOCAB_PAD), jnp.float32).at[:, :TGT_VOCAB].set(params['fc_b'])
    return dict(
        enc_word=params['enc_word'], enc_pos=params['enc_pos'],
        dec_word=params['dec_word'], dec_pos=params['dec_pos'],
        enc_pack=_pack_encoder_layers(params['enc_layers']),
        dec_pack=_pack_decoder_layers(params['dec_layers']),
        fcw_pad=fcw_pad, fcb_pad=fcb_pad)


# ================================= model forward ================================

def transformer_forward(packed, src, tgt):
    n, src_len = src.shape
    _, tgt_len = tgt.shape

    # masks: only the (N, src_len) keep vector is materialized; causal mask is
    # built in-kernel with broadcasted_iota.  Dropout p=0 -> identity.
    src_keep = (src != SRC_PAD_IDX).astype(jnp.float32)

    # embeddings (gather) stay in plain JAX glue.
    enc_x = packed['enc_word'][src] + packed['enc_pos'][jnp.arange(src_len)][None]
    enc_out = run_encoder(enc_x, src_keep, packed['enc_pack'])          # (N, Ls, E)

    dec_x = packed['dec_word'][tgt] + packed['dec_pos'][jnp.arange(tgt_len)][None]
    logits_pad = run_decoder(dec_x, enc_out, src_keep, packed['dec_pack'],
                             packed['fcw_pad'], packed['fcb_pad'])      # (N*Lt, 128)

    return logits_pad[:, :TGT_VOCAB].reshape(n, tgt_len, TGT_VOCAB)


# ==================================== driver ====================================

if __name__ == "__main__":
    key = jax.random.PRNGKey(0)
    pkey, skey, tkey = jax.random.split(key, 3)

    params = init_params(pkey)
    packed = pack_params(params)

    N, SRC_LEN, TGT_LEN = 2, 8, 8
    src = jax.random.randint(skey, (N, SRC_LEN), 1, SRC_VOCAB, dtype=jnp.int32)
    src = src.at[:, -1].set(SRC_PAD_IDX)     # a padded position so src_mask is exercised
    tgt = jax.random.randint(tkey, (N, TGT_LEN), 1, TGT_VOCAB, dtype=jnp.int32)

    out = jax.jit(transformer_forward)(packed, src, tgt)
    out = jax.block_until_ready(out)
    assert out.shape == (N, TGT_LEN, TGT_VOCAB)
    assert bool(jnp.all(jnp.isfinite(out)))
    print("KERNEL_OK")
</pallas_src>

<mosaic_0001>
module attributes {stable_mosaic.version = 11 : i64} {
  func.func @_encoder_stack_kernel(%arg0: i32, %arg1: memref<2x8x32xf32, #tpu.memory_space<vmem>>, %arg2: memref<2x8xf32, #tpu.memory_space<vmem>>, %arg3: memref<1x32x96xf32, #tpu.memory_space<vmem>>, %arg4: memref<1x1x96xf32, #tpu.memory_space<vmem>>, %arg5: memref<1x32x32xf32, #tpu.memory_space<vmem>>, %arg6: memref<1x1x32xf32, #tpu.memory_space<vmem>>, %arg7: memref<1x1x32xf32, #tpu.memory_space<vmem>>, %arg8: memref<1x1x32xf32, #tpu.memory_space<vmem>>, %arg9: memref<1x1x32xf32, #tpu.memory_space<vmem>>, %arg10: memref<1x1x32xf32, #tpu.memory_space<vmem>>, %arg11: memref<1x32x128xf32, #tpu.memory_space<vmem>>, %arg12: memref<1x1x128xf32, #tpu.memory_space<vmem>>, %arg13: memref<1x128x32xf32, #tpu.memory_space<vmem>>, %arg14: memref<1x1x32xf32, #tpu.memory_space<vmem>>, %arg15: memref<2x8x32xf32, #tpu.memory_space<vmem>>) attributes {dimension_semantics = [#tpu.dimension_semantics<arbitrary>], iteration_bounds = array<i64: 2>, scalar_prefetch = 0 : i64, scratch_operands = 0 : i64, tpu.core_type = #tpu.core_type<tc>, window_params = [{pipeline_mode = #tpu.pipeline_mode<synchronous>, transform_indices = @transform_0, window_bounds = array<i64: 2, 8, 32>}, {pipeline_mode = #tpu.pipeline_mode<synchronous>, transform_indices = @transform_1, window_bounds = array<i64: 2, 8>}, {transform_indices = @transform_2, window_bounds = array<i64: 1, 32, 96>}, {transform_indices = @transform_3, window_bounds = array<i64: 1, 1, 96>}, {transform_indices = @transform_4, window_bounds = array<i64: 1, 32, 32>}, {transform_indices = @transform_5, window_bounds = array<i64: 1, 1, 32>}, {transform_indices = @transform_6, window_bounds = array<i64: 1, 1, 32>}, {transform_indices = @transform_7, window_bounds = array<i64: 1, 1, 32>}, {transform_indices = @transform_8, window_bounds = array<i64: 1, 1, 32>}, {transform_indices = @transform_9, window_bounds = array<i64: 1, 1, 32>}, {transform_indices = @transform_10, window_bounds = array<i64: 1, 32, 128>}, {transform_indices = @transform_11, window_bounds = array<i64: 1, 1, 128>}, {transform_indices = @transform_12, window_bounds = array<i64: 1, 128, 32>}, {transform_indices = @transform_13, window_bounds = array<i64: 1, 1, 32>}, {pipeline_mode = #tpu.pipeline_mode<synchronous>, transform_indices = @transform_14, window_bounds = array<i64: 2, 8, 32>}]} {
    %c0_i32 = arith.constant 0 : i32
    %0 = arith.cmpi eq, %arg0, %c0_i32 : i32
    %1 = arith.extui %0 : i1 to i32
    %c0_i32_0 = arith.constant 0 : i32
    %2 = arith.cmpi ne, %1, %c0_i32_0 : i32
    scf.if %2 {
      %c0_83 = arith.constant 0 : index
      %c0_84 = arith.constant 0 : index
      %c0_85 = arith.constant 0 : index
      %181 = vector.load %arg1[%c0_83, %c0_84, %c0_85] : memref<2x8x32xf32, #tpu.memory_space<vmem>>, vector<2x8x32xf32>
      %c0_86 = arith.constant 0 : index
      %c0_87 = arith.constant 0 : index
      %c0_88 = arith.constant 0 : index
      %182 = vector.load %arg15[%c0_86, %c0_87, %c0_88] : memref<2x8x32xf32, #tpu.memory_space<vmem>>, vector<2x8x32xf32>
      tpu.vector_store %arg15[%c0_86, %c0_87, %c0_88], %181 {strides = array<i32>} : memref<2x8x32xf32, #tpu.memory_space<vmem>>, vector<2x8x32xf32>,
    } else {
    }
    %c0 = arith.constant 0 : index
    %c0_1 = arith.constant 0 : index
    %c0_2 = arith.constant 0 : index
    %3 = vector.load %arg15[%c0, %c0_1, %c0_2] : memref<2x8x32xf32, #tpu.memory_space<vmem>>, vector<2x8x32xf32>
    %4 = vector.shape_cast %3 : vector<2x8x32xf32> to vector<16x32xf32>
    %c0_3 = arith.constant 0 : index
    %c0_4 = arith.constant 0 : index
    %c0_5 = arith.constant 0 : index
    %5 = vector.load %arg3[%c0_3, %c0_4, %c0_5] : memref<1x32x96xf32, #tpu.memory_space<vmem>>, vector<1x32x96xf32>
    %6 = vector.shape_cast %5 : vector<1x32x96xf32> to vector<32x96xf32>
    %cst = arith.constant dense<0.000000e+00> : vector<16x96xf32>
    %7 = tpu.matmul %4, %6, %cst {dimension_numbers = #tpu.dot_dimension_numbers<[1], [0], [0], [1], [0, 0, 1, 1], [], []>} : vector<16x32xf32>, vector<32x96xf32>, vector<16x96xf32> -> vector<16x96xf32>
    %c0_6 = arith.constant 0 : index
    %c0_7 = arith.constant 0 : index
    %c0_8 = arith.constant 0 : index
    %8 = vector.load %arg4[%c0_6, %c0_7, %c0_8] : memref<1x1x96xf32, #tpu.memory_space<vmem>>, vector<1x1x96xf32>
    %9 = vector.shape_cast %8 : vector<1x1x96xf32> to vector<1x96xf32>
    %10 = vector.broadcast %9 : vector<1x96xf32> to vector<16x96xf32>
    %11 = arith.addf %7, %10 : vector<16x96xf32>
    %12 = vector.extract_strided_slice %11 {offsets = [0, 0], sizes = [16, 32], strides = [1, 1]} : vector<16x96xf32> to vector<16x32xf32>
    %13 = vector.extract_strided_slice %11 {offsets = [0, 32], sizes = [16, 32], strides = [1, 1]} : vector<16x96xf32> to vector<16x32xf32>
    %14 = vector.extract_strided_slice %11 {offsets = [0, 64], sizes = [16, 32], strides = [1, 1]} : vector<16x96xf32> to vector<16x32xf32>
    %c0_9 = arith.constant 0 : index
    %c0_10 = arith.constant 0 : index
    %15 = vector.load %arg2[%c0_9, %c0_10] : memref<2x8xf32, #tpu.memory_space<vmem>>, vector<2x8xf32>
    %16 = vector.shape_cast %15 : vector<2x8xf32> to vector<2x1x8xf32>
    %cst_11 = arith.constant 0.000000e+00 : f32
    %17 = vector.broadcast %cst_11 : f32 to vector<2x1x8xf32>
    %18 = arith.cmpf one, %16, %17 : vector<2x1x8xf32>
    %19 = vector.shape_cast %18 : vector<2x1x8xi1> to vector<2x1x8xi1>
    %20 = vector.broadcast %19 : vector<2x1x8xi1> to vector<2x8x8xi1>
    %c0_12 = arith.constant 0 : index
    %c0_13 = arith.constant 0 : index
    %c0_14 = arith.constant 0 : index
    %21 = vector.load %arg5[%c0_12, %c0_13, %c0_14] : memref<1x32x32xf32, #tpu.memory_space<vmem>>, vector<1x32x32xf32>
    %22 = vector.shape_cast %21 : vector<1x32x32xf32> to vector<32x32xf32>
    %c0_15 = arith.constant 0 : index
    %c0_16 = arith.constant 0 : index
    %c0_17 = arith.constant 0 : index
    %23 = vector.load %arg6[%c0_15, %c0_16, %c0_17] : memref<1x1x32xf32, #tpu.memory_space<vmem>>, vector<1x1x32xf32>
    %24 = vector.shape_cast %23 : vector<1x1x32xf32> to vector<1x32xf32>
    %25 = vector.shape_cast %12 : vector<16x32xf32> to vector<2x8x32xf32>
    %26 = vector.shape_cast %13 : vector<16x32xf32> to vector<2x8x32xf32>
    %27 = vector.shape_cast %14 : vector<16x32xf32> to vector<2x8x32xf32>
    %28 = vector.extract_strided_slice %25 {offsets = [0, 0, 0], sizes = [2, 8, 8], strides = [1, 1, 1]} : vector<2x8x32xf32> to vector<2x8x8xf32>
    %29 = vector.extract_strided_slice %26 {offsets = [0, 0, 0], sizes = [2, 8, 8], strides = [1, 1, 1]} : vector<2x8x32xf32> to vector<2x8x8xf32>
    %30 = vector.extract_strided_slice %27 {offsets = [0, 0, 0], sizes = [2, 8, 8], strides = [1, 1, 1]} : vector<2x8x32xf32> to vector<2x8x8xf32>
    "tpu.trace_start"() <{level = 10 : i32, message = "bqd,bkd->bqk"}> : () -> ()
    %cst_18 = arith.constant dense<0.000000e+00> : vector<2x8x8xf32>
    %31 = tpu.matmul %28, %29, %cst_18 {dimension_numbers = #tpu.dot_dimension_numbers<[2], [2], [1], [1], [0, 0, 0, 1, 1, 1], [0], [0]>} : vector<2x8x8xf32>, vector<2x8x8xf32>, vector<2x8x8xf32> -> vector<2x8x8xf32>
    %cst_19 = arith.constant -1.000000e+20 : f32
    "tpu.trace_stop"() : () -> ()
    %32 = vector.broadcast %cst_19 : f32 to vector<2x8x8xf32>
    %33 = arith.select %20, %31, %32 : vector<2x8x8xi1>, vector<2x8x8xf32>
    %cst_20 = arith.constant 0.176776692 : f32
    %34 = vector.broadcast %cst_20 : f32 to vector<2x8x8xf32>
    %35 = arith.mulf %33, %34 : vector<2x8x8xf32>
    %cst_21 = arith.constant dense<0xFF800000> : vector<2x8xf32>
    %36 = vector.multi_reduction <maximumf>, %35, %cst_21 [2] : vector<2x8x8xf32> to vector<2x8xf32>
    %37 = vector.shape_cast %36 : vector<2x8xf32> to vector<2x8x1xf32>
    %38 = vector.broadcast %37 : vector<2x8x1xf32> to vector<2x8x8xf32>
    %39 = arith.subf %35, %38 : vector<2x8x8xf32>
    %40 = math.exp %39 : vector<2x8x8xf32>
    %cst_22 = arith.constant dense<0.000000e+00> : vector<2x8xf32>
    %41 = vector.multi_reduction <add>, %40, %cst_22 [2] : vector<2x8x8xf32> to vector<2x8xf32>
    %42 = vector.shape_cast %41 : vector<2x8xf32> to vector<2x8x1xf32>
    %43 = tpu.reciprocal %42 {approx = true} : vector<2x8x1xf32> -> vector<2x8x1xf32>
    %44 = vector.broadcast %43 : vector<2x8x1xf32> to vector<2x8x8xf32>
    %45 = arith.mulf %40, %44 : vector<2x8x8xf32>
    "tpu.trace_start"() <{level = 10 : i32, message = "bqk,bkd->bqd"}> : () -> ()
    %cst_23 = arith.constant dense<0.000000e+00> : vector<2x8x8xf32>
    %46 = tpu.matmul %45, %30, %cst_23 {dimension_numbers = #tpu.dot_dimension_numbers<[2], [1], [1], [2], [0, 0, 0, 1, 1, 2], [0], [0]>} : vector<2x8x8xf32>, vector<2x8x8xf32>, vector<2x8x8xf32> -> vector<2x8x8xf32>
    "tpu.trace_stop"() : () -> ()
    %47 = vector.extract_strided_slice %25 {offsets = [0, 0, 8], sizes = [2, 8, 8], strides = [1, 1, 1]} : vector<2x8x32xf32> to vector<2x8x8xf32>
    %48 = vector.extract_strided_slice %26 {offsets = [0, 0, 8], sizes = [2, 8, 8], strides = [1, 1, 1]} : vector<2x8x32xf32> to vector<2x8x8xf32>
    %49 = vector.extract_strided_slice %27 {offsets = [0, 0, 8], sizes = [2, 8, 8], strides = [1, 1, 1]} : vector<2x8x32xf32> to vector<2x8x8xf32>
    "tpu.trace_start"() <{level = 10 : i32, message = "bqd,bkd->bqk"}> : () -> ()
    %cst_24 = arith.constant dense<0.000000e+00> : vector<2x8x8xf32>
    %50 = tpu.matmul %47, %48, %cst_24 {dimension_numbers = #tpu.dot_dimension_numbers<[2], [2], [1], [1], [0, 0, 0, 1, 1, 1], [0], [0]>} : vector<2x8x8xf32>, vector<2x8x8xf32>, vector<2x8x8xf32> -> vector<2x8x8xf32>
    %cst_25 = arith.constant -1.000000e+20 : f32
    "tpu.trace_stop"() : () -> ()
    %51 = vector.broadcast %cst_25 : f32 to vector<2x8x8xf32>
    %52 = arith.select %20, %50, %51 : vector<2x8x8xi1>, vector<2x8x8xf32>
    %cst_26 = arith.constant 0.176776692 : f32
    %53 = vector.broadcast %cst_26 : f32 to vector<2x8x8xf32>
    %54 = arith.mulf %52, %53 : vector<2x8x8xf32>
    %cst_27 = arith.constant dense<0xFF800000> : vector<2x8xf32>
    %55 = vector.multi_reduction <maximumf>, %54, %cst_27 [2] : vector<2x8x8xf32> to vector<2x8xf32>
    %56 = vector.shape_cast %55 : vector<2x8xf32> to vector<2x8x1xf32>
    %57 = vector.broadcast %56 : vector<2x8x1xf32> to vector<2x8x8xf32>
    %58 = arith.subf %54, %57 : vector<2x8x8xf32>
    %59 = math.exp %58 : vector<2x8x8xf32>
    %cst_28 = arith.constant dense<0.000000e+00> : vector<2x8xf32>
    %60 = vector.multi_reduction <add>, %59, %cst_28 [2] : vector<2x8x8xf32> to vector<2x8xf32>
    %61 = vector.shape_cast %60 : vector<2x8xf32> to vector<2x8x1xf32>
    %62 = tpu.reciprocal %61 {approx = true} : vector<2x8x1xf32> -> vector<2x8x1xf32>
    %63 = vector.broadcast %62 : vector<2x8x1xf32> to vector<2x8x8xf32>
    %64 = arith.mulf %59, %63 : vector<2x8x8xf32>
    "tpu.trace_start"() <{level = 10 : i32, message = "bqk,bkd->bqd"}> : () -> ()
    %cst_29 = arith.constant dense<0.000000e+00> : vector<2x8x8xf32>
    %65 = tpu.matmul %64, %49, %cst_29 {dimension_numbers = #tpu.dot_dimension_numbers<[2], [1], [1], [2], [0, 0, 0, 1, 1, 2], [0], [0]>} : vector<2x8x8xf32>, vector<2x8x8xf32>, vector<2x8x8xf32> -> vector<2x8x8xf32>
    "tpu.trace_stop"() : () -> ()
    %66 = vector.extract_strided_slice %25 {offsets = [0, 0, 16], sizes = [2, 8, 8], strides = [1, 1, 1]} : vector<2x8x32xf32> to vector<2x8x8xf32>
    %67 = vector.extract_strided_slice %26 {offsets = [0, 0, 16], sizes = [2, 8, 8], strides = [1, 1, 1]} : vector<2x8x32xf32> to vector<2x8x8xf32>
    %68 = vector.extract_strided_slice %27 {offsets = [0, 0, 16], sizes = [2, 8, 8], strides = [1, 1, 1]} : vector<2x8x32xf32> to vector<2x8x8xf32>
    "tpu.trace_start"() <{level = 10 : i32, message = "bqd,bkd->bqk"}> : () -> ()
    %cst_30 = arith.constant dense<0.000000e+00> : vector<2x8x8xf32>
    %69 = tpu.matmul %66, %67, %cst_30 {dimension_numbers = #tpu.dot_dimension_numbers<[2], [2], [1], [1], [0, 0, 0, 1, 1, 1], [0], [0]>} : vector<2x8x8xf32>, vector<2x8x8xf32>, vector<2x8x8xf32> -> vector<2x8x8xf32>
    %cst_31 = arith.constant -1.000000e+20 : f32
    "tpu.trace_stop"() : () -> ()
    %70 = vector.broadcast %cst_31 : f32 to vector<2x8x8xf32>
    %71 = arith.select %20, %69, %70 : vector<2x8x8xi1>, vector<2x8x8xf32>
    %cst_32 = arith.constant 0.176776692 : f32
    %72 = vector.broadcast %cst_32 : f32 to vector<2x8x8xf32>
    %73 = arith.mulf %71, %72 : vector<2x8x8xf32>
    %cst_33 = arith.constant dense<0xFF800000> : vector<2x8xf32>
    %74 = vector.multi_reduction <maximumf>, %73, %cst_33 [2] : vector<2x8x8xf32> to vector<2x8xf32>
    %75 = vector.shape_cast %74 : vector<2x8xf32> to vector<2x8x1xf32>
    %76 = vector.broadcast %75 : vector<2x8x1xf32> to vector<2x8x8xf32>
    %77 = arith.subf %73, %76 : vector<2x8x8xf32>
    %78 = math.exp %77 : vector<2x8x8xf32>
    %cst_34 = arith.constant dense<0.000000e+00> : vector<2x8xf32>
    %79 = vector.multi_reduction <add>, %78, %cst_34 [2] : vector<2x8x8xf32> to vector<2x8xf32>
    %80 = vector.shape_cast %79 : vector<2x8xf32> to vector<2x8x1xf32>
    %81 = tpu.reciprocal %80 {approx = true} : vector<2x8x1xf32> -> vector<2x8x1xf32>
    %82 = vector.broadcast %81 : vector<2x8x1xf32> to vector<2x8x8xf32>
    %83 = arith.mulf %78, %82 : vector<2x8x8xf32>
    "tpu.trace_start"() <{level = 10 : i32, message = "bqk,bkd->bqd"}> : () -> ()
    %cst_35 = arith.constant dense<0.000000e+00> : vector<2x8x8xf32>
    %84 = tpu.matmul %83, %68, %cst_35 {dimension_numbers = #tpu.dot_dimension_numbers<[2], [1], [1], [2], [0, 0, 0, 1, 1, 2], [0], [0]>} : vector<2x8x8xf32>, vector<2x8x8xf32>, vector<2x8x8xf32> -> vector<2x8x8xf32>
    "tpu.trace_stop"() : () -> ()
    %85 = vector.extract_strided_slice %25 {offsets = [0, 0, 24], sizes = [2, 8, 8], strides = [1, 1, 1]} : vector<2x8x32xf32> to vector<2x8x8xf32>
    %86 = vector.extract_strided_slice %26 {offsets = [0, 0, 24], sizes = [2, 8, 8], strides = [1, 1, 1]} : vector<2x8x32xf32> to vector<2x8x8xf32>
    %87 = vector.extract_strided_slice %27 {offsets = [0, 0, 24], sizes = [2, 8, 8], strides = [1, 1, 1]} : vector<2x8x32xf32> to vector<2x8x8xf32>
    "tpu.trace_start"() <{level = 10 : i32, message = "bqd,bkd->bqk"}> : () -> ()
    %cst_36 = arith.constant dense<0.000000e+00> : vector<2x8x8xf32>
    %88 = tpu.matmul %85, %86, %cst_36 {dimension_numbers = #tpu.dot_dimension_numbers<[2], [2], [1], [1], [0, 0, 0, 1, 1, 1], [0], [0]>} : vector<2x8x8xf32>, vector<2x8x8xf32>, vector<2x8x8xf32> -> vector<2x8x8xf32>
    %cst_37 = arith.constant -1.000000e+20 : f32
    "tpu.trace_stop"() : () -> ()
    %89 = vector.broadcast %cst_37 : f32 to vector<2x8x8xf32>
    %90 = arith.select %20, %88, %89 : vector<2x8x8xi1>, vector<2x8x8xf32>
    %cst_38 = arith.constant 0.176776692 : f32
    %91 = vector.broadcast %cst_38 : f32 to vector<2x8x8xf32>
    %92 = arith.mulf %90, %91 : vector<2x8x8xf32>
    %cst_39 = arith.constant dense<0xFF800000> : vector<2x8xf32>
    %93 = vector.multi_reduction <maximumf>, %92, %cst_39 [2] : vector<2x8x8xf32> to vector<2x8xf32>
    %94 = vector.shape_cast %93 : vector<2x8xf32> to vector<2x8x1xf32>
    %95 = vector.broadcast %94 : vector<2x8x1xf32> to vector<2x8x8xf32>
    %96 = arith.subf %92, %95 : vector<2x8x8xf32>
    %97 = math.exp %96 : vector<2x8x8xf32>
    %cst_40 = arith.constant dense<0.000000e+00> : vector<2x8xf32>
    %98 = vector.multi_reduction <add>, %97, %cst_40 [2] : vector<2x8x8xf32> to vector<2x8xf32>
    %99 = vector.shape_cast %98 : vector<2x8xf32> to vector<2x8x1xf32>
    %100 = tpu.reciprocal %99 {approx = true} : vector<2x8x1xf32> -> vector<2x8x1xf32>
    %101 = vector.broadcast %100 : vector<2x8x1xf32> to vector<2x8x8xf32>
    %102 = arith.mulf %97, %101 : vector<2x8x8xf32>
    "tpu.trace_start"() <{level = 10 : i32, message = "bqk,bkd->bqd"}> : () -> ()
    %cst_41 = arith.constant dense<0.000000e+00> : vector<2x8x8xf32>
    %103 = tpu.matmul %102, %87, %cst_41 {dimension_numbers = #tpu.dot_dimension_numbers<[2], [1], [1], [2], [0, 0, 0, 1, 1, 2], [0], [0]>} : vector<2x8x8xf32>, vector<2x8x8xf32>, vector<2x8x8xf32> -> vector<2x8x8xf32>
    "tpu.trace_stop"() : () -> ()
    %104 = tpu.concatenate %46, %65, %84, %103 in 2 : vector<2x8x8xf32>, vector<2x8x8xf32>, vector<2x8x8xf32>, vector<2x8x8xf32> -> vector<2x8x32xf32>
    %105 = vector.shape_cast %104 : vector<2x8x32xf32> to vector<16x32xf32>
    %cst_42 = arith.constant dense<0.000000e+00> : vector<16x32xf32>
    %106 = tpu.matmul %105, %22, %cst_42 {dimension_numbers = #tpu.dot_dimension_numbers<[1], [0], [0], [1], [0, 0, 1, 1], [], []>} : vector<16x32xf32>, vector<32x32xf32>, vector<16x32xf32> -> vector<16x32xf32>
    %107 = vector.broadcast %24 : vector<1x32xf32> to vector<16x32xf32>
    %108 = arith.addf %106, %107 : vector<16x32xf32>
    %c0_43 = arith.constant 0 : index
    %c0_44 = arith.constant 0 : index
    %c0_45 = arith.constant 0 : index
    %109 = vector.load %arg7[%c0_43, %c0_44, %c0_45] : memref<1x1x32xf32, #tpu.memory_space<vmem>>, vector<1x1x32xf32>
    %110 = vector.shape_cast %109 : vector<1x1x32xf32> to vector<1x32xf32>
    %c0_46 = arith.constant 0 : index
    %c0_47 = arith.constant 0 : index
    %c0_48 = arith.constant 0 : index
    %111 = vector.load %arg8[%c0_46, %c0_47, %c0_48] : memref<1x1x32xf32, #tpu.memory_space<vmem>>, vector<1x1x32xf32>
    %112 = vector.shape_cast %111 : vector<1x1x32xf32> to vector<1x32xf32>
    %113 = arith.addf %108, %4 : vector<16x32xf32>
    %cst_49 = arith.constant dense<0.000000e+00> : vector<16xf32>
    %114 = vector.multi_reduction <add>, %113, %cst_49 [1] : vector<16x32xf32> to vector<16xf32>
    %115 = vector.shape_cast %114 : vector<16xf32> to vector<16x1xf32>
    %cst_50 = arith.constant 3.200000e+01 : f32
    %116 = vector.broadcast %cst_50 : f32 to vector<16x1xf32>
    %117 = arith.divf %115, %116 : vector<16x1xf32>
    %118 = vector.broadcast %117 : vector<16x1xf32> to vector<16x32xf32>
    %119 = arith.subf %113, %118 : vector<16x32xf32>
    %120 = arith.mulf %119, %119 : vector<16x32xf32>
    %cst_51 = arith.constant dense<0.000000e+00> : vector<16xf32>
    %121 = vector.multi_reduction <add>, %120, %cst_51 [1] : vector<16x32xf32> to vector<16xf32>
    %122 = vector.shape_cast %121 : vector<16xf32> to vector<16x1xf32>
    %cst_52 = arith.constant 3.200000e+01 : f32
    %123 = vector.broadcast %cst_52 : f32 to vector<16x1xf32>
    %124 = arith.divf %122, %123 : vector<16x1xf32>
    %125 = vector.broadcast %117 : vector<16x1xf32> to vector<16x32xf32>
    %126 = arith.subf %113, %125 : vector<16x32xf32>
    %cst_53 = arith.constant 9.99999974E-6 : f32
    %127 = vector.broadcast %cst_53 : f32 to vector<16x1xf32>
    %128 = arith.addf %124, %127 : vector<16x1xf32>
    %129 = math.rsqrt %128 : vector<16x1xf32>
    %130 = vector.broadcast %129 : vector<16x1xf32> to vector<16x32xf32>
    %131 = arith.mulf %126, %130 : vector<16x32xf32>
    %132 = vector.broadcast %110 : vector<1x32xf32> to vector<16x32xf32>
    %133 = arith.mulf %131, %132 : vector<16x32xf32>
    %134 = vector.broadcast %112 : vector<1x32xf32> to vector<16x32xf32>
    %135 = arith.addf %133, %134 : vector<16x32xf32>
    %c0_54 = arith.constant 0 : index
    %c0_55 = arith.constant 0 : index
    %c0_56 = arith.constant 0 : index
    %136 = vector.load %arg11[%c0_54, %c0_55, %c0_56] : memref<1x32x128xf32, #tpu.memory_space<vmem>>, vector<1x32x128xf32>
    %137 = vector.shape_cast %136 : vector<1x32x128xf32> to vector<32x128xf32>
    %c0_57 = arith.constant 0 : index
    %c0_58 = arith.constant 0 : index
    %c0_59 = arith.constant 0 : index
    %138 = vector.load %arg12[%c0_57, %c0_58, %c0_59] : memref<1x1x128xf32, #tpu.memory_space<vmem>>, vector<1x1x128xf32>
    %139 = vector.shape_cast %138 : vector<1x1x128xf32> to vector<1x128xf32>
    %c0_60 = arith.constant 0 : index
    %c0_61 = arith.constant 0 : index
    %c0_62 = arith.constant 0 : index
    %140 = vector.load %arg13[%c0_60, %c0_61, %c0_62] : memref<1x128x32xf32, #tpu.memory_space<vmem>>, vector<1x128x32xf32>
    %141 = vector.shape_cast %140 : vector<1x128x32xf32> to vector<128x32xf32>
    %c0_63 = arith.constant 0 : index
    %c0_64 = arith.constant 0 : index
    %c0_65 = arith.constant 0 : index
    %142 = vector.load %arg14[%c0_63, %c0_64, %c0_65] : memref<1x1x32xf32, #tpu.memory_space<vmem>>, vector<1x1x32xf32>
    %143 = vector.shape_cast %142 : vector<1x1x32xf32> to vector<1x32xf32>
    %cst_66 = arith.constant dense<0.000000e+00> : vector<16x128xf32>
    %144 = tpu.matmul %135, %137, %cst_66 {dimension_numbers = #tpu.dot_dimension_numbers<[1], [0], [0], [1], [0, 0, 1, 1], [], []>} : vector<16x32xf32>, vector<32x128xf32>, vector<16x128xf32> -> vector<16x128xf32>
    %145 = vector.broadcast %139 : vector<1x128xf32> to vector<16x128xf32>
    %146 = arith.addf %144, %145 : vector<16x128xf32>
    %cst_67 = arith.constant 0.000000e+00 : f32
    %147 = vector.broadcast %cst_67 : f32 to vector<16x128xf32>
    %148 = arith.maximumf %146, %147 : vector<16x128xf32>
    %cst_68 = arith.constant dense<0.000000e+00> : vector<16x32xf32>
    %149 = tpu.matmul %148, %141, %cst_68 {dimension_numbers = #tpu.dot_dimension_numbers<[1], [0], [0], [1], [0, 0, 1, 1], [], []>} : vector<16x128xf32>, vector<128x32xf32>, vector<16x32xf32> -> vector<16x32xf32>
    %150 = vector.broadcast %143 : vector<1x32xf32> to vector<16x32xf32>
    %151 = arith.addf %149, %150 : vector<16x32xf32>
    %c0_69 = arith.constant 0 : index
    %c0_70 = arith.constant 0 : index
    %c0_71 = arith.constant 0 : index
    %152 = vector.load %arg9[%c0_69, %c0_70, %c0_71] : memref<1x1x32xf32, #tpu.memory_space<vmem>>, vector<1x1x32xf32>
    %153 = vector.shape_cast %152 : vector<1x1x32xf32> to vector<1x32xf32>
    %c0_72 = arith.constant 0 : index
    %c0_73 = arith.constant 0 : index
    %c0_74 = arith.constant 0 : index
    %154 = vector.load %arg10[%c0_72, %c0_73, %c0_74] : memref<1x1x32xf32, #tpu.memory_space<vmem>>, vector<1x1x32xf32>
    %155 = vector.shape_cast %154 : vector<1x1x32xf32> to vector<1x32xf32>
    %156 = arith.addf %151, %135 : vector<16x32xf32>
    %cst_75 = arith.constant dense<0.000000e+00> : vector<16xf32>
    %157 = vector.multi_reduction <add>, %156, %cst_75 [1] : vector<16x32xf32> to vector<16xf32>
    %158 = vector.shape_cast %157 : vector<16xf32> to vector<16x1xf32>
    %cst_76 = arith.constant 3.200000e+01 : f32
    %159 = vector.broadcast %cst_76 : f32 to vector<16x1xf32>
    %160 = arith.divf %158, %159 : vector<16x1xf32>
    %161 = vector.broadcast %160 : vector<16x1xf32> to vector<16x32xf32>
    %162 = arith.subf %156, %161 : vector<16x32xf32>
    %163 = arith.mulf %162, %162 : vector<16x32xf32>
    %cst_77 = arith.constant dense<0.000000e+00> : vector<16xf32>
    %164 = vector.multi_reduction <add>, %163, %cst_77 [1] : vector<16x32xf32> to vector<16xf32>
    %165 = vector.shape_cast %164 : vector<16xf32> to vector<16x1xf32>
    %cst_78 = arith.constant 3.200000e+01 : f32
    %166 = vector.broadcast %cst_78 : f32 to vector<16x1xf32>
    %167 = arith.divf %165, %166 : vector<16x1xf32>
    %168 = vector.broadcast %160 : vector<16x1xf32> to vector<16x32xf32>
    %169 = arith.subf %156, %168 : vector<16x32xf32>
    %cst_79 = arith.constant 9.99999974E-6 : f32
    %170 = vector.broadcast %cst_79 : f32 to vector<16x1xf32>
    %171 = arith.addf %167, %170 : vector<16x1xf32>
    %172 = math.rsqrt %171 : vector<16x1xf32>
    %173 = vector.broadcast %172 : vector<16x1xf32> to vector<16x32xf32>
    %174 = arith.mulf %169, %173 : vector<16x32xf32>
    %175 = vector.broadcast %153 : vector<1x32xf32> to vector<16x32xf32>
    %176 = arith.mulf %174, %175 : vector<16x32xf32>
    %177 = vector.broadcast %155 : vector<1x32xf32> to vector<16x32xf32>
    %178 = arith.addf %176, %177 : vector<16x32xf32>
    %179 = vector.shape_cast %178 : vector<16x32xf32> to vector<2x8x32xf32>
    %c0_80 = arith.constant 0 : index
    %c0_81 = arith.constant 0 : index
    %c0_82 = arith.constant 0 : index
    %180 = vector.load %arg15[%c0_80, %c0_81, %c0_82] : memref<2x8x32xf32, #tpu.memory_space<vmem>>, vector<2x8x32xf32>
    tpu.vector_store %arg15[%c0_80, %c0_81, %c0_82], %179 {strides = array<i32>} : memref<2x8x32xf32, #tpu.memory_space<vmem>>, vector<2x8x32xf32>,
    return
  }
  func.func @transform_0(%arg0: i32) -> (i32, i32, i32) {
    %c0_i32 = arith.constant 0 : i32
    %c0_i32_0 = arith.constant 0 : i32
    %c0_i32_1 = arith.constant 0 : i32
    %c0_i32_2 = arith.constant 0 : i32
    return %c0_i32, %c0_i32_0, %c0_i32_1 : i32, i32, i32
  }
  func.func @transform_1(%arg0: i32) -> (i32, i32) {
    %c0_i32 = arith.constant 0 : i32
    %c0_i32_0 = arith.constant 0 : i32
    %c0_i32_1 = arith.constant 0 : i32
    return %c0_i32, %c0_i32_0 : i32, i32
  }
  func.func @transform_2(%arg0: i32) -> (i32, i32, i32) {
    %c0_i32 = arith.constant 0 : i32
    %c0_i32_0 = arith.constant 0 : i32
    %c0_i32_1 = arith.constant 0 : i32
    return %arg0, %c0_i32, %c0_i32_0 : i32, i32, i32
  }
  func.func @transform_3(%arg0: i32) -> (i32, i32, i32) {
    %c0_i32 = arith.constant 0 : i32
    %c0_i32_0 = arith.constant 0 : i32
    %c0_i32_1 = arith.constant 0 : i32
    return %arg0, %c0_i32, %c0_i32_0 : i32, i32, i32
  }
  func.func @transform_4(%arg0: i32) -> (i32, i32, i32) {
    %c0_i32 = arith.constant 0 : i32
    %c0_i32_0 = arith.constant 0 : i32
    %c0_i32_1 = arith.constant 0 : i32
    return %arg0, %c0_i32, %c0_i32_0 : i32, i32, i32
  }
  func.func @transform_5(%arg0: i32) -> (i32, i32, i32) {
    %c0_i32 = arith.constant 0 : i32
    %c0_i32_0 = arith.constant 0 : i32
    %c0_i32_1 = arith.constant 0 : i32
    return %arg0, %c0_i32, %c0_i32_0 : i32, i32, i32
  }
  func.func @transform_6(%arg0: i32) -> (i32, i32, i32) {
    %c0_i32 = arith.constant 0 : i32
    %c0_i32_0 = arith.constant 0 : i32
    %c0_i32_1 = arith.constant 0 : i32
    return %arg0, %c0_i32, %c0_i32_0 : i32, i32, i32
  }
  func.func @transform_7(%arg0: i32) -> (i32, i32, i32) {
    %c0_i32 = arith.constant 0 : i32
    %c0_i32_0 = arith.constant 0 : i32
    %c0_i32_1 = arith.constant 0 : i32
    return %arg0, %c0_i32, %c0_i32_0 : i32, i32, i32
  }
  func.func @transform_8(%arg0: i32) -> (i32, i32, i32) {
    %c0_i32 = arith.constant 0 : i32
    %c0_i32_0 = arith.constant 0 : i32
    %c0_i32_1 = arith.constant 0 : i32
    return %arg0, %c0_i32, %c0_i32_0 : i32, i32, i32
  }
  func.func @transform_9(%arg0: i32) -> (i32, i32, i32) {
    %c0_i32 = arith.constant 0 : i32
    %c0_i32_0 = arith.constant 0 : i32
    %c0_i32_1 = arith.constant 0 : i32
    return %arg0, %c0_i32, %c0_i32_0 : i32, i32, i32
  }
  func.func @transform_10(%arg0: i32) -> (i32, i32, i32) {
    %c0_i32 = arith.constant 0 : i32
    %c0_i32_0 = arith.constant 0 : i32
    %c0_i32_1 = arith.constant 0 : i32
    return %arg0, %c0_i32, %c0_i32_0 : i32, i32, i32
  }
  func.func @transform_11(%arg0: i32) -> (i32, i32, i32) {
    %c0_i32 = arith.constant 0 : i32
    %c0_i32_0 = arith.constant 0 : i32
    %c0_i32_1 = arith.constant 0 : i32
    return %arg0, %c0_i32, %c0_i32_0 : i32, i32, i32
  }
  func.func @transform_12(%arg0: i32) -> (i32, i32, i32) {
    %c0_i32 = arith.constant 0 : i32
    %c0_i32_0 = arith.constant 0 : i32
    %c0_i32_1 = arith.constant 0 : i32
    return %arg0, %c0_i32, %c0_i32_0 : i32, i32, i32
  }
  func.func @transform_13(%arg0: i32) -> (i32, i32, i32) {
    %c0_i32 = arith.constant 0 : i32
    %c0_i32_0 = arith.constant 0 : i32
    %c0_i32_1 = arith.constant 0 : i32
    return %arg0, %c0_i32, %c0_i32_0 : i32, i32, i32
  }
  func.func @transform_14(%arg0: i32) -> (i32, i32, i32) {
    %c0_i32 = arith.constant 0 : i32
    %c0_i32_0 = arith.constant 0 : i32
    %c0_i32_1 = arith.constant 0 : i32
    %c0_i32_2 = arith.constant 0 : i32
    return %c0_i32, %c0_i32_0, %c0_i32_1 : i32, i32, i32
  }
}

module attributes {stable_mosaic.version = 11 : i64} {
  func.func @_decoder_stack_kernel(%arg0: i32, %arg1: memref<2x8x32xf32, #tpu.memory_space<vmem>>, %arg2: memref<2x8x32xf32, #tpu.memory_space<vmem>>, %arg3: memref<2x8xf32, #tpu.memory_space<vmem>>, %arg4: memref<1x32x96xf32, #tpu.memory_space<vmem>>, %arg5: memref<1x1x96xf32, #tpu.memory_space<vmem>>, %arg6: memref<1x32x32xf32, #tpu.memory_space<vmem>>, %arg7: memref<1x1x32xf32, #tpu.memory_space<vmem>>, %arg8: memref<1x1x32xf32, #tpu.memory_space<vmem>>, %arg9: memref<1x1x32xf32, #tpu.memory_space<vmem>>, %arg10: memref<1x32x32xf32, #tpu.memory_space<vmem>>, %arg11: memref<1x1x32xf32, #tpu.memory_space<vmem>>, %arg12: memref<1x32x64xf32, #tpu.memory_space<vmem>>, %arg13: memref<1x1x64xf32, #tpu.memory_space<vmem>>, %arg14: memref<1x32x32xf32, #tpu.memory_space<vmem>>, %arg15: memref<1x1x32xf32, #tpu.memory_space<vmem>>, %arg16: memref<1x1x32xf32, #tpu.memory_space<vmem>>, %arg17: memref<1x1x32xf32, #tpu.memory_space<vmem>>, %arg18: memref<1x1x32xf32, #tpu.memory_space<vmem>>, %arg19: memref<1x1x32xf32, #tpu.memory_space<vmem>>, %arg20: memref<1x32x128xf32, #tpu.memory_space<vmem>>, %arg21: memref<1x1x128xf32, #tpu.memory_space<vmem>>, %arg22: memref<1x128x32xf32, #tpu.memory_space<vmem>>, %arg23: memref<1x1x32xf32, #tpu.memory_space<vmem>>, %arg24: memref<32x128xf32, #tpu.memory_space<vmem>>, %arg25: memref<1x128xf32, #tpu.memory_space<vmem>>, %arg26: memref<16x128xf32, #tpu.memory_space<vmem>>, %arg27: memref<16x32xf32, #tpu.memory_space<vmem>>) attributes {dimension_semantics = [#tpu.dimension_semantics<arbitrary>], iteration_bounds = array<i64: 2>, scalar_prefetch = 0 : i64, scratch_operands = 1 : i64, tpu.core_type = #tpu.core_type<tc>, window_params = [{pipeline_mode = #tpu.pipeline_mode<synchronous>, transform_indices = @transform_0, window_bounds = array<i64: 2, 8, 32>}, {pipeline_mode = #tpu.pipeline_mode<synchronous>, transform_indices = @transform_1, window_bounds = array<i64: 2, 8, 32>}, {pipeline_mode = #tpu.pipeline_mode<synchronous>, transform_indices = @transform_2, window_bounds = array<i64: 2, 8>}, {transform_indices = @transform_3, window_bounds = array<i64: 1, 32, 96>}, {transform_indices = @transform_4, window_bounds = array<i64: 1, 1, 96>}, {transform_indices = @transform_5, window_bounds = array<i64: 1, 32, 32>}, {transform_indices = @transform_6, window_bounds = array<i64: 1, 1, 32>}, {transform_indices = @transform_7, window_bounds = array<i64: 1, 1, 32>}, {transform_indices = @transform_8, window_bounds = array<i64: 1, 1, 32>}, {transform_indices = @transform_9, window_bounds = array<i64: 1, 32, 32>}, {transform_indices = @transform_10, window_bounds = array<i64: 1, 1, 32>}, {transform_indices = @transform_11, window_bounds = array<i64: 1, 32, 64>}, {transform_indices = @transform_12, window_bounds = array<i64: 1, 1, 64>}, {transform_indices = @transform_13, window_bounds = array<i64: 1, 32, 32>}, {transform_indices = @transform_14, window_bounds = array<i64: 1, 1, 32>}, {transform_indices = @transform_15, window_bounds = array<i64: 1, 1, 32>}, {transform_indices = @transform_16, window_bounds = array<i64: 1, 1, 32>}, {transform_indices = @transform_17, window_bounds = array<i64: 1, 1, 32>}, {transform_indices = @transform_18, window_bounds = array<i64: 1, 1, 32>}, {transform_indices = @transform_19, window_bounds = array<i64: 1, 32, 128>}, {transform_indices = @transform_20, window_bounds = array<i64: 1, 1, 128>}, {transform_indices = @transform_21, window_bounds = array<i64: 1, 128, 32>}, {transform_indices = @transform_22, window_bounds = array<i64: 1, 1, 32>}, {pipeline_mode = #tpu.pipeline_mode<synchronous>, transform_indices = @transform_23, window_bounds = array<i64: 32, 128>}, {pipeline_mode = #tpu.pipeline_mode<synchronous>, transform_indices = @transform_24, window_bounds = array<i64: 1, 128>}, {pipeline_mode = #tpu.pipeline_mode<synchronous>, transform_indices = @transform_25, window_bounds = array<i64: 16, 128>}]} {
    %c0_i32 = arith.constant 0 : i32
    %0 = arith.cmpi eq, %arg0, %c0_i32 : i32
    %1 = arith.extui %0 : i1 to i32
    %c0_i32_0 = arith.constant 0 : i32
    %2 = arith.cmpi ne, %1, %c0_i32_0 : i32
    scf.if %2 {
      %c0_141 = arith.constant 0 : index
      %c0_142 = arith.constant 0 : index
      %c0_143 = arith.constant 0 : index
      %321 = vector.load %arg1[%c0_141, %c0_142, %c0_143] : memref<2x8x32xf32, #tpu.memory_space<vmem>>, vector<2x8x32xf32>
      %322 = vector.shape_cast %321 : vector<2x8x32xf32> to vector<16x32xf32>
      %c0_144 = arith.constant 0 : index
      %c0_145 = arith.constant 0 : index
      %323 = vector.load %arg27[%c0_144, %c0_145] : memref<16x32xf32, #tpu.memory_space<vmem>>, vector<16x32xf32>
      tpu.vector_store %arg27[%c0_144, %c0_145], %322 {strides = array<i32>} : memref<16x32xf32, #tpu.memory_space<vmem>>, vector<16x32xf32>,
    } else {
    }
    %c0 = arith.constant 0 : index
    %c0_1 = arith.constant 0 : index
    %3 = vector.load %arg27[%c0, %c0_1] : memref<16x32xf32, #tpu.memory_space<vmem>>, vector<16x32xf32>
    %c0_2 = arith.constant 0 : index
    %c0_3 = arith.constant 0 : index
    %c0_4 = arith.constant 0 : index
    %4 = vector.load %arg4[%c0_2, %c0_3, %c0_4] : memref<1x32x96xf32, #tpu.memory_space<vmem>>, vector<1x32x96xf32>
    %5 = vector.shape_cast %4 : vector<1x32x96xf32> to vector<32x96xf32>
    %cst = arith.constant dense<0.000000e+00> : vector<16x96xf32>
    %6 = tpu.matmul %3, %5, %cst {dimension_numbers = #tpu.dot_dimension_numbers<[1], [0], [0], [1], [0, 0, 1, 1], [], []>} : vector<16x32xf32>, vector<32x96xf32>, vector<16x96xf32> -> vector<16x96xf32>
    %c0_5 = arith.constant 0 : index
    %c0_6 = arith.constant 0 : index
    %c0_7 = arith.constant 0 : index
    %7 = vector.load %arg5[%c0_5, %c0_6, %c0_7] : memref<1x1x96xf32, #tpu.memory_space<vmem>>, vector<1x1x96xf32>
    %8 = vector.shape_cast %7 : vector<1x1x96xf32> to vector<1x96xf32>
    %9 = vector.broadcast %8 : vector<1x96xf32> to vector<16x96xf32>
    %10 = arith.addf %6, %9 : vector<16x96xf32>
    %11 = vector.extract_strided_slice %10 {offsets = [0, 0], sizes = [16, 32], strides = [1, 1]} : vector<16x96xf32> to vector<16x32xf32>
    %12 = vector.extract_strided_slice %10 {offsets = [0, 32], sizes = [16, 32], strides = [1, 1]} : vector<16x96xf32> to vector<16x32xf32>
    %13 = vector.extract_strided_slice %10 {offsets = [0, 64], sizes = [16, 32], strides = [1, 1]} : vector<16x96xf32> to vector<16x32xf32>
    %14 = tpu.iota {dimensions = array<i32: 0>} : vector<8x8xi32>
    %15 = tpu.iota {dimensions = array<i32: 1>} : vector<8x8xi32>
    %16 = arith.cmpi sge, %14, %15 : vector<8x8xi32>
    %17 = vector.shape_cast %16 : vector<8x8xi1> to vector<1x8x8xi1>
    %18 = vector.shape_cast %17 : vector<1x8x8xi1> to vector<1x8x8xi1>
    %19 = vector.broadcast %18 : vector<1x8x8xi1> to vector<2x8x8xi1>
    %c0_8 = arith.constant 0 : index
    %c0_9 = arith.constant 0 : index
    %c0_10 = arith.constant 0 : index
    %20 = vector.load %arg6[%c0_8, %c0_9, %c0_10] : memref<1x32x32xf32, #tpu.memory_space<vmem>>, vector<1x32x32xf32>
    %21 = vector.shape_cast %20 : vector<1x32x32xf32> to vector<32x32xf32>
    %c0_11 = arith.constant 0 : index
    %c0_12 = arith.constant 0 : index
    %c0_13 = arith.constant 0 : index
    %22 = vector.load %arg7[%c0_11, %c0_12, %c0_13] : memref<1x1x32xf32, #tpu.memory_space<vmem>>, vector<1x1x32xf32>
    %23 = vector.shape_cast %22 : vector<1x1x32xf32> to vector<1x32xf32>
    %24 = vector.shape_cast %11 : vector<16x32xf32> to vector<2x8x32xf32>
    %25 = vector.shape_cast %12 : vector<16x32xf32> to vector<2x8x32xf32>
    %26 = vector.shape_cast %13 : vector<16x32xf32> to vector<2x8x32xf32>
    %27 = vector.extract_strided_slice %24 {offsets = [0, 0, 0], sizes = [2, 8, 8], strides = [1, 1, 1]} : vector<2x8x32xf32> to vector<2x8x8xf32>
    %28 = vector.extract_strided_slice %25 {offsets = [0, 0, 0], sizes = [2, 8, 8], strides = [1, 1, 1]} : vector<2x8x32xf32> to vector<2x8x8xf32>
    %29 = vector.extract_strided_slice %26 {offsets = [0, 0, 0], sizes = [2, 8, 8], strides = [1, 1, 1]} : vector<2x8x32xf32> to vector<2x8x8xf32>
    "tpu.trace_start"() <{level = 10 : i32, message = "bqd,bkd->bqk"}> : () -> ()
    %cst_14 = arith.constant dense<0.000000e+00> : vector<2x8x8xf32>
    %30 = tpu.matmul %27, %28, %cst_14 {dimension_numbers = #tpu.dot_dimension_numbers<[2], [2], [1], [1], [0, 0, 0, 1, 1, 1], [0], [0]>} : vector<2x8x8xf32>, vector<2x8x8xf32>, vector<2x8x8xf32> -> vector<2x8x8xf32>
    %cst_15 = arith.constant -1.000000e+20 : f32
    "tpu.trace_stop"() : () -> ()
    %31 = vector.broadcast %cst_15 : f32 to vector<2x8x8xf32>
    %32 = arith.select %19, %30, %31 : vector<2x8x8xi1>, vector<2x8x8xf32>
    %cst_16 = arith.constant 0.176776692 : f32
    %33 = vector.broadcast %cst_16 : f32 to vector<2x8x8xf32>
    %34 = arith.mulf %32, %33 : vector<2x8x8xf32>
    %cst_17 = arith.constant dense<0xFF800000> : vector<2x8xf32>
    %35 = vector.multi_reduction <maximumf>, %34, %cst_17 [2] : vector<2x8x8xf32> to vector<2x8xf32>
    %36 = vector.shape_cast %35 : vector<2x8xf32> to vector<2x8x1xf32>
    %37 = vector.broadcast %36 : vector<2x8x1xf32> to vector<2x8x8xf32>
    %38 = arith.subf %34, %37 : vector<2x8x8xf32>
    %39 = math.exp %38 : vector<2x8x8xf32>
    %cst_18 = arith.constant dense<0.000000e+00> : vector<2x8xf32>
    %40 = vector.multi_reduction <add>, %39, %cst_18 [2] : vector<2x8x8xf32> to vector<2x8xf32>
    %41 = vector.shape_cast %40 : vector<2x8xf32> to vector<2x8x1xf32>
    %42 = tpu.reciprocal %41 {approx = true} : vector<2x8x1xf32> -> vector<2x8x1xf32>
    %43 = vector.broadcast %42 : vector<2x8x1xf32> to vector<2x8x8xf32>
    %44 = arith.mulf %39, %43 : vector<2x8x8xf32>
    "tpu.trace_start"() <{level = 10 : i32, message = "bqk,bkd->bqd"}> : () -> ()
    %cst_19 = arith.constant dense<0.000000e+00> : vector<2x8x8xf32>
    %45 = tpu.matmul %44, %29, %cst_19 {dimension_numbers = #tpu.dot_dimension_numbers<[2], [1], [1], [2], [0, 0, 0, 1, 1, 2], [0], [0]>} : vector<2x8x8xf32>, vector<2x8x8xf32>, vector<2x8x8xf32> -> vector<2x8x8xf32>
    "tpu.trace_stop"() : () -> ()
    %46 = vector.extract_strided_slice %24 {offsets = [0, 0, 8], sizes = [2, 8, 8], strides = [1, 1, 1]} : vector<2x8x32xf32> to vector<2x8x8xf32>
    %47 = vector.extract_strided_slice %25 {offsets = [0, 0, 8], sizes = [2, 8, 8], strides = [1, 1, 1]} : vector<2x8x32xf32> to vector<2x8x8xf32>
    %48 = vector.extract_strided_slice %26 {offsets = [0, 0, 8], sizes = [2, 8, 8], strides = [1, 1, 1]} : vector<2x8x32xf32> to vector<2x8x8xf32>
    "tpu.trace_start"() <{level = 10 : i32, message = "bqd,bkd->bqk"}> : () -> ()
    %cst_20 = arith.constant dense<0.000000e+00> : vector<2x8x8xf32>
    %49 = tpu.matmul %46, %47, %cst_20 {dimension_numbers = #tpu.dot_dimension_numbers<[2], [2], [1], [1], [0, 0, 0, 1, 1, 1], [0], [0]>} : vector<2x8x8xf32>, vector<2x8x8xf32>, vector<2x8x8xf32> -> vector<2x8x8xf32>
    %cst_21 = arith.constant -1.000000e+20 : f32
    "tpu.trace_stop"() : () -> ()
    %50 = vector.broadcast %cst_21 : f32 to vector<2x8x8xf32>
    %51 = arith.select %19, %49, %50 : vector<2x8x8xi1>, vector<2x8x8xf32>
    %cst_22 = arith.constant 0.176776692 : f32
    %52 = vector.broadcast %cst_22 : f32 to vector<2x8x8xf32>
    %53 = arith.mulf %51, %52 : vector<2x8x8xf32>
    %cst_23 = arith.constant dense<0xFF800000> : vector<2x8xf32>
    %54 = vector.multi_reduction <maximumf>, %53, %cst_23 [2] : vector<2x8x8xf32> to vector<2x8xf32>
    %55 = vector.shape_cast %54 : vector<2x8xf32> to vector<2x8x1xf32>
    %56 = vector.broadcast %55 : vector<2x8x1xf32> to vector<2x8x8xf32>
    %57 = arith.subf %53, %56 : vector<2x8x8xf32>
    %58 = math.exp %57 : vector<2x8x8xf32>
    %cst_24 = arith.constant dense<0.000000e+00> : vector<2x8xf32>
    %59 = vector.multi_reduction <add>, %58, %cst_24 [2] : vector<2x8x8xf32> to vector<2x8xf32>
    %60 = vector.shape_cast %59 : vector<2x8xf32> to vector<2x8x1xf32>
    %61 = tpu.reciprocal %60 {approx = true} : vector<2x8x1xf32> -> vector<2x8x1xf32>
    %62 = vector.broadcast %61 : vector<2x8x1xf32> to vector<2x8x8xf32>
    %63 = arith.mulf %58, %62 : vector<2x8x8xf32>
    "tpu.trace_start"() <{level = 10 : i32, message = "bqk,bkd->bqd"}> : () -> ()
    %cst_25 = arith.constant dense<0.000000e+00> : vector<2x8x8xf32>
    %64 = tpu.matmul %63, %48, %cst_25 {dimension_numbers = #tpu.dot_dimension_numbers<[2], [1], [1], [2], [0, 0, 0, 1, 1, 2], [0], [0]>} : vector<2x8x8xf32>, vector<2x8x8xf32>, vector<2x8x8xf32> -> vector<2x8x8xf32>
    "tpu.trace_stop"() : () -> ()
    %65 = vector.extract_strided_slice %24 {offsets = [0, 0, 16], sizes = [2, 8, 8], strides = [1, 1, 1]} : vector<2x8x32xf32> to vector<2x8x8xf32>
    %66 = vector.extract_strided_slice %25 {offsets = [0, 0, 16], sizes = [2, 8, 8], strides = [1, 1, 1]} : vector<2x8x32xf32> to vector<2x8x8xf32>
    %67 = vector.extract_strided_slice %26 {offsets = [0, 0, 16], sizes = [2, 8, 8], strides = [1, 1, 1]} : vector<2x8x32xf32> to vector<2x8x8xf32>
    "tpu.trace_start"() <{level = 10 : i32, message = "bqd,bkd->bqk"}> : () -> ()
    %cst_26 = arith.constant dense<0.000000e+00> : vector<2x8x8xf32>
    %68 = tpu.matmul %65, %66, %cst_26 {dimension_numbers = #tpu.dot_dimension_numbers<[2], [2], [1], [1], [0, 0, 0, 1, 1, 1], [0], [0]>} : vector<2x8x8xf32>, vector<2x8x8xf32>, vector<2x8x8xf32> -> vector<2x8x8xf32>
    %cst_27 = arith.constant -1.000000e+20 : f32
    "tpu.trace_stop"() : () -> ()
    %69 = vector.broadcast %cst_27 : f32 to vector<2x8x8xf32>
    %70 = arith.select %19, %68, %69 : vector<2x8x8xi1>, vector<2x8x8xf32>
    %cst_28 = arith.constant 0.176776692 : f32
    %71 = vector.broadcast %cst_28 : f32 to vector<2x8x8xf32>
    %72 = arith.mulf %70, %71 : vector<2x8x8xf32>
    %cst_29 = arith.constant dense<0xFF800000> : vector<2x8xf32>
    %73 = vector.multi_reduction <maximumf>, %72, %cst_29 [2] : vector<2x8x8xf32> to vector<2x8xf32>
    %74 = vector.shape_cast %73 : vector<2x8xf32> to vector<2x8x1xf32>
    %75 = vector.broadcast %74 : vector<2x8x1xf32> to vector<2x8x8xf32>
    %76 = arith.subf %72, %75 : vector<2x8x8xf32>
    %77 = math.exp %76 : vector<2x8x8xf32>
    %cst_30 = arith.constant dense<0.000000e+00> : vector<2x8xf32>
    %78 = vector.multi_reduction <add>, %77, %cst_30 [2] : vector<2x8x8xf32> to vector<2x8xf32>
    %79 = vector.shape_cast %78 : vector<2x8xf32> to vector<2x8x1xf32>
    %80 = tpu.reciprocal %79 {approx = true} : vector<2x8x1xf32> -> vector<2x8x1xf32>
    %81 = vector.broadcast %80 : vector<2x8x1xf32> to vector<2x8x8xf32>
    %82 = arith.mulf %77, %81 : vector<2x8x8xf32>
    "tpu.trace_start"() <{level = 10 : i32, message = "bqk,bkd->bqd"}> : () -> ()
    %cst_31 = arith.constant dense<0.000000e+00> : vector<2x8x8xf32>
    %83 = tpu.matmul %82, %67, %cst_31 {dimension_numbers = #tpu.dot_dimension_numbers<[2], [1], [1], [2], [0, 0, 0, 1, 1, 2], [0], [0]>} : vector<2x8x8xf32>, vector<2x8x8xf32>, vector<2x8x8xf32> -> vector<2x8x8xf32>
    "tpu.trace_stop"() : () -> ()
    %84 = vector.extract_strided_slice %24 {offsets = [0, 0, 24], sizes = [2, 8, 8], strides = [1, 1, 1]} : vector<2x8x32xf32> to vector<2x8x8xf32>
    %85 = vector.extract_strided_slice %25 {offsets = [0, 0, 24], sizes = [2, 8, 8], strides = [1, 1, 1]} : vector<2x8x32xf32> to vector<2x8x8xf32>
    %86 = vector.extract_strided_slice %26 {offsets = [0, 0, 24], sizes = [2, 8, 8], strides = [1, 1, 1]} : vector<2x8x32xf32> to vector<2x8x8xf32>
    "tpu.trace_start"() <{level = 10 : i32, message = "bqd,bkd->bqk"}> : () -> ()
    %cst_32 = arith.constant dense<0.000000e+00> : vector<2x8x8xf32>
    %87 = tpu.matmul %84, %85, %cst_32 {dimension_numbers = #tpu.dot_dimension_numbers<[2], [2], [1], [1], [0, 0, 0, 1, 1, 1], [0], [0]>} : vector<2x8x8xf32>, vector<2x8x8xf32>, vector<2x8x8xf32> -> vector<2x8x8xf32>
    %cst_33 = arith.constant -1.000000e+20 : f32
    "tpu.trace_stop"() : () -> ()
    %88 = vector.broadcast %cst_33 : f32 to vector<2x8x8xf32>
    %89 = arith.select %19, %87, %88 : vector<2x8x8xi1>, vector<2x8x8xf32>
    %cst_34 = arith.constant 0.176776692 : f32
    %90 = vector.broadcast %cst_34 : f32 to vector<2x8x8xf32>
    %91 = arith.mulf %89, %90 : vector<2x8x8xf32>
    %cst_35 = arith.constant dense<0xFF800000> : vector<2x8xf32>
    %92 = vector.multi_reduction <maximumf>, %91, %cst_35 [2] : vector<2x8x8xf32> to vector<2x8xf32>
    %93 = vector.shape_cast %92 : vector<2x8xf32> to vector<2x8x1xf32>
    %94 = vector.broadcast %93 : vector<2x8x1xf32> to vector<2x8x8xf32>
    %95 = arith.subf %91, %94 : vector<2x8x8xf32>
    %96 = math.exp %95 : vector<2x8x8xf32>
    %cst_36 = arith.constant dense<0.000000e+00> : vector<2x8xf32>
    %97 = vector.multi_reduction <add>, %96, %cst_36 [2] : vector<2x8x8xf32> to vector<2x8xf32>
    %98 = vector.shape_cast %97 : vector<2x8xf32> to vector<2x8x1xf32>
    %99 = tpu.reciprocal %98 {approx = true} : vector<2x8x1xf32> -> vector<2x8x1xf32>
    %100 = vector.broadcast %99 : vector<2x8x1xf32> to vector<2x8x8xf32>
    %101 = arith.mulf %96, %100 : vector<2x8x8xf32>
    "tpu.trace_start"() <{level = 10 : i32, message = "bqk,bkd->bqd"}> : () -> ()
    %cst_37 = arith.constant dense<0.000000e+00> : vector<2x8x8xf32>
    %102 = tpu.matmul %101, %86, %cst_37 {dimension_numbers = #tpu.dot_dimension_numbers<[2], [1], [1], [2], [0, 0, 0, 1, 1, 2], [0], [0]>} : vector<2x8x8xf32>, vector<2x8x8xf32>, vector<2x8x8xf32> -> vector<2x8x8xf32>
    "tpu.trace_stop"() : () -> ()
    %103 = tpu.concatenate %45, %64, %83, %102 in 2 : vector<2x8x8xf32>, vector<2x8x8xf32>, vector<2x8x8xf32>, vector<2x8x8xf32> -> vector<2x8x32xf32>
    %104 = vector.shape_cast %103 : vector<2x8x32xf32> to vector<16x32xf32>
    %cst_38 = arith.constant dense<0.000000e+00> : vector<16x32xf32>
    %105 = tpu.matmul %104, %21, %cst_38 {dimension_numbers = #tpu.dot_dimension_numbers<[1], [0], [0], [1], [0, 0, 1, 1], [], []>} : vector<16x32xf32>, vector<32x32xf32>, vector<16x32xf32> -> vector<16x32xf32>
    %106 = vector.broadcast %23 : vector<1x32xf32> to vector<16x32xf32>
    %107 = arith.addf %105, %106 : vector<16x32xf32>
    %c0_39 = arith.constant 0 : index
    %c0_40 = arith.constant 0 : index
    %c0_41 = arith.constant 0 : index
    %108 = vector.load %arg8[%c0_39, %c0_40, %c0_41] : memref<1x1x32xf32, #tpu.memory_space<vmem>>, vector<1x1x32xf32>
    %109 = vector.shape_cast %108 : vector<1x1x32xf32> to vector<1x32xf32>
    %c0_42 = arith.constant 0 : index
    %c0_43 = arith.constant 0 : index
    %c0_44 = arith.constant 0 : index
    %110 = vector.load %arg9[%c0_42, %c0_43, %c0_44] : memref<1x1x32xf32, #tpu.memory_space<vmem>>, vector<1x1x32xf32>
    %111 = vector.shape_cast %110 : vector<1x1x32xf32> to vector<1x32xf32>
    %112 = arith.addf %107, %3 : vector<16x32xf32>
    %cst_45 = arith.constant dense<0.000000e+00> : vector<16xf32>
    %113 = vector.multi_reduction <add>, %112, %cst_45 [1] : vector<16x32xf32> to vector<16xf32>
    %114 = vector.shape_cast %113 : vector<16xf32> to vector<16x1xf32>
    %cst_46 = arith.constant 3.200000e+01 : f32
    %115 = vector.broadcast %cst_46 : f32 to vector<16x1xf32>
    %116 = arith.divf %114, %115 : vector<16x1xf32>
    %117 = vector.broadcast %116 : vector<16x1xf32> to vector<16x32xf32>
    %118 = arith.subf %112, %117 : vector<16x32xf32>
    %119 = arith.mulf %118, %118 : vector<16x32xf32>
    %cst_47 = arith.constant dense<0.000000e+00> : vector<16xf32>
    %120 = vector.multi_reduction <add>, %119, %cst_47 [1] : vector<16x32xf32> to vector<16xf32>
    %121 = vector.shape_cast %120 : vector<16xf32> to vector<16x1xf32>
    %cst_48 = arith.constant 3.200000e+01 : f32
    %122 = vector.broadcast %cst_48 : f32 to vector<16x1xf32>
    %123 = arith.divf %121, %122 : vector<16x1xf32>
    %124 = vector.broadcast %116 : vector<16x1xf32> to vector<16x32xf32>
    %125 = arith.subf %112, %124 : vector<16x32xf32>
    %cst_49 = arith.constant 9.99999974E-6 : f32
    %126 = vector.broadcast %cst_49 : f32 to vector<16x1xf32>
    %127 = arith.addf %123, %126 : vector<16x1xf32>
    %128 = math.rsqrt %127 : vector<16x1xf32>
    %129 = vector.broadcast %128 : vector<16x1xf32> to vector<16x32xf32>
    %130 = arith.mulf %125, %129 : vector<16x32xf32>
    %131 = vector.broadcast %109 : vector<1x32xf32> to vector<16x32xf32>
    %132 = arith.mulf %130, %131 : vector<16x32xf32>
    %133 = vector.broadcast %111 : vector<1x32xf32> to vector<16x32xf32>
    %134 = arith.addf %132, %133 : vector<16x32xf32>
    %c0_50 = arith.constant 0 : index
    %c0_51 = arith.constant 0 : index
    %c0_52 = arith.constant 0 : index
    %135 = vector.load %arg2[%c0_50, %c0_51, %c0_52] : memref<2x8x32xf32, #tpu.memory_space<vmem>>, vector<2x8x32xf32>
    %136 = vector.shape_cast %135 : vector<2x8x32xf32> to vector<16x32xf32>
    %c0_53 = arith.constant 0 : index
    %c0_54 = arith.constant 0 : index
    %c0_55 = arith.constant 0 : index
    %137 = vector.load %arg10[%c0_53, %c0_54, %c0_55] : memref<1x32x32xf32, #tpu.memory_space<vmem>>, vector<1x32x32xf32>
    %138 = vector.shape_cast %137 : vector<1x32x32xf32> to vector<32x32xf32>
    %cst_56 = arith.constant dense<0.000000e+00> : vector<16x32xf32>
    %139 = tpu.matmul %134, %138, %cst_56 {dimension_numbers = #tpu.dot_dimension_numbers<[1], [0], [0], [1], [0, 0, 1, 1], [], []>} : vector<16x32xf32>, vector<32x32xf32>, vector<16x32xf32> -> vector<16x32xf32>
    %c0_57 = arith.constant 0 : index
    %c0_58 = arith.constant 0 : index
    %c0_59 = arith.constant 0 : index
    %140 = vector.load %arg11[%c0_57, %c0_58, %c0_59] : memref<1x1x32xf32, #tpu.memory_space<vmem>>, vector<1x1x32xf32>
    %141 = vector.shape_cast %140 : vector<1x1x32xf32> to vector<1x32xf32>
    %142 = vector.broadcast %141 : vector<1x32xf32> to vector<16x32xf32>
    %143 = arith.addf %139, %142 : vector<16x32xf32>
    %c0_60 = arith.constant 0 : index
    %c0_61 = arith.constant 0 : index
    %c0_62 = arith.constant 0 : index
    %144 = vector.load %arg12[%c0_60, %c0_61, %c0_62] : memref<1x32x64xf32, #tpu.memory_space<vmem>>, vector<1x32x64xf32>
    %145 = vector.shape_cast %144 : vector<1x32x64xf32> to vector<32x64xf32>
    %cst_63 = arith.constant dense<0.000000e+00> : vector<16x64xf32>
    %146 = tpu.matmul %136, %145, %cst_63 {dimension_numbers = #tpu.dot_dimension_numbers<[1], [0], [0], [1], [0, 0, 1, 1], [], []>} : vector<16x32xf32>, vector<32x64xf32>, vector<16x64xf32> -> vector<16x64xf32>
    %c0_64 = arith.constant 0 : index
    %c0_65 = arith.constant 0 : index
    %c0_66 = arith.constant 0 : index
    %147 = vector.load %arg13[%c0_64, %c0_65, %c0_66] : memref<1x1x64xf32, #tpu.memory_space<vmem>>, vector<1x1x64xf32>
    %148 = vector.shape_cast %147 : vector<1x1x64xf32> to vector<1x64xf32>
    %149 = vector.broadcast %148 : vector<1x64xf32> to vector<16x64xf32>
    %150 = arith.addf %146, %149 : vector<16x64xf32>
    %151 = vector.extract_strided_slice %150 {offsets = [0, 0], sizes = [16, 32], strides = [1, 1]} : vector<16x64xf32> to vector<16x32xf32>
    %152 = vector.extract_strided_slice %150 {offsets = [0, 32], sizes = [16, 32], strides = [1, 1]} : vector<16x64xf32> to vector<16x32xf32>
    %c0_67 = arith.constant 0 : index
    %c0_68 = arith.constant 0 : index
    %153 = vector.load %arg3[%c0_67, %c0_68] : memref<2x8xf32, #tpu.memory_space<vmem>>, vector<2x8xf32>
    %154 = vector.shape_cast %153 : vector<2x8xf32> to vector<2x1x8xf32>
    %cst_69 = arith.constant 0.000000e+00 : f32
    %155 = vector.broadcast %cst_69 : f32 to vector<2x1x8xf32>
    %156 = arith.cmpf one, %154, %155 : vector<2x1x8xf32>
    %157 = vector.shape_cast %156 : vector<2x1x8xi1> to vector<2x1x8xi1>
    %158 = vector.broadcast %157 : vector<2x1x8xi1> to vector<2x8x8xi1>
    %c0_70 = arith.constant 0 : index
    %c0_71 = arith.constant 0 : index
    %c0_72 = arith.constant 0 : index
    %159 = vector.load %arg14[%c0_70, %c0_71, %c0_72] : memref<1x32x32xf32, #tpu.memory_space<vmem>>, vector<1x32x32xf32>
    %160 = vector.shape_cast %159 : vector<1x32x32xf32> to vector<32x32xf32>
    %c0_73 = arith.constant 0 : index
    %c0_74 = arith.constant 0 : index
    %c0_75 = arith.constant 0 : index
    %161 = vector.load %arg15[%c0_73, %c0_74, %c0_75] : memref<1x1x32xf32, #tpu.memory_space<vmem>>, vector<1x1x32xf32>
    %162 = vector.shape_cast %161 : vector<1x1x32xf32> to vector<1x32xf32>
    %163 = vector.shape_cast %143 : vector<16x32xf32> to vector<2x8x32xf32>
    %164 = vector.shape_cast %151 : vector<16x32xf32> to vector<2x8x32xf32>
    %165 = vector.shape_cast %152 : vector<16x32xf32> to vector<2x8x32xf32>
    %166 = vector.extract_strided_slice %163 {offsets = [0, 0, 0], sizes = [2, 8, 8], strides = [1, 1, 1]} : vector<2x8x32xf32> to vector<2x8x8xf32>
    %167 = vector.extract_strided_slice %164 {offsets = [0, 0, 0], sizes = [2, 8, 8], strides = [1, 1, 1]} : vector<2x8x32xf32> to vector<2x8x8xf32>
    %168 = vector.extract_strided_slice %165 {offsets = [0, 0, 0], sizes = [2, 8, 8], strides = [1, 1, 1]} : vector<2x8x32xf32> to vector<2x8x8xf32>
    "tpu.trace_start"() <{level = 10 : i32, message = "bqd,bkd->bqk"}> : () -> ()
    %cst_76 = arith.constant dense<0.000000e+00> : vector<2x8x8xf32>
    %169 = tpu.matmul %166, %167, %cst_76 {dimension_numbers = #tpu.dot_dimension_numbers<[2], [2], [1], [1], [0, 0, 0, 1, 1, 1], [0], [0]>} : vector<2x8x8xf32>, vector<2x8x8xf32>, vector<2x8x8xf32> -> vector<2x8x8xf32>
    %cst_77 = arith.constant -1.000000e+20 : f32
    "tpu.trace_stop"() : () -> ()
    %170 = vector.broadcast %cst_77 : f32 to vector<2x8x8xf32>
    %171 = arith.select %158, %169, %170 : vector<2x8x8xi1>, vector<2x8x8xf32>
    %cst_78 = arith.constant 0.176776692 : f32
    %172 = vector.broadcast %cst_78 : f32 to vector<2x8x8xf32>
    %173 = arith.mulf %171, %172 : vector<2x8x8xf32>
    %cst_79 = arith.constant dense<0xFF800000> : vector<2x8xf32>
    %174 = vector.multi_reduction <maximumf>, %173, %cst_79 [2] : vector<2x8x8xf32> to vector<2x8xf32>
    %175 = vector.shape_cast %174 : vector<2x8xf32> to vector<2x8x1xf32>
    %176 = vector.broadcast %175 : vector<2x8x1xf32> to vector<2x8x8xf32>
    %177 = arith.subf %173, %176 : vector<2x8x8xf32>
    %178 = math.exp %177 : vector<2x8x8xf32>
    %cst_80 = arith.constant dense<0.000000e+00> : vector<2x8xf32>
    %179 = vector.multi_reduction <add>, %178, %cst_80 [2] : vector<2x8x8xf32> to vector<2x8xf32>
    %180 = vector.shape_cast %179 : vector<2x8xf32> to vector<2x8x1xf32>
    %181 = tpu.reciprocal %180 {approx = true} : vector<2x8x1xf32> -> vector<2x8x1xf32>
    %182 = vector.broadcast %181 : vector<2x8x1xf32> to vector<2x8x8xf32>
    %183 = arith.mulf %178, %182 : vector<2x8x8xf32>
    "tpu.trace_start"() <{level = 10 : i32, message = "bqk,bkd->bqd"}> : () -> ()
    %cst_81 = arith.constant dense<0.000000e+00> : vector<2x8x8xf32>
    %184 = tpu.matmul %183, %168, %cst_81 {dimension_numbers = #tpu.dot_dimension_numbers<[2], [1], [1], [2], [0, 0, 0, 1, 1, 2], [0], [0]>} : vector<2x8x8xf32>, vector<2x8x8xf32>, vector<2x8x8xf32> -> vector<2x8x8xf32>
    "tpu.trace_stop"() : () -> ()
    %185 = vector.extract_strided_slice %163 {offsets = [0, 0, 8], sizes = [2, 8, 8], strides = [1, 1, 1]} : vector<2x8x32xf32> to vector<2x8x8xf32>
    %186 = vector.extract_strided_slice %164 {offsets = [0, 0, 8], sizes = [2, 8, 8], strides = [1, 1, 1]} : vector<2x8x32xf32> to vector<2x8x8xf32>
    %187 = vector.extract_strided_slice %165 {offsets = [0, 0, 8], sizes = [2, 8, 8], strides = [1, 1, 1]} : vector<2x8x32xf32> to vector<2x8x8xf32>
    "tpu.trace_start"() <{level = 10 : i32, message = "bqd,bkd->bqk"}> : () -> ()
    %cst_82 = arith.constant dense<0.000000e+00> : vector<2x8x8xf32>
    %188 = tpu.matmul %185, %186, %cst_82 {dimension_numbers = #tpu.dot_dimension_numbers<[2], [2], [1], [1], [0, 0, 0, 1, 1, 1], [0], [0]>} : vector<2x8x8xf32>, vector<2x8x8xf32>, vector<2x8x8xf32> -> vector<2x8x8xf32>
    %cst_83 = arith.constant -1.000000e+20 : f32
    "tpu.trace_stop"() : () -> ()
    %189 = vector.broadcast %cst_83 : f32 to vector<2x8x8xf32>
    %190 = arith.select %158, %188, %189 : vector<2x8x8xi1>, vector<2x8x8xf32>
    %cst_84 = arith.constant 0.176776692 : f32
    %191 = vector.broadcast %cst_84 : f32 to vector<2x8x8xf32>
    %192 = arith.mulf %190, %191 : vector<2x8x8xf32>
    %cst_85 = arith.constant dense<0xFF800000> : vector<2x8xf32>
    %193 = vector.multi_reduction <maximumf>, %192, %cst_85 [2] : vector<2x8x8xf32> to vector<2x8xf32>
    %194 = vector.shape_cast %193 : vector<2x8xf32> to vector<2x8x1xf32>
    %195 = vector.broadcast %194 : vector<2x8x1xf32> to vector<2x8x8xf32>
    %196 = arith.subf %192, %195 : vector<2x8x8xf32>
    %197 = math.exp %196 : vector<2x8x8xf32>
    %cst_86 = arith.constant dense<0.000000e+00> : vector<2x8xf32>
    %198 = vector.multi_reduction <add>, %197, %cst_86 [2] : vector<2x8x8xf32> to vector<2x8xf32>
    %199 = vector.shape_cast %198 : vector<2x8xf32> to vector<2x8x1xf32>
    %200 = tpu.reciprocal %199 {approx = true} : vector<2x8x1xf32> -> vector<2x8x1xf32>
    %201 = vector.broadcast %200 : vector<2x8x1xf32> to vector<2x8x8xf32>
    %202 = arith.mulf %197, %201 : vector<2x8x8xf32>
    "tpu.trace_start"() <{level = 10 : i32, message = "bqk,bkd->bqd"}> : () -> ()
    %cst_87 = arith.constant dense<0.000000e+00> : vector<2x8x8xf32>
    %203 = tpu.matmul %202, %187, %cst_87 {dimension_numbers = #tpu.dot_dimension_numbers<[2], [1], [1], [2], [0, 0, 0, 1, 1, 2], [0], [0]>} : vector<2x8x8xf32>, vector<2x8x8xf32>, vector<2x8x8xf32> -> vector<2x8x8xf32>
    "tpu.trace_stop"() : () -> ()
    %204 = vector.extract_strided_slice %163 {offsets = [0, 0, 16], sizes = [2, 8, 8], strides = [1, 1, 1]} : vector<2x8x32xf32> to vector<2x8x8xf32>
    %205 = vector.extract_strided_slice %164 {offsets = [0, 0, 16], sizes = [2, 8, 8], strides = [1, 1, 1]} : vector<2x8x32xf32> to vector<2x8x8xf32>
    %206 = vector.extract_strided_slice %165 {offsets = [0, 0, 16], sizes = [2, 8, 8], strides = [1, 1, 1]} : vector<2x8x32xf32> to vector<2x8x8xf32>
    "tpu.trace_start"() <{level = 10 : i32, message = "bqd,bkd->bqk"}> : () -> ()
    %cst_88 = arith.constant dense<0.000000e+00> : vector<2x8x8xf32>
    %207 = tpu.matmul %204, %205, %cst_88 {dimension_numbers = #tpu.dot_dimension_numbers<[2], [2], [1], [1], [0, 0, 0, 1, 1, 1], [0], [0]>} : vector<2x8x8xf32>, vector<2x8x8xf32>, vector<2x8x8xf32> -> vector<2x8x8xf32>
    %cst_89 = arith.constant -1.000000e+20 : f32
    "tpu.trace_stop"() : () -> ()
    %208 = vector.broadcast %cst_89 : f32 to vector<2x8x8xf32>
    %209 = arith.select %158, %207, %208 : vector<2x8x8xi1>, vector<2x8x8xf32>
    %cst_90 = arith.constant 0.176776692 : f32
    %210 = vector.broadcast %cst_90 : f32 to vector<2x8x8xf32>
    %211 = arith.mulf %209, %210 : vector<2x8x8xf32>
    %cst_91 = arith.constant dense<0xFF800000> : vector<2x8xf32>
    %212 = vector.multi_reduction <maximumf>, %211, %cst_91 [2] : vector<2x8x8xf32> to vector<2x8xf32>
    %213 = vector.shape_cast %212 : vector<2x8xf32> to vector<2x8x1xf32>
    %214 = vector.broadcast %213 : vector<2x8x1xf32> to vector<2x8x8xf32>
    %215 = arith.subf %211, %214 : vector<2x8x8xf32>
    %216 = math.exp %215 : vector<2x8x8xf32>
    %cst_92 = arith.constant dense<0.000000e+00> : vector<2x8xf32>
    %217 = vector.multi_reduction <add>, %216, %cst_92 [2] : vector<2x8x8xf32> to vector<2x8xf32>
    %218 = vector.shape_cast %217 : vector<2x8xf32> to vector<2x8x1xf32>
    %219 = tpu.reciprocal %218 {approx = true} : vector<2x8x1xf32> -> vector<2x8x1xf32>
    %220 = vector.broadcast %219 : vector<2x8x1xf32> to vector<2x8x8xf32>
    %221 = arith.mulf %216, %220 : vector<2x8x8xf32>
    "tpu.trace_start"() <{level = 10 : i32, message = "bqk,bkd->bqd"}> : () -> ()
    %cst_93 = arith.constant dense<0.000000e+00> : vector<2x8x8xf32>
    %222 = tpu.matmul %221, %206, %cst_93 {dimension_numbers = #tpu.dot_dimension_numbers<[2], [1], [1], [2], [0, 0, 0, 1, 1, 2], [0], [0]>} : vector<2x8x8xf32>, vector<2x8x8xf32>, vector<2x8x8xf32> -> vector<2x8x8xf32>
    "tpu.trace_stop"() : () -> ()
    %223 = vector.extract_strided_slice %163 {offsets = [0, 0, 24], sizes = [2, 8, 8], strides = [1, 1, 1]} : vector<2x8x32xf32> to vector<2x8x8xf32>
    %224 = vector.extract_strided_slice %164 {offsets = [0, 0, 24], sizes = [2, 8, 8], strides = [1, 1, 1]} : vector<2x8x32xf32> to vector<2x8x8xf32>
    %225 = vector.extract_strided_slice %165 {offsets = [0, 0, 24], sizes = [2, 8, 8], strides = [1, 1, 1]} : vector<2x8x32xf32> to vector<2x8x8xf32>
    "tpu.trace_start"() <{level = 10 : i32, message = "bqd,bkd->bqk"}> : () -> ()
    %cst_94 = arith.constant dense<0.000000e+00> : vector<2x8x8xf32>
    %226 = tpu.matmul %223, %224, %cst_94 {dimension_numbers = #tpu.dot_dimension_numbers<[2], [2], [1], [1], [0, 0, 0, 1, 1, 1], [0], [0]>} : vector<2x8x8xf32>, vector<2x8x8xf32>, vector<2x8x8xf32> -> vector<2x8x8xf32>
    %cst_95 = arith.constant -1.000000e+20 : f32
    "tpu.trace_stop"() : () -> ()
    %227 = vector.broadcast %cst_95 : f32 to vector<2x8x8xf32>
    %228 = arith.select %158, %226, %227 : vector<2x8x8xi1>, vector<2x8x8xf32>
    %cst_96 = arith.constant 0.176776692 : f32
    %229 = vector.broadcast %cst_96 : f32 to vector<2x8x8xf32>
    %230 = arith.mulf %228, %229 : vector<2x8x8xf32>
    %cst_97 = arith.constant dense<0xFF800000> : vector<2x8xf32>
    %231 = vector.multi_reduction <maximumf>, %230, %cst_97 [2] : vector<2x8x8xf32> to vector<2x8xf32>
    %232 = vector.shape_cast %231 : vector<2x8xf32> to vector<2x8x1xf32>
    %233 = vector.broadcast %232 : vector<2x8x1xf32> to vector<2x8x8xf32>
    %234 = arith.subf %230, %233 : vector<2x8x8xf32>
    %235 = math.exp %234 : vector<2x8x8xf32>
    %cst_98 = arith.constant dense<0.000000e+00> : vector<2x8xf32>
    %236 = vector.multi_reduction <add>, %235, %cst_98 [2] : vector<2x8x8xf32> to vector<2x8xf32>
    %237 = vector.shape_cast %236 : vector<2x8xf32> to vector<2x8x1xf32>
    %238 = tpu.reciprocal %237 {approx = true} : vector<2x8x1xf32> -> vector<2x8x1xf32>
    %239 = vector.broadcast %238 : vector<2x8x1xf32> to vector<2x8x8xf32>
    %240 = arith.mulf %235, %239 : vector<2x8x8xf32>
    "tpu.trace_start"() <{level = 10 : i32, message = "bqk,bkd->bqd"}> : () -> ()
    %cst_99 = arith.constant dense<0.000000e+00> : vector<2x8x8xf32>
    %241 = tpu.matmul %240, %225, %cst_99 {dimension_numbers = #tpu.dot_dimension_numbers<[2], [1], [1], [2], [0, 0, 0, 1, 1, 2], [0], [0]>} : vector<2x8x8xf32>, vector<2x8x8xf32>, vector<2x8x8xf32> -> vector<2x8x8xf32>
    "tpu.trace_stop"() : () -> ()
    %242 = tpu.concatenate %184, %203, %222, %241 in 2 : vector<2x8x8xf32>, vector<2x8x8xf32>, vector<2x8x8xf32>, vector<2x8x8xf32> -> vector<2x8x32xf32>
    %243 = vector.shape_cast %242 : vector<2x8x32xf32> to vector<16x32xf32>
    %cst_100 = arith.constant dense<0.000000e+00> : vector<16x32xf32>
    %244 = tpu.matmul %243, %160, %cst_100 {dimension_numbers = #tpu.dot_dimension_numbers<[1], [0], [0], [1], [0, 0, 1, 1], [], []>} : vector<16x32xf32>, vector<32x32xf32>, vector<16x32xf32> -> vector<16x32xf32>
    %245 = vector.broadcast %162 : vector<1x32xf32> to vector<16x32xf32>
    %246 = arith.addf %244, %245 : vector<16x32xf32>
    %c0_101 = arith.constant 0 : index
    %c0_102 = arith.constant 0 : index
    %c0_103 = arith.constant 0 : index
    %247 = vector.load %arg16[%c0_101, %c0_102, %c0_103] : memref<1x1x32xf32, #tpu.memory_space<vmem>>, vector<1x1x32xf32>
    %248 = vector.shape_cast %247 : vector<1x1x32xf32> to vector<1x32xf32>
    %c0_104 = arith.constant 0 : index
    %c0_105 = arith.constant 0 : index
    %c0_106 = arith.constant 0 : index
    %249 = vector.load %arg17[%c0_104, %c0_105, %c0_106] : memref<1x1x32xf32, #tpu.memory_space<vmem>>, vector<1x1x32xf32>
    %250 = vector.shape_cast %249 : vector<1x1x32xf32> to vector<1x32xf32>
    %251 = arith.addf %246, %134 : vector<16x32xf32>
    %cst_107 = arith.constant dense<0.000000e+00> : vector<16xf32>
    %252 = vector.multi_reduction <add>, %251, %cst_107 [1] : vector<16x32xf32> to vector<16xf32>
    %253 = vector.shape_cast %252 : vector<16xf32> to vector<16x1xf32>
    %cst_108 = arith.constant 3.200000e+01 : f32
    %254 = vector.broadcast %cst_108 : f32 to vector<16x1xf32>
    %255 = arith.divf %253, %254 : vector<16x1xf32>
    %256 = vector.broadcast %255 : vector<16x1xf32> to vector<16x32xf32>
    %257 = arith.subf %251, %256 : vector<16x32xf32>
    %258 = arith.mulf %257, %257 : vector<16x32xf32>
    %cst_109 = arith.constant dense<0.000000e+00> : vector<16xf32>
    %259 = vector.multi_reduction <add>, %258, %cst_109 [1] : vector<16x32xf32> to vector<16xf32>
    %260 = vector.shape_cast %259 : vector<16xf32> to vector<16x1xf32>
    %cst_110 = arith.constant 3.200000e+01 : f32
    %261 = vector.broadcast %cst_110 : f32 to vector<16x1xf32>
    %262 = arith.divf %260, %261 : vector<16x1xf32>
    %263 = vector.broadcast %255 : vector<16x1xf32> to vector<16x32xf32>
    %264 = arith.subf %251, %263 : vector<16x32xf32>
    %cst_111 = arith.constant 9.99999974E-6 : f32
    %265 = vector.broadcast %cst_111 : f32 to vector<16x1xf32>
    %266 = arith.addf %262, %265 : vector<16x1xf32>
    %267 = math.rsqrt %266 : vector<16x1xf32>
    %268 = vector.broadcast %267 : vector<16x1xf32> to vector<16x32xf32>
    %269 = arith.mulf %264, %268 : vector<16x32xf32>
    %270 = vector.broadcast %248 : vector<1x32xf32> to vector<16x32xf32>
    %271 = arith.mulf %269, %270 : vector<16x32xf32>
    %272 = vector.broadcast %250 : vector<1x32xf32> to vector<16x32xf32>
    %273 = arith.addf %271, %272 : vector<16x32xf32>
    %c0_112 = arith.constant 0 : index
    %c0_113 = arith.constant 0 : index
    %c0_114 = arith.constant 0 : index
    %274 = vector.load %arg20[%c0_112, %c0_113, %c0_114] : memref<1x32x128xf32, #tpu.memory_space<vmem>>, vector<1x32x128xf32>
    %275 = vector.shape_cast %274 : vector<1x32x128xf32> to vector<32x128xf32>
    %c0_115 = arith.constant 0 : index
    %c0_116 = arith.constant 0 : index
    %c0_117 = arith.constant 0 : index
    %276 = vector.load %arg21[%c0_115, %c0_116, %c0_117] : memref<1x1x128xf32, #tpu.memory_space<vmem>>, vector<1x1x128xf32>
    %277 = vector.shape_cast %276 : vector<1x1x128xf32> to vector<1x128xf32>
    %c0_118 = arith.constant 0 : index
    %c0_119 = arith.constant 0 : index
    %c0_120 = arith.constant 0 : index
    %278 = vector.load %arg22[%c0_118, %c0_119, %c0_120] : memref<1x128x32xf32, #tpu.memory_space<vmem>>, vector<1x128x32xf32>
    %279 = vector.shape_cast %278 : vector<1x128x32xf32> to vector<128x32xf32>
    %c0_121 = arith.constant 0 : index
    %c0_122 = arith.constant 0 : index
    %c0_123 = arith.constant 0 : index
    %280 = vector.load %arg23[%c0_121, %c0_122, %c0_123] : memref<1x1x32xf32, #tpu.memory_space<vmem>>, vector<1x1x32xf32>
    %281 = vector.shape_cast %280 : vector<1x1x32xf32> to vector<1x32xf32>
    %cst_124 = arith.constant dense<0.000000e+00> : vector<16x128xf32>
    %282 = tpu.matmul %273, %275, %cst_124 {dimension_numbers = #tpu.dot_dimension_numbers<[1], [0], [0], [1], [0, 0, 1, 1], [], []>} : vector<16x32xf32>, vector<32x128xf32>, vector<16x128xf32> -> vector<16x128xf32>
    %283 = vector.broadcast %277 : vector<1x128xf32> to vector<16x128xf32>
    %284 = arith.addf %282, %283 : vector<16x128xf32>
    %cst_125 = arith.constant 0.000000e+00 : f32
    %285 = vector.broadcast %cst_125 : f32 to vector<16x128xf32>
    %286 = arith.maximumf %284, %285 : vector<16x128xf32>
    %cst_126 = arith.constant dense<0.000000e+00> : vector<16x32xf32>
    %287 = tpu.matmul %286, %279, %cst_126 {dimension_numbers = #tpu.dot_dimension_numbers<[1], [0], [0], [1], [0, 0, 1, 1], [], []>} : vector<16x128xf32>, vector<128x32xf32>, vector<16x32xf32> -> vector<16x32xf32>
    %288 = vector.broadcast %281 : vector<1x32xf32> to vector<16x32xf32>
    %289 = arith.addf %287, %288 : vector<16x32xf32>
    %c0_127 = arith.constant 0 : index
    %c0_128 = arith.constant 0 : index
    %c0_129 = arith.constant 0 : index
    %290 = vector.load %arg18[%c0_127, %c0_128, %c0_129] : memref<1x1x32xf32, #tpu.memory_space<vmem>>, vector<1x1x32xf32>
    %291 = vector.shape_cast %290 : vector<1x1x32xf32> to vector<1x32xf32>
    %c0_130 = arith.constant 0 : index
    %c0_131 = arith.constant 0 : index
    %c0_132 = arith.constant 0 : index
    %292 = vector.load %arg19[%c0_130, %c0_131, %c0_132] : memref<1x1x32xf32, #tpu.memory_space<vmem>>, vector<1x1x32xf32>
    %293 = vector.shape_cast %292 : vector<1x1x32xf32> to vector<1x32xf32>
    %294 = arith.addf %289, %273 : vector<16x32xf32>
    %cst_133 = arith.constant dense<0.000000e+00> : vector<16xf32>
    %295 = vector.multi_reduction <add>, %294, %cst_133 [1] : vector<16x32xf32> to vector<16xf32>
    %296 = vector.shape_cast %295 : vector<16xf32> to vector<16x1xf32>
    %cst_134 = arith.constant 3.200000e+01 : f32
    %297 = vector.broadcast %cst_134 : f32 to vector<16x1xf32>
    %298 = arith.divf %296, %297 : vector<16x1xf32>
    %299 = vector.broadcast %298 : vector<16x1xf32> to vector<16x32xf32>
    %300 = arith.subf %294, %299 : vector<16x32xf32>
    %301 = arith.mulf %300, %300 : vector<16x32xf32>
    %cst_135 = arith.constant dense<0.000000e+00> : vector<16xf32>
    %302 = vector.multi_reduction <add>, %301, %cst_135 [1] : vector<16x32xf32> to vector<16xf32>
    %303 = vector.shape_cast %302 : vector<16xf32> to vector<16x1xf32>
    %cst_136 = arith.constant 3.200000e+01 : f32
    %304 = vector.broadcast %cst_136 : f32 to vector<16x1xf32>
    %305 = arith.divf %303, %304 : vector<16x1xf32>
    %306 = vector.broadcast %298 : vector<16x1xf32> to vector<16x32xf32>
    %307 = arith.subf %294, %306 : vector<16x32xf32>
    %cst_137 = arith.constant 9.99999974E-6 : f32
    %308 = vector.broadcast %cst_137 : f32 to vector<16x1xf32>
    %309 = arith.addf %305, %308 : vector<16x1xf32>
    %310 = math.rsqrt %309 : vector<16x1xf32>
    %311 = vector.broadcast %310 : vector<16x1xf32> to vector<16x32xf32>
    %312 = arith.mulf %307, %311 : vector<16x32xf32>
    %313 = vector.broadcast %291 : vector<1x32xf32> to vector<16x32xf32>
    %314 = arith.mulf %312, %313 : vector<16x32xf32>
    %315 = vector.broadcast %293 : vector<1x32xf32> to vector<16x32xf32>
    %316 = arith.addf %314, %315 : vector<16x32xf32>
    %c0_138 = arith.constant 0 : index
    %c0_139 = arith.constant 0 : index
    %317 = vector.load %arg27[%c0_138, %c0_139] : memref<16x32xf32, #tpu.memory_space<vmem>>, vector<16x32xf32>
    tpu.vector_store %arg27[%c0_138, %c0_139], %316 {strides = array<i32>} : memref<16x32xf32, #tpu.memory_space<vmem>>, vector<16x32xf32>,
    %c1_i32 = arith.constant 1 : i32
    %318 = arith.cmpi eq, %arg0, %c1_i32 : i32
    %319 = arith.extui %318 : i1 to i32
    %c0_i32_140 = arith.constant 0 : i32
    %320 = arith.cmpi ne, %319, %c0_i32_140 : i32
    scf.if %320 {
      %c0_141 = arith.constant 0 : index
      %c0_142 = arith.constant 0 : index
      %321 = vector.load %arg24[%c0_141, %c0_142] : memref<32x128xf32, #tpu.memory_space<vmem>>, vector<32x128xf32>
      %cst_143 = arith.constant dense<0.000000e+00> : vector<16x128xf32>
      %322 = tpu.matmul %316, %321, %cst_143 {dimension_numbers = #tpu.dot_dimension_numbers<[1], [0], [0], [1], [0, 0, 1, 1], [], []>} : vector<16x32xf32>, vector<32x128xf32>, vector<16x128xf32> -> vector<16x128xf32>
      %c0_144 = arith.constant 0 : index
      %c0_145 = arith.constant 0 : index
      %323 = vector.load %arg25[%c0_144, %c0_145] : memref<1x128xf32, #tpu.memory_space<vmem>>, vector<1x128xf32>
      %324 = vector.broadcast %323 : vector<1x128xf32> to vector<16x128xf32>
      %325 = arith.addf %322, %324 : vector<16x128xf32>
      %c0_146 = arith.constant 0 : index
      %c0_147 = arith.constant 0 : index
      %326 = vector.load %arg26[%c0_146, %c0_147] : memref<16x128xf32, #tpu.memory_space<vmem>>, vector<16x128xf32>
      tpu.vector_store %arg26[%c0_146, %c0_147], %325 {strides = array<i32>} : memref<16x128xf32, #tpu.memory_space<vmem>>, vector<16x128xf32>,
    } else {
    }
    return
  }
  func.func @transform_0(%arg0: i32) -> (i32, i32, i32) {
    %c0_i32 = arith.constant 0 : i32
    %c0_i32_0 = arith.constant 0 : i32
    %c0_i32_1 = arith.constant 0 : i32
    %c0_i32_2 = arith.constant 0 : i32
    return %c0_i32, %c0_i32_0, %c0_i32_1 : i32, i32, i32
  }
  func.func @transform_1(%arg0: i32) -> (i32, i32, i32) {
    %c0_i32 = arith.constant 0 : i32
    %c0_i32_0 = arith.constant 0 : i32
    %c0_i32_1 = arith.constant 0 : i32
    %c0_i32_2 = arith.constant 0 : i32
    return %c0_i32, %c0_i32_0, %c0_i32_1 : i32, i32, i32
  }
  func.func @transform_2(%arg0: i32) -> (i32, i32) {
    %c0_i32 = arith.constant 0 : i32
    %c0_i32_0 = arith.constant 0 : i32
    %c0_i32_1 = arith.constant 0 : i32
    return %c0_i32, %c0_i32_0 : i32, i32
  }
  func.func @transform_3(%arg0: i32) -> (i32, i32, i32) {
    %c0_i32 = arith.constant 0 : i32
    %c0_i32_0 = arith.constant 0 : i32
    %c0_i32_1 = arith.constant 0 : i32
    return %arg0, %c0_i32, %c0_i32_0 : i32, i32, i32
  }
  func.func @transform_4(%arg0: i32) -> (i32, i32, i32) {
    %c0_i32 = arith.constant 0 : i32
    %c0_i32_0 = arith.constant 0 : i32
    %c0_i32_1 = arith.constant 0 : i32
    return %arg0, %c0_i32, %c0_i32_0 : i32, i32, i32
  }
  func.func @transform_5(%arg0: i32) -> (i32, i32, i32) {
    %c0_i32 = arith.constant 0 : i32
    %c0_i32_0 = arith.constant 0 : i32
    %c0_i32_1 = arith.constant 0 : i32
    return %arg0, %c0_i32, %c0_i32_0 : i32, i32, i32
  }
  func.func @transform_6(%arg0: i32) -> (i32, i32, i32) {
    %c0_i32 = arith.constant 0 : i32
    %c0_i32_0 = arith.constant 0 : i32
    %c0_i32_1 = arith.constant 0 : i32
    return %arg0, %c0_i32, %c0_i32_0 : i32, i32, i32
  }
  func.func @transform_7(%arg0: i32) -> (i32, i32, i32) {
    %c0_i32 = arith.constant 0 : i32
    %c0_i32_0 = arith.constant 0 : i32
    %c0_i32_1 = arith.constant 0 : i32
    return %arg0, %c0_i32, %c0_i32_0 : i32, i32, i32
  }
  func.func @transform_8(%arg0: i32) -> (i32, i32, i32) {
    %c0_i32 = arith.constant 0 : i32
    %c0_i32_0 = arith.constant 0 : i32
    %c0_i32_1 = arith.constant 0 : i32
    return %arg0, %c0_i32, %c0_i32_0 : i32, i32, i32
  }
  func.func @transform_9(%arg0: i32) -> (i32, i32, i32) {
    %c0_i32 = arith.constant 0 : i32
    %c0_i32_0 = arith.constant 0 : i32
    %c0_i32_1 = arith.constant 0 : i32
    return %arg0, %c0_i32, %c0_i32_0 : i32, i32, i32
  }
  func.func @transform_10(%arg0: i32) -> (i32, i32, i32) {
    %c0_i32 = arith.constant 0 : i32
    %c0_i32_0 = arith.constant 0 : i32
    %c0_i32_1 = arith.constant 0 : i32
    return %arg0, %c0_i32, %c0_i32_0 : i32, i32, i32
  }
  func.func @transform_11(%arg0: i32) -> (i32, i32, i32) {
    %c0_i32 = arith.constant 0 : i32
    %c0_i32_0 = arith.constant 0 : i32
    %c0_i32_1 = arith.constant 0 : i32
    return %arg0, %c0_i32, %c0_i32_0 : i32, i32, i32
  }
  func.func @transform_12(%arg0: i32) -> (i32, i32, i32) {
    %c0_i32 = arith.constant 0 : i32
    %c0_i32_0 = arith.constant 0 : i32
    %c0_i32_1 = arith.constant 0 : i32
    return %arg0, %c0_i32, %c0_i32_0 : i32, i32, i32
  }
  func.func @transform_13(%arg0: i32) -> (i32, i32, i32) {
    %c0_i32 = arith.constant 0 : i32
    %c0_i32_0 = arith.constant 0 : i32
    %c0_i32_1 = arith.constant 0 : i32
    return %arg0, %c0_i32, %c0_i32_0 : i32, i32, i32
  }
  func.func @transform_14(%arg0: i32) -> (i32, i32, i32) {
    %c0_i32 = arith.constant 0 : i32
    %c0_i32_0 = arith.constant 0 : i32
    %c0_i32_1 = arith.constant 0 : i32
    return %arg0, %c0_i32, %c0_i32_0 : i32, i32, i32
  }
  func.func @transform_15(%arg0: i32) -> (i32, i32, i32) {
    %c0_i32 = arith.constant 0 : i32
    %c0_i32_0 = arith.constant 0 : i32
    %c0_i32_1 = arith.constant 0 : i32
    return %arg0, %c0_i32, %c0_i32_0 : i32, i32, i32
  }
  func.func @transform_16(%arg0: i32) -> (i32, i32, i32) {
    %c0_i32 = arith.constant 0 : i32
    %c0_i32_0 = arith.constant 0 : i32
    %c0_i32_1 = arith.constant 0 : i32
    return %arg0, %c0_i32, %c0_i32_0 : i32, i32, i32
  }
  func.func @transform_17(%arg0: i32) -> (i32, i32, i32) {
    %c0_i32 = arith.constant 0 : i32
    %c0_i32_0 = arith.constant 0 : i32
    %c0_i32_1 = arith.constant 0 : i32
    return %arg0, %c0_i32, %c0_i32_0 : i32, i32, i32
  }
  func.func @transform_18(%arg0: i32) -> (i32, i32, i32) {
    %c0_i32 = arith.constant 0 : i32
    %c0_i32_0 = arith.constant 0 : i32
    %c0_i32_1 = arith.constant 0 : i32
    return %arg0, %c0_i32, %c0_i32_0 : i32, i32, i32
  }
  func.func @transform_19(%arg0: i32) -> (i32, i32, i32) {
    %c0_i32 = arith.constant 0 : i32
    %c0_i32_0 = arith.constant 0 : i32
    %c0_i32_1 = arith.constant 0 : i32
    return %arg0, %c0_i32, %c0_i32_0 : i32, i32, i32
  }
  func.func @transform_20(%arg0: i32) -> (i32, i32, i32) {
    %c0_i32 = arith.constant 0 : i32
    %c0_i32_0 = arith.constant 0 : i32
    %c0_i32_1 = arith.constant 0 : i32
    return %arg0, %c0_i32, %c0_i32_0 : i32, i32, i32
  }
  func.func @transform_21(%arg0: i32) -> (i32, i32, i32) {
    %c0_i32 = arith.constant 0 : i32
    %c0_i32_0 = arith.constant 0 : i32
    %c0_i32_1 = arith.constant 0 : i32
    return %arg0, %c0_i32, %c0_i32_0 : i32, i32, i32
  }
  func.func @transform_22(%arg0: i32) -> (i32, i32, i32) {
    %c0_i32 = arith.constant 0 : i32
    %c0_i32_0 = arith.constant 0 : i32
    %c0_i32_1 = arith.constant 0 : i32
    return %arg0, %c0_i32, %c0_i32_0 : i32, i32, i32
  }
  func.func @transform_23(%arg0: i32) -> (i32, i32) {
    %c0_i32 = arith.constant 0 : i32
    %c0_i32_0 = arith.constant 0 : i32
    %c0_i32_1 = arith.constant 0 : i32
    return %c0_i32, %c0_i32_0 : i32, i32
  }
  func.func @transform_24(%arg0: i32) -> (i32, i32) {
    %c0_i32 = arith.constant 0 : i32
    %c0_i32_0 = arith.constant 0 : i32
    %c0_i32_1 = arith.constant 0 : i32
    return %c0_i32, %c0_i32_0 : i32, i32
  }
  func.func @transform_25(%arg0: i32) -> (i32, i32) {
    %c0_i32 = arith.constant 0 : i32
    %c0_i32_0 = arith.constant 0 : i32
    %c0_i32_1 = arith.constant 0 : i32
    return %c0_i32, %c0_i32_0 : i32, i32
  }
}

</mosaic_0001>

<bundles_post_ra>
// kernel: transformer_forward.2
= control target key start
LH: loop header
LB: loop body
LE: loop exit
PB: predicated region body
PF: predicated region fallthrough
CT: control target
= control target key end

     0   :  { %s3092_s29 = smov 0   ;;  %s3434_s0 = inlined_call_operand.vmem [shape: f32[2,8,32], index: 0, kind: input, shape index: {}]   ;;  %s3435_s1 = inlined_call_operand.vmem [shape: f32[2,8], index: 1, kind: input, shape index: {}]   ;;  %s3436_s2 = inlined_call_operand.vmem [shape: f32[2,32,96], index: 2, kind: input, shape index: {}]   ;;  %s3437_s3 = inlined_call_operand.vmem [shape: f32[2,1,96], index: 3, kind: input, shape index: {}]   ;;  %s3438_s4 = inlined_call_operand.vmem [shape: f32[2,32,32], index: 4, kind: input, shape index: {}]   ;;  %s3439_s5 = inlined_call_operand.vmem [shape: f32[2,1,32], index: 5, kind: input, shape index: {}]   ;;  %s3440_s6 = inlined_call_operand.vmem [shape: f32[2,1,32], index: 6, kind: input, shape index: {}]   ;;  %s3441_s7 = inlined_call_operand.vmem [shape: f32[2,1,32], index: 7, kind: input, shape index: {}]   ;;  %s3442_s8 = inlined_call_operand.vmem [shape: f32[2,1,32], index: 8, kind: input, shape index: {}]   ;;  %s3443_s9 = inlined_call_operand.vmem [shape: f32[2,1,32], index: 9, kind: input, shape index: {}]   ;;  %s3444_s10 = inlined_call_operand.vmem [shape: f32[2,32,128], index: 10, kind: input, shape index: {}]   ;;  %s3445_s11 = inlined_call_operand.vmem [shape: f32[2,1,128], index: 11, kind: input, shape index: {}]   ;;  %s3446_s12 = inlined_call_operand.vmem [shape: f32[2,128,32], index: 12, kind: input, shape index: {}]   ;;  %s3447_s13 = inlined_call_operand.vmem [shape: f32[2,1,32], index: 13, kind: input, shape index: {}]   ;;  %s3448_s14 = inlined_call_operand.vmem [shape: f32[2,8,32], index: 14, kind: output, shape index: {}]  }
   0x1   :  { %3454 = sst [smem:[#allocation4_spill]] %s3434_s0 }
   0x2   :  { %3455 = sst [smem:[#allocation5_spill]] %s3435_s1 }
   0x3   :  { %3456 = sst [smem:[#allocation6_spill]] %s3436_s2 }
   0x4   :  { %3457 = sst [smem:[#allocation7_spill]] %s3438_s4 }
   0x5   :  { %3458 = sst [smem:[#allocation8_spill]] %s3448_s14 }
   0x6 LB: > { %3459 = sst [smem:[#allocation2_spill]] %s2997_s29  ;;  %s2651_s30 = sadd.s32 4294967295, %s2997_s29   ;;  %s2997_s29 = sphi %s3092_s29, %s24_s29  }
   0x7   : > { %p2654_p0 = scmp.ge.s32.totalorder %s2997_s29, 1  ;;  %p501_p1 = scmp.lt.s32.totalorder %s2997_s29, 3 }
   0x9   : > { %p502_p2 = pnand %p2654_p0, %p501_p1 }
   0xb   : > { %505 = sbr.rel (%p502_p2) target bundleno = 3934 (0xf5e), region = 76 }
  0x10   : > { %p581_p3 = scmp.lt.s32.totalorder %s2651_s30, 1  ;;  %s3460_s2 = sld [smem:[#allocation6_spill]] }
  0x11   : > { %s3461_s4 = sld [smem:[#allocation7_spill]]  ;;  %p2663_p4 = scmp.ne.s32.totalorder %s2651_s30, 0 }
  0x12   : > { %s3100_s15 = scalar_select %p581_p3, %s2651_s30, 1 }
  0x13   : > { %s3464_s0 = sld [smem:[#allocation8_spill]] (!%p2663_p4) }
  0x14   : > { %s2705_s16 = sshll.u32 %s3100_s15, 5  ;;  %s596_s28 = scalar_lea.vmem %s3439_s5, %s3100_s15 }
  0x15   : > { %s605_s21 = scalar_lea.vmem %s3442_s8, %s3100_s15  ;;  %s3138_s26 = scalar_lea.vmem %s3444_s10, %s2705_s16 }
  0x16   : > { %s585_s22 = scalar_lea.vmem %s3460_s2, %s2705_s16  ;;  %s616_s29 = scalar_lea.vmem %s3445_s11, %s3100_s15 }
  0x17   : > { %s3113_s25 = scalar_lea.vmem %s3461_s4, %s2705_s16  ;;  %s2708_s14 = sshll.u32 %s3100_s15, 7 }
  0x18   : > { %3462 = sst [smem:[#allocation3_spill]] %s3113_s25  ;;  %s3148_s18 = scalar_lea.vmem %s3446_s12, %s2708_s14 }
  0x19   : > { %s624_s2 = scalar_lea.vmem %s3447_s13, %s3100_s15  ;;  %628 = sbr.rel (%p2663_p4) target bundleno = 34 (0x22), region = 80 }
  0x1a   : > { %s3463_s16 = sld [smem:[#allocation4_spill]] (!%p2663_p4) }
  0x1e   : > { %vm631_vm0 = vcmask 261120  }
  0x20   : > { %v629_v0 = vld [vmem:[%s3463_s16] sm:$0xff]  ;;  %v630_v1 = vld [vmem:[%s3463_s16 + $0x8] sm:$0xff] }
  0x21   : > { %632 = vst.msk [vmem:[%s3464_s0] sm:$0xff] %vm631_vm0, %v629_v0  ;;  %633 = vst.msk [vmem:[%s3464_s0 + $0x8] sm:$0xff] %vm631_vm0, %v630_v1 }
  0x22 PF: > { %v639_v2 = vld [vmem:[%s585_s22 + $0x18] sm:$0xff]  ;;  %v638_v3 = vld [vmem:[%s585_s22 + $0x10] sm:$0xff]  ;;  %vm647_vm1 = vcmask 261120   ;;  %s3465_s20 = sld [smem:[#allocation8_spill]]  ;;  %v637_v5 = vld [vmem:[%s585_s22 + $0x8] sm:$0xff]  ;;  %v2999_v8 = vmov 0.0   ;;  %s3466_s25 = scalar_lea.vmem %s3437_s3, %s3100_s15  ;;  %v742_v18 = vlaneseq }
  0x23   : > { %2777 = vmatprep.subr.mxu1 %v639_v2  ;;  %v636_v6 = vld [vmem:[%s585_s22] sm:$0xff]  ;;  %2798 = vmatprep.subr.mxu0 %v2999_v8  ;;  %vm3000_vm2 = vmmov 0   ;;  %s3001_s27 = smov 96   ;;  %vm777_vm3 = vcmask 64512   ;;  %v3002_v16 = vmov 1966171168  }
  0x24   : > { %2778 = vmatpush3.msra.mxu1 %v639_v2  ;;  %2800 = vmatprep.mubr.msk.f32.mxu0 %vm3000_vm2, %v2999_v8  ;;  %v2664_v10 = vld [vmem:[%s3466_s25] ss:$0 sm:$0xff]  ;;  %v740_v17 = vunpack.c.l.s4 %v3002_v16  ;;  %v743_v20 = vshrl.u32 %v742_v18, 7  ;;  %s3467_s14 = sld [smem:[#allocation5_spill]]  ;;  %v3003_v27 = vmov 0   ;;  %s3004_s17 = smov 64  }
  0x25   : > { %2779 = vmatprep.subr.mxu1 %v638_v3  ;;  %s3005_s30 = smov 88   ;;  %s3006_s19 = smov 120   ;;  %vm2138_vm8 = vcmask 195584   ;;  %vm2135_vm9 = vcmask 130048  }
  0x26   : > { %2780 = vmatpush3.msra.mxu1 %v638_v3  ;;  %v741_v19 = vunpack.c.0.s8 %v740_v17  ;;  %v761_v26 = vsub.s32 0, %v743_v20  ;;  %s3007_s24 = smov 56   ;;  %s3008_s23 = smov 80  }
  0x27   : > { %2781 = vmatprep.subr.mxu1 %v637_v5  ;;  %s3009_s22 = smov 112   ;;  %s3010_s4 = smov 48  }
  0x28   : > { %v3169_v4 = vld [vmem:[%s3465_s20] sm:$0xff]  ;;  %2782 = vmatpush3.msra.mxu1 %v637_v5  ;;  %v3176_v7 = vld [vmem:[%s3465_s20 + $0x8] sm:$0xff]  ;;  %v744_v21 = vsub.s32 %v741_v19, %v743_v20  ;;  %s3011_s25 = smov 72   ;;  %s3013_s1 = smov 40  }
  0x29   : > { %2785 = vmatprep.mubr.msk.f32.mxu1 %vm647_vm1, %v3169_v4  ;;  %2783 = vmatprep.subr.mxu1 %v636_v6  ;;  %s3014_s0 = smov 8  }
  0x2a   : > { %2784 = vmatpush3.msra.mxu1 %v636_v6  ;;  %v2667_v22 = vld.sshfl [vmem:[%s3467_s14] sm:$0x11 pattern:$0x75316420]  ;;  %s3015_s14 = smov 16  }
  0x2b   : > { %2786 = vmatmul.mubr.msk.f32.vlgmr.msra.gmra.mxu1 %vm647_vm1, %v3176_v7  ;;  %2788 = vmatprep.subr.mxu1 %v2999_v8  ;;  %v745_v23 = vrot.slane %v2667_v22, %v744_v21  ;;  %v738_v24 = vcombine.high %v2667_v22, %v2667_v22 }
  0x2c   : > { %2790 = vmatprep.mubr.msk.f32.mxu1 %vm3000_vm2, %v2999_v8 }
  0x2d   : > { %vm755_vm4 = vcmp.ne.f32.partialorder %v745_v23, 0.0  ;;  %v752_v25 = vrot.slane %v738_v24, %v744_v21 }
  0x2e   : > { %v757_v28 = vsel %vm755_vm4, 1, %v3003_v27 }
  0x2f   : > { %vm756_vm5 = vcmp.ne.f32.partialorder %v752_v25, 0.0  ;;  %v3212_v29 = vrot.slane %v757_v28, %v761_v26 }
  0x30   : > { %v758_v30 = vsel %vm756_vm5, 1, %v3003_v27 }
  0x31   : > { %vm767_vm6 = vcmp.eq.s32.totalorder %v3212_v29, 1  ;;  %v3215_v31 = vrot.slane %v758_v30, %v761_v26 }
  0x33   : > { %vm768_vm7 = vcmp.eq.s32.totalorder %v3215_v31, 1 }
  0xeb   : > { %v2787_v9 = vpop.f32.mrf.mxu1 }
  0xec   : > { %v3194_v13 = vadd.f32 %v2787_v9, %v2664_v10 }
  0xed   : > { %v720_v11 = vpop.f32.mrf.mxu1 }
  0xee   : > { %v3191_v12 = vadd.f32 %v2664_v10, %v720_v11 }
  0xf0   : > { %775 = vrot.lane.b32.xlu0 %v3191_v12, %s3001_s27 }
  0xf4   : > { %853 = vrot.lane.b32.xlu0 %v3194_v13, %s3001_s27  ;;  %s3012_s27 = smov 104  }
 0x162   : > { %v776_v14 = vpop.permute.xlu0 %775 }
 0x163   : > { %2789 = vmatpush3.xpose.msk.msra.mxu1 %vm777_vm3, %v776_v14 }
 0x164   : > { %2793 = vmatprep.subr.mxu1 %v2999_v8 }
 0x166   : > { %2791 = vmatmul.mubr.msk.f32.vlgmr.msra.gmra.mxu1 %vm777_vm3, %v3191_v12  ;;  %v854_v15 = vpop.permute.xlu0 %853 }
 0x167   : > { %2794 = vmatpush3.xpose.msk.msra.mxu1 %vm777_vm3, %v854_v15  ;;  %2795 = vmatprep.mubr.msk.f32.mxu1 %vm3000_vm2, %v2999_v8 }
 0x168   : > { %2803 = vmatprep.subr.mxu1 %v2999_v8 }
 0x16a   : > { %2796 = vmatmul.mubr.msk.f32.vlgmr.msra.gmra.mxu1 %vm777_vm3, %v3194_v13 }
 0x16b   : > { %2805 = vmatprep.mubr.msk.f32.mxu1 %vm3000_vm2, %v2999_v8 }
 0x226   : > { %v848_v32 = vpop.f32.mrf.mxu1 }
 0x227   : > { %v929_v33 = vsel %vm767_vm6, %v848_v32, -1e+20 }
 0x228   : > { %v931_v34 = vmul.f32 0.17677669, %v929_v33  ;;  %v2792_v35 = vpop.f32.mrf.mxu1 }
 0x22a   : > { %v925_v36 = vpop.f32.mrf.mxu1  ;;  %v933_v37 = vsel %vm777_vm3, %v931_v34, -inf }
 0x22b   : > { %v930_v38 = vsel %vm768_vm7, %v925_v36, -1e+20  ;;  %934 = vmax.xlane.f32.xlu1 %v933_v37 }
 0x22c   : > { %v932_v39 = vmul.f32 0.17677669, %v930_v38  ;;  %v2797_v40 = vpop.f32.mrf.mxu1 }
 0x22e   : > { %v936_v41 = vsel %vm777_vm3, %v932_v39, -inf }
 0x22f   : > { %937 = vmax.xlane.f32.xlu1 %v936_v41 }
 0x240   : > { %955 = vrot.lane.b32.xlu1 %v3191_v12, %s3004_s17 }
 0x244   : > { %1031 = vrot.lane.b32.xlu1 %v3194_v13, %s3004_s17  ;;  %s3468_s17 = sld [smem:[#allocation3_spill]] }
 0x248   : > { %1109 = vrot.lane.b32.xlu1 %v3191_v12, %s3005_s30 }
 0x24c   : > { %1187 = vrot.lane.b32.xlu1 %v3194_v13, %s3005_s30  ;;  %s3016_s30 = smov 24  }
 0x2b4   : > { %v935_v42 = vpop.xlane.xlu1 %934 }
 0x2b5   : > { %v939_v43 = vsub.f32 %v931_v34, %v935_v42 }
 0x2b7   : > { %v941_v44 = vmul.f32 1.442695, %v939_v43 }
 0x2b8   : > { %v938_v45 = vpop.xlane.xlu1 %937 }
 0x2b9   : > { %2951 = vpow2.f32 %v941_v44  ;;  %v940_v46 = vsub.f32 %v932_v39, %v938_v45 }
 0x2bb   : > { %v943_v47 = vmul.f32 1.442695, %v940_v46 }
 0x2bc   : > { %v956_v48 = vpop.permute.xlu1 %955 }
 0x2bd   : > { %2953 = vpow2.f32 %v943_v47  ;;  %2799 = vmatpush3.msra.mxu0 %v956_v48 }
 0x2be   : > { %2808 = vmatprep.subr.mxu0 %v2999_v8 }
 0x2c0   : > { %v1032_v49 = vpop.permute.xlu1 %1031 }
 0x2c1   : > { %2804 = vmatpush3.msra.mxu1 %v1032_v49 }
 0x2c2   : > { %2813 = vmatprep.subr.mxu1 %v2999_v8 }
 0x2c4   : > { %v1110_v54 = vpop.permute.xlu1 %1109 }
 0x2c6   : > { %v2952_v50 = vpop.eup %2951 }
 0x2c7   : > { %v945_v51 = vsel %vm777_vm3, %v2952_v50, 0.0 }
 0x2c8   : > { %946 = vadd.xlane.f32.xlu0 %v945_v51  ;;  %v1188_v55 = vpop.permute.xlu1 %1187 }
 0x2ca   : > { %v2954_v52 = vpop.eup %2953 }
 0x2cb   : > { %v948_v53 = vsel %vm777_vm3, %v2954_v52, 0.0 }
 0x2cc   : > { %949 = vadd.xlane.f32.xlu1 %v948_v53 }
 0x2dd   : > { %1185 = vrot.lane.b32.xlu1 %v3194_v13, %s3006_s19 }
 0x2de   : > { %1107 = vrot.lane.b32.xlu0 %v3191_v12, %s3006_s19 }
 0x351   : > { %v947_v56 = vpop.xlane.xlu0 %946 }
 0x352   : > { %2955 = vrcp.f32 %v947_v56 }
 0x355   : > { %v950_v57 = vpop.xlane.xlu1 %949  ;;  %v1108_v62 = vpop.permute.xlu0 %1107 }
 0x356   : > { %2957 = vrcp.f32 %v950_v57 }
 0x359   : > { %v1186_v63 = vpop.permute.xlu1 %1185 }
 0x35f   : > { %v2956_v58 = vpop.eup %2955 }
 0x360   : > { %v953_v59 = vmul.f32 %v2956_v58, %v2952_v50 }
 0x362   : > { %2801 = vmatmul.mubr.msk.f32.vlgmr.msra.gmra.mxu0 %vm777_vm3, %v953_v59 }
 0x363   : > { %v2958_v60 = vpop.eup %2957  ;;  %2809 = vmatpush3.xpose.msk.msra.mxu0 %vm777_vm3, %v1110_v54  ;;  %2810 = vmatprep.mubr.msk.f32.mxu0 %vm3000_vm2, %v2999_v8 }
 0x364   : > { %v954_v61 = vmul.f32 %v2958_v60, %v2954_v52  ;;  %2818 = vmatprep.subr.mxu0 %v2999_v8 }
 0x366   : > { %2806 = vmatmul.mubr.msk.f32.vlgmr.msra.gmra.mxu1 %vm777_vm3, %v954_v61  ;;  %2811 = vmatmul.mubr.msk.f32.vlgmr.msra.gmra.mxu0 %vm777_vm3, %v1108_v62 }
 0x367   : > { %2814 = vmatpush3.xpose.msk.msra.mxu1 %vm777_vm3, %v1188_v55  ;;  %2815 = vmatprep.mubr.msk.f32.mxu1 %vm3000_vm2, %v2999_v8 }
 0x368   : > { %2823 = vmatprep.subr.mxu1 %v2999_v8  ;;  %2820 = vmatprep.mubr.msk.f32.mxu0 %vm3000_vm2, %v2999_v8 }
 0x36a   : > { %2816 = vmatmul.mubr.msk.f32.vlgmr.msra.gmra.mxu1 %vm777_vm3, %v1186_v63 }
 0x36b   : > { %2825 = vmatprep.mubr.msk.f32.mxu1 %vm3000_vm2, %v2999_v8 }
 0x422   : > { %v3250_v0 = vpop.f32.mrf.mxu0 }
 0x424   : > { %v2802_v1 = vpop.f32.mrf.mxu0 }
 0x426   : > { %v3252_v2 = vpop.f32.mrf.mxu1  ;;  %v1181_v3 = vpop.f32.mrf.mxu0 }
 0x427   : > { %v1263_v5 = vsel %vm767_vm6, %v1181_v3, -1e+20 }
 0x428   : > { %v1265_v6 = vmul.f32 0.17677669, %v1263_v5  ;;  %v2807_v9 = vpop.f32.mrf.mxu1  ;;  %v2812_v10 = vpop.f32.mrf.mxu0 }
 0x42a   : > { %v1259_v11 = vpop.f32.mrf.mxu1  ;;  %v1267_v14 = vsel %vm777_vm3, %v1265_v6, -inf }
 0x42b   : > { %v1264_v15 = vsel %vm768_vm7, %v1259_v11, -1e+20  ;;  %1268 = vmax.xlane.f32.xlu1 %v1267_v14 }
 0x42c   : > { %v1266_v16 = vmul.f32 0.17677669, %v1264_v15  ;;  %v2817_v17 = vpop.f32.mrf.mxu1 }
 0x42e   : > { %v1270_v18 = vsel %vm777_vm3, %v1266_v16, -inf }
 0x42f   : > { %1271 = vmax.xlane.f32.xlu0 %v1270_v18 }
 0x43c   : > { %1289 = vrot.lane.b32.xlu1 %v3191_v12, %s3007_s24 }
 0x440   : > { %1443 = vrot.lane.b32.xlu1 %v3191_v12, %s3008_s23 }
 0x444   : > { %1521 = vrot.lane.b32.xlu1 %v3194_v13, %s3008_s23  ;;  %s3469_s23 = scalar_lea.vmem %s3440_s6, %s3100_s15 }
 0x445   : > { %1365 = vrot.lane.b32.xlu0 %v3194_v13, %s3007_s24 }
 0x449   : > { %1441 = vrot.lane.b32.xlu0 %v3191_v12, %s3009_s22 }
 0x4b4   : > { %v1269_v19 = vpop.xlane.xlu1 %1268 }
 0x4b5   : > { %v1273_v20 = vsub.f32 %v1265_v6, %v1269_v19 }
 0x4b7   : > { %v1275_v21 = vmul.f32 1.442695, %v1273_v20 }
 0x4b8   : > { %v1290_v22 = vpop.permute.xlu1 %1289  ;;  %v1272_v23 = vpop.xlane.xlu0 %1271 }
 0x4b9   : > { %2959 = vpow2.f32 %v1275_v21  ;;  %v1274_v24 = vsub.f32 %v1266_v16, %v1272_v23  ;;  %2819 = vmatpush3.msra.mxu0 %v1290_v22 }
 0x4ba   : > { %2828 = vmatprep.subr.mxu0 %v2999_v8 }
 0x4bb   : > { %v1277_v25 = vmul.f32 1.442695, %v1274_v24 }
 0x4bc   : > { %v1366_v26 = vpop.permute.xlu0 %1365  ;;  %v1444_v33 = vpop.permute.xlu1 %1443 }
 0x4bd   : > { %2961 = vpow2.f32 %v1277_v25  ;;  %2824 = vmatpush3.msra.mxu1 %v1366_v26 }
 0x4be   : > { %2833 = vmatprep.subr.mxu1 %v2999_v8 }
 0x4c0   : > { %v1522_v34 = vpop.permute.xlu1 %1521  ;;  %v1442_v41 = vpop.permute.xlu0 %1441 }
 0x4c6   : > { %v2960_v27 = vpop.eup %2959 }
 0x4c7   : > { %v1279_v28 = vsel %vm777_vm3, %v2960_v27, 0.0 }
 0x4c8   : > { %1280 = vadd.xlane.f32.xlu1 %v1279_v28 }
 0x4ca   : > { %v2962_v30 = vpop.eup %2961 }
 0x4cb   : > { %v1282_v32 = vsel %vm777_vm3, %v2962_v30, 0.0 }
 0x4cc   : > { %1283 = vadd.xlane.f32.xlu1 %v1282_v32 }
 0x4dd   : > { %1519 = vrot.lane.b32.xlu1 %v3194_v13, %s3009_s22 }
 0x551   : > { %v1281_v35 = vpop.xlane.xlu1 %1280 }
 0x552   : > { %2963 = vrcp.f32 %v1281_v35 }
 0x555   : > { %v1284_v36 = vpop.xlane.xlu1 %1283 }
 0x556   : > { %2965 = vrcp.f32 %v1284_v36 }
 0x559   : > { %v1520_v42 = vpop.permute.xlu1 %1519 }
 0x55f   : > { %v2964_v37 = vpop.eup %2963 }
 0x560   : > { %v1287_v38 = vmul.f32 %v2964_v37, %v2960_v27 }
 0x562   : > { %2821 = vmatmul.mubr.msk.f32.vlgmr.msra.gmra.mxu0 %vm777_vm3, %v1287_v38 }
 0x563   : > { %v2966_v39 = vpop.eup %2965  ;;  %2829 = vmatpush3.xpose.msk.msra.mxu0 %vm777_vm3, %v1444_v33  ;;  %2830 = vmatprep.mubr.msk.f32.mxu0 %vm3000_vm2, %v2999_v8 }
 0x564   : > { %v1288_v40 = vmul.f32 %v2966_v39, %v2962_v30  ;;  %2838 = vmatprep.subr.mxu0 %v2999_v8 }
 0x566   : > { %2826 = vmatmul.mubr.msk.f32.vlgmr.msra.gmra.mxu1 %vm777_vm3, %v1288_v40  ;;  %2831 = vmatmul.mubr.msk.f32.vlgmr.msra.gmra.mxu0 %vm777_vm3, %v1442_v41 }
 0x567   : > { %2834 = vmatpush3.xpose.msk.msra.mxu1 %vm777_vm3, %v1522_v34  ;;  %2835 = vmatprep.mubr.msk.f32.mxu1 %vm3000_vm2, %v2999_v8 }
 0x568   : > { %2843 = vmatprep.subr.mxu1 %v2999_v8  ;;  %2840 = vmatprep.mubr.msk.f32.mxu0 %vm3000_vm2, %v2999_v8 }
 0x56a   : > { %2836 = vmatmul.mubr.msk.f32.vlgmr.msra.gmra.mxu1 %vm777_vm3, %v1520_v42 }
 0x56b   : > { %2845 = vmatprep.mubr.msk.f32.mxu1 %vm3000_vm2, %v2999_v8 }
 0x622   : > { %v3286_v43 = vpop.f32.mrf.mxu0 }
 0x624   : > { %v2822_v44 = vpop.f32.mrf.mxu0 }
 0x626   : > { %v3288_v45 = vpop.f32.mrf.mxu1  ;;  %v1515_v46 = vpop.f32.mrf.mxu0 }
 0x627   : > { %v1597_v47 = vsel %vm767_vm6, %v1515_v46, -1e+20 }
 0x628   : > { %v1599_v48 = vmul.f32 0.17677669, %v1597_v47  ;;  %v2827_v49 = vpop.f32.mrf.mxu1  ;;  %v2832_v50 = vpop.f32.mrf.mxu0 }
 0x62a   : > { %v1593_v51 = vpop.f32.mrf.mxu1  ;;  %v1601_v52 = vsel %vm777_vm3, %v1599_v48, -inf }
 0x62b   : > { %v1598_v53 = vsel %vm768_vm7, %v1593_v51, -1e+20  ;;  %1602 = vmax.xlane.f32.xlu0 %v1601_v52  ;;  %v772_v52 = vld [vmem:[%s3468_s17 + $0x18] sm:$0xff] }
 0x62c   : > { %v1600_v54 = vmul.f32 0.17677669, %v1598_v53  ;;  %v2837_v55 = vpop.f32.mrf.mxu1  ;;  %v771_v53 = vld [vmem:[%s3468_s17 + $0x10] sm:$0xff] }
 0x62e   : > { %v1604_v56 = vsel %vm777_vm3, %v1600_v54, -inf }
 0x62f   : > { %1605 = vmax.xlane.f32.xlu1 %v1604_v56 }
 0x640   : > { %1623 = vrot.lane.b32.xlu1 %v3191_v12, %s3010_s4 }
 0x641   : > { %1699 = vrot.lane.b32.xlu0 %v3194_v13, %s3010_s4 }
 0x644   : > { %1777 = vrot.lane.b32.xlu1 %v3191_v12, %s3011_s25 }
 0x648   : > { %1855 = vrot.lane.b32.xlu1 %v3194_v13, %s3011_s25  ;;  %s3470_s25 = scalar_lea.vmem %s3441_s7, %s3100_s15 }
 0x64c   : > { %1853 = vrot.lane.b32.xlu1 %v3194_v13, %s3012_s27 }
 0x6b4   : > { %v1603_v57 = vpop.xlane.xlu0 %1602 }
 0x6b5   : > { %v1607_v58 = vsub.f32 %v1599_v48, %v1603_v57 }
 0x6b7   : > { %v1609_v59 = vmul.f32 1.442695, %v1607_v58 }
 0x6b8   : > { %v1606_v60 = vpop.xlane.xlu1 %1605  ;;  %v1700_v61 = vpop.permute.xlu0 %1699 }
 0x6b9   : > { %2967 = vpow2.f32 %v1609_v59  ;;  %v1608_v62 = vsub.f32 %v1600_v54, %v1606_v60  ;;  %2844 = vmatpush3.msra.mxu1 %v1700_v61  ;;  %v769_v54 = vld [vmem:[%s3468_s17] sm:$0xff] }
 0x6ba   : > { %2853 = vmatprep.subr.mxu1 %v2999_v8 }
 0x6bb   : > { %v1611_v63 = vmul.f32 1.442695, %v1608_v62 }
 0x6bc   : > { %v1624_v1 = vpop.permute.xlu1 %1623 }
 0x6bd   : > { %2969 = vpow2.f32 %v1611_v63  ;;  %2839 = vmatpush3.msra.mxu0 %v1624_v1 }
 0x6be   : > { %2848 = vmatprep.subr.mxu0 %v2999_v8 }
 0x6c0   : > { %v1778_v14 = vpop.permute.xlu1 %1777 }
 0x6c4   : > { %v1856_v18 = vpop.permute.xlu1 %1855 }
 0x6c6   : > { %v2968_v3 = vpop.eup %2967 }
 0x6c7   : > { %v1613_v5 = vsel %vm777_vm3, %v2968_v3, 0.0 }
 0x6c8   : > { %1614 = vadd.xlane.f32.xlu0 %v1613_v5  ;;  %v1854_v21 = vpop.permute.xlu1 %1853 }
 0x6ca   : > { %v2970_v6 = vpop.eup %2969 }
 0x6cb   : > { %v1616_v9 = vsel %vm777_vm3, %v2970_v6, 0.0 }
 0x6cc   : > { %1617 = vadd.xlane.f32.xlu0 %v1616_v9 }
 0x6e2   : > { %1775 = vrot.lane.b32.xlu0 %v3191_v12, %s3012_s27 }
 0x751   : > { %v1615_v10 = vpop.xlane.xlu0 %1614 }
 0x752   : > { %2971 = vrcp.f32 %v1615_v10 }
 0x755   : > { %v1618_v11 = vpop.xlane.xlu0 %1617 }
 0x756   : > { %2973 = vrcp.f32 %v1618_v11 }
 0x759   : > { %v1776_v20 = vpop.permute.xlu0 %1775 }
 0x75f   : > { %v2972_v15 = vpop.eup %2971 }
 0x760   : > { %v1621_v16 = vmul.f32 %v2972_v15, %v2968_v3 }
 0x762   : > { %2841 = vmatmul.mubr.msk.f32.vlgmr.msra.gmra.mxu0 %vm777_vm3, %v1621_v16 }
 0x763   : > { %v2974_v17 = vpop.eup %2973  ;;  %2849 = vmatpush3.xpose.msk.msra.mxu0 %vm777_vm3, %v1778_v14  ;;  %2850 = vmatprep.mubr.msk.f32.mxu0 %vm3000_vm2, %v2999_v8 }
 0x764   : > { %v1622_v19 = vmul.f32 %v2974_v17, %v2970_v6  ;;  %2858 = vmatprep.subr.mxu0 %v2999_v8 }
 0x766   : > { %2846 = vmatmul.mubr.msk.f32.vlgmr.msra.gmra.mxu1 %vm777_vm3, %v1622_v19  ;;  %2851 = vmatmul.mubr.msk.f32.vlgmr.msra.gmra.mxu0 %vm777_vm3, %v1776_v20 }
 0x767   : > { %2854 = vmatpush3.xpose.msk.msra.mxu1 %vm777_vm3, %v1856_v18  ;;  %2855 = vmatprep.mubr.msk.f32.mxu1 %vm3000_vm2, %v2999_v8 }
 0x768   : > { %2863 = vmatprep.subr.mxu1 %v2999_v8  ;;  %2860 = vmatprep.mubr.msk.f32.mxu0 %vm3000_vm2, %v2999_v8 }
 0x76a   : > { %2856 = vmatmul.mubr.msk.f32.vlgmr.msra.gmra.mxu1 %vm777_vm3, %v1854_v21 }
 0x76b   : > { %2865 = vmatprep.mubr.msk.f32.mxu1 %vm3000_vm2, %v2999_v8 }
 0x822   : > { %v1695_v22 = vpop.f32.mrf.mxu0 }
 0x824   : > { %v2842_v23 = vpop.f32.mrf.mxu0 }
 0x826   : > { %v1771_v24 = vpop.f32.mrf.mxu1  ;;  %v1849_v25 = vpop.f32.mrf.mxu0 }
 0x827   : > { %v1931_v26 = vsel %vm767_vm6, %v1849_v25, -1e+20 }
 0x828   : > { %v1933_v27 = vmul.f32 0.17677669, %v1931_v26  ;;  %v2847_v28 = vpop.f32.mrf.mxu1  ;;  %v2852_v30 = vpop.f32.mrf.mxu0 }
 0x829   : > { %v2278_v30 = vld [vmem:[%s3138_s26 + $0x18] sm:$0xff] }
 0x82a   : > { %v1927_v32 = vpop.f32.mrf.mxu1  ;;  %v1935_v33 = vsel %vm777_vm3, %v1933_v27, -inf }
 0x82b   : > { %v1932_v34 = vsel %vm768_vm7, %v1927_v32, -1e+20  ;;  %1936 = vmax.xlane.f32.xlu0 %v1935_v33  ;;  %v2277_v32 = vld [vmem:[%s3138_s26 + $0x10] sm:$0xff]  ;;  %v2276_v33 = vld [vmem:[%s3138_s26 + $0x8] sm:$0xff] }
 0x82c   : > { %v1934_v35 = vmul.f32 0.17677669, %v1932_v34  ;;  %v2857_v36 = vpop.f32.mrf.mxu1  ;;  %v2275_v34 = vld [vmem:[%s3138_s26] sm:$0xff] }
 0x82d   : > { %v2294_v36 = vld [vmem:[%s3148_s18 + $0x70] sm:$0xff] }
 0x82e   : > { %v1938_v8 = vsel %vm777_vm3, %v1934_v35, -inf }
 0x82f   : > { %1939 = vmax.xlane.f32.xlu1 %v1938_v8  ;;  %v2293_v8 = vld [vmem:[%s3148_s18 + $0x68] sm:$0xff] }
 0x840   : > { %1957 = vrot.lane.b32.xlu1 %v3191_v12, %s3013_s1 }
 0x844   : > { %2111 = vrot.lane.b32.xlu1 %v3286_v43, %s3014_s0 }
 0x848   : > { %2113 = vrot.lane.b32.xlu1 %v3288_v45, %s3014_s0 }
 0x84c   : > { %2121 = vrot.lane.b32.xlu1 %v1771_v24, %s3015_s14 }
 0x8b4   : > { %v1937_v29 = vpop.xlane.xlu0 %1936 }
 0x8b5   : > { %v1941_v37 = vsub.f32 %v1933_v27, %v1937_v29  ;;  %v2292_v29 = vld [vmem:[%s3148_s18 + $0x60] sm:$0xff] }
 0x8b7   : > { %v1943_v31 = vmul.f32 1.442695, %v1941_v37  ;;  %v2291_v37 = vld [vmem:[%s3148_s18 + $0x58] sm:$0xff] }
 0x8b8   : > { %v1940_v38 = vpop.xlane.xlu1 %1939 }
 0x8b9   : > { %2975 = vpow2.f32 %v1943_v31  ;;  %v1942_v39 = vsub.f32 %v1934_v35, %v1940_v38  ;;  %v2295_v35 = vld [vmem:[%s3148_s18 + $0x78] sm:$0xff]  ;;  %v2290_v31 = vld [vmem:[%s3148_s18 + $0x50] sm:$0xff]  ;;  %v2289_v38 = vld [vmem:[%s3148_s18 + $0x48] sm:$0xff] }
 0x8bb   : > { %v1945_v40 = vmul.f32 1.442695, %v1942_v39  ;;  %v2288_v39 = vld [vmem:[%s3148_s18 + $0x40] sm:$0xff] }
 0x8bc   : > { %v1958_v41 = vpop.permute.xlu1 %1957 }
 0x8bd   : > { %2977 = vpow2.f32 %v1945_v40  ;;  %2859 = vmatpush3.msra.mxu0 %v1958_v41  ;;  %v2287_v40 = vld [vmem:[%s3148_s18 + $0x38] sm:$0xff]  ;;  %v2286_v41 = vld [vmem:[%s3148_s18 + $0x30] sm:$0xff] }
 0x8be   : > { %2890 = vmatprep.subr.mxu0 %v2295_v35 }
 0x8c0   : > { %v2112_v59 = vpop.permute.xlu1 %2111 }
 0x8c1   : > { %v2133_v62 = vsel %vm777_vm3, %v3250_v0, %v2112_v59  ;;  %v2692_v0 = vld [vmem:[%s596_s28] ss:$0 sm:$0xff]  ;;  %v2282_v59 = vld [vmem:[%s3148_s18 + $0x10] sm:$0xff] }
 0x8c4   : > { %v2114_v60 = vpop.permute.xlu1 %2113 }
 0x8c5   : > { %v2134_v6 = vsel %vm777_vm3, %v3252_v2, %v2114_v60  ;;  %v2281_v60 = vld [vmem:[%s3148_s18 + $0x8] sm:$0xff] }
 0x8c6   : > { %v2976_v42 = vpop.eup %2975 }
 0x8c7   : > { %v1947_v12 = vsel %vm777_vm3, %v2976_v42, 0.0 }
 0x8c8   : > { %1948 = vadd.xlane.f32.xlu0 %v1947_v12  ;;  %v2122_v63 = vpop.permute.xlu1 %2121  ;;  %v2284_v12 = vld [vmem:[%s3148_s18 + $0x20] sm:$0xff] }
 0x8c9   : > { %v2137_v9 = vsel %vm2135_vm9, %v2134_v6, %v2122_v63 }
 0x8ca   : > { %v2978_v44 = vpop.eup %2977 }
 0x8cb   : > { %v1950_v43 = vsel %vm777_vm3, %v2978_v44, 0.0 }
 0x8cc   : > { %1951 = vadd.xlane.f32.xlu0 %v1950_v43 }
 0x8e2   : > { %2033 = vrot.lane.b32.xlu0 %v3194_v13, %s3013_s1  ;;  %v770_v13 = vld [vmem:[%s3468_s17 + $0x8] sm:$0xff] }
 0x8e6   : > { %2119 = vrot.lane.b32.xlu0 %v1695_v22, %s3015_s14 }
 0x951   : > { %v1949_v45 = vpop.xlane.xlu0 %1948 }
 0x952   : > { %2979 = vrcp.f32 %v1949_v45 }
 0x955   : > { %v1952_v46 = vpop.xlane.xlu0 %1951 }
 0x956   : > { %2981 = vrcp.f32 %v1952_v46 }
 0x959   : > { %v2034_v47 = vpop.permute.xlu0 %2033 }
 0x95a   : > { %2864 = vmatpush3.msra.mxu1 %v2034_v47 }
 0x95b   : > { %2868 = vmatprep.subr.mxu1 %v772_v52 }
 0x95d   : > { %v2120_v61 = vpop.permute.xlu0 %2119 }
 0x95e   : > { %v2136_v1 = vsel %vm2135_vm9, %v2133_v62, %v2120_v61  ;;  %v2280_v61 = vld [vmem:[%s3148_s18] sm:$0xff] }
 0x95f   : > { %v2980_v48 = vpop.eup %2979  ;;  %v2697_v62 = vld [vmem:[%s616_s29] ss:$0 sm:$0xff] }
 0x960   : > { %v1955_v49 = vmul.f32 %v2980_v48, %v2976_v42  ;;  %v2285_v42 = vld [vmem:[%s3148_s18 + $0x28] sm:$0xff] }
 0x962   : > { %2861 = vmatmul.mubr.msk.f32.vlgmr.msra.gmra.mxu0 %vm777_vm3, %v1955_v49 }
 0x963   : > { %v2982_v50 = vpop.eup %2981  ;;  %2891 = vmatpush3.msra.mxu0 %v2295_v35 }
 0x964   : > { %v1956_v51 = vmul.f32 %v2982_v50, %v2978_v44  ;;  %2892 = vmatprep.subr.mxu0 %v2294_v36  ;;  %v2695_v50 = vld [vmem:[%s3469_s23] ss:$0 sm:$0xff] }
 0x965   : > { %2893 = vmatpush3.msra.mxu0 %v2294_v36  ;;  %v2701_v36 = vld [vmem:[%s605_s21] ss:$0 sm:$0xff] }
 0x966   : > { %2866 = vmatmul.mubr.msk.f32.vlgmr.msra.gmra.mxu1 %vm777_vm3, %v1956_v51  ;;  %2894 = vmatprep.subr.mxu0 %v2293_v8 }
 0x967   : > { %2869 = vmatpush3.msra.mxu1 %v772_v52  ;;  %2895 = vmatpush3.msra.mxu0 %v2293_v8  ;;  %v2696_v52 = vld [vmem:[%s3470_s25] ss:$0 sm:$0xff] }
 0x968   : > { %2870 = vmatprep.subr.mxu1 %v771_v53  ;;  %2896 = vmatprep.subr.mxu0 %v2292_v29 }
 0x969   : > { %2871 = vmatpush3.msra.mxu1 %v771_v53  ;;  %2897 = vmatpush3.msra.mxu0 %v2292_v29 }
 0x96a   : > { %2872 = vmatprep.subr.mxu1 %v770_v13  ;;  %2898 = vmatprep.subr.mxu0 %v2291_v37 }
 0x96b   : > { %2873 = vmatpush3.msra.mxu1 %v770_v13  ;;  %2899 = vmatpush3.msra.mxu0 %v2291_v37 }
 0x96c   : > { %2874 = vmatprep.subr.mxu1 %v769_v54  ;;  %2900 = vmatprep.subr.mxu0 %v2290_v31 }
 0x96d   : > { %2875 = vmatpush3.msra.mxu1 %v769_v54  ;;  %2901 = vmatpush3.msra.mxu0 %v2290_v31 }
 0x96e   : > { %2879 = vmatprep.subr.mxu1 %v2278_v30  ;;  %2902 = vmatprep.subr.mxu0 %v2289_v38 }
 0x96f   : > { %2903 = vmatpush3.msra.mxu0 %v2289_v38 }
 0x970   : > { %2904 = vmatprep.subr.mxu0 %v2288_v39 }
 0x971   : > { %2905 = vmatpush3.msra.mxu0 %v2288_v39 }
 0x972   : > { %2906 = vmatprep.subr.mxu0 %v2287_v40 }
 0x973   : > { %2907 = vmatpush3.msra.mxu0 %v2287_v40 }
 0x974   : > { %2908 = vmatprep.subr.mxu0 %v2286_v41 }
 0x975   : > { %2909 = vmatpush3.msra.mxu0 %v2286_v41 }
 0x976   : > { %2910 = vmatprep.subr.mxu0 %v2285_v42 }
 0x977   : > { %2911 = vmatpush3.msra.mxu0 %v2285_v42 }
 0x978   : > { %2912 = vmatprep.subr.mxu0 %v2284_v12 }
 0x979   : > { %2913 = vmatpush3.msra.mxu0 %v2284_v12 }
 0xa22   : > { %v2029_v55 = vpop.f32.mrf.mxu0 }
 0xa23   : > { %2127 = vrot.lane.b32.xlu0 %v2029_v55, %s3016_s30 }
 0xa24   : > { %v2862_v56 = vpop.f32.mrf.mxu0 }
 0xa26   : > { %v2105_v57 = vpop.f32.mrf.mxu1 }
 0xa27   : > { %2129 = vrot.lane.b32.xlu1 %v2105_v57, %s3016_s30  ;;  %s3471_s30 = scalar_lea.vmem %s3443_s9, %s3100_s15 }
 0xa28   : > { %v2867_v58 = vpop.f32.mrf.mxu1  ;;  %v2702_v37 = vld [vmem:[%s3471_s30] ss:$0 sm:$0xff] }
 0xa29   : > { %v2283_v58 = vld [vmem:[%s3148_s18 + $0x18] sm:$0xff] }
 0xa2a   : > { %2914 = vmatprep.subr.mxu0 %v2283_v58 }
 0xa2b   : > { %2915 = vmatpush3.msra.mxu0 %v2283_v58 }
 0xa2c   : > { %2916 = vmatprep.subr.mxu0 %v2282_v59 }
 0xa2d   : > { %2917 = vmatpush3.msra.mxu0 %v2282_v59 }
 0xa2e   : > { %2918 = vmatprep.subr.mxu0 %v2281_v60 }
 0xa2f   : > { %2919 = vmatpush3.msra.mxu0 %v2281_v60 }
 0xa30   : > { %2920 = vmatprep.subr.mxu0 %v2280_v61 }
 0xa31   : > { %2921 = vmatpush3.msra.mxu0 %v2280_v61 }
 0xa95   : > { %v2128_v3 = vpop.permute.xlu0 %2127 }
 0xa96   : > { %v2139_v5 = vsel %vm2138_vm8, %v2136_v1, %v2128_v3 }
 0xa97   : > { %2876 = vmatprep.mubr.msk.f32.mxu1 %vm647_vm1, %v2139_v5 }
 0xa99   : > { %v2130_v10 = vpop.permute.xlu1 %2129 }
 0xa9a   : > { %v2140_v11 = vsel %vm2138_vm8, %v2137_v9, %v2130_v10  ;;  %v2700_v10 = vld [vmem:[%s624_s2] ss:$0 sm:$0xff] }
 0xa9b   : > { %2877 = vmatmul.mubr.msk.f32.vlgmr.msra.gmra.mxu1 %vm647_vm1, %v2140_v11 }
 0xa9c   : > { %2880 = vmatpush3.msra.mxu1 %v2278_v30 }
 0xa9d   : > { %2881 = vmatprep.subr.mxu1 %v2277_v32 }
 0xa9e   : > { %2882 = vmatpush3.msra.mxu1 %v2277_v32 }
 0xa9f   : > { %2883 = vmatprep.subr.mxu1 %v2276_v33 }
 0xaa0   : > { %2884 = vmatpush3.msra.mxu1 %v2276_v33 }
 0xaa1   : > { %2885 = vmatprep.subr.mxu1 %v2275_v34 }
 0xaa2   : > { %2886 = vmatpush3.msra.mxu1 %v2275_v34 }
 0xb5b   : > { %v2878_v14 = vpop.f32.mrf.mxu1 }
 0xb5c   : > { %v2225_v15 = vadd.f32 %v2878_v14, %v2692_v0 }
 0xb5d   : > { %v2219_v16 = vpop.f32.mrf.mxu1 }
 0xb5e   : > { %v2220_v17 = vadd.f32 %v2692_v0, %v2219_v16  ;;  %v2231_v18 = vadd.f32 %v2225_v15, %v3176_v7 }
 0xb60   : > { %v2235_v19 = vsel %vm647_vm1, %v2231_v18, 0.0  ;;  %v2230_v2 = vadd.f32 %v2220_v17, %v3169_v4 }
 0xb61   : > { %2236 = vadd.xlane.f32.xlu1 %v2235_v19 }
 0xb62   : > { %v2232_v20 = vsel %vm647_vm1, %v2230_v2, 0.0 }
 0xb63   : > { %2233 = vadd.xlane.f32.xlu0 %v2232_v20 }
 0xbea   : > { %v2237_v21 = vpop.xlane.xlu1 %2236 }
 0xbeb   : > { %v2240_v22 = vmul.f32 0.03125, %v2237_v21 }
 0xbec   : > { %v2234_v23 = vpop.xlane.xlu0 %2233 }
 0xbed   : > { %v2239_v24 = vmul.f32 0.03125, %v2234_v23  ;;  %v3355_v25 = vsub.f32 %v2231_v18, %v2240_v22 }
 0xbef   : > { %v3357_v26 = vsub.f32 %v2230_v2, %v2239_v24  ;;  %v2244_v27 = vmul.f32 %v3355_v25, %v3355_v25 }
 0xbf1   : > { %v2243_v7 = vmul.f32 %v3357_v26, %v3357_v26  ;;  %v2248_v28 = vsel %vm647_vm1, %v2244_v27, 0.0 }
 0xbf3   : > { %v2245_v4 = vsel %vm647_vm1, %v2243_v7, 0.0 }
 0xbf4   : > { %2246 = vadd.xlane.f32.xlu0 %v2245_v4 }
 0xbf8   : > { %2249 = vadd.xlane.f32.xlu0 %v2248_v28 }
 0xc7d   : > { %v2247_v44 = vpop.xlane.xlu0 %2246 }
 0xc7e   : > { %v2251_v43 = vmul.f32 0.03125, %v2247_v44 }
 0xc80   : > { %v2253_v45 = vadd.f32 1e-05, %v2251_v43 }
 0xc81   : > { %v2250_v46 = vpop.xlane.xlu0 %2249 }
 0xc82   : > { %2983 = vrsqrt.f32 %v2253_v45  ;;  %v2252_v47 = vmul.f32 0.03125, %v2250_v46 }
 0xc84   : > { %v2254_v48 = vadd.f32 1e-05, %v2252_v47 }
 0xc86   : > { %2985 = vrsqrt.f32 %v2254_v48 }
 0xc8f   : > { %v2984_v49 = vpop.eup %2983 }
 0xc90   : > { %v2257_v51 = vmul.f32 %v2984_v49, %v3357_v26 }
 0xc92   : > { %v2265_v53 = vmul.f32 %v2695_v50, %v2257_v51 }
 0xc93   : > { %v2986_v13 = vpop.eup %2985 }
 0xc94   : > { %v2258_v54 = vmul.f32 %v2986_v13, %v3355_v25  ;;  %v2273_v55 = vadd.f32 %v2696_v52, %v2265_v53 }
 0xc96   : > { %v2266_v56 = vmul.f32 %v2695_v50, %v2258_v54  ;;  %2887 = vmatprep.mubr.msk.f32.mxu1 %vm647_vm1, %v2273_v55 }
 0xc98   : > { %v2274_v57 = vadd.f32 %v2696_v52, %v2266_v56 }
 0xc9a   : > { %2888 = vmatmul.mubr.msk.f32.vlgmr.msra.gmra.mxu1 %vm647_vm1, %v2274_v57 }
 0xd5a   : > { %v2889_v63 = vpop.f32.mrf.mxu1 }
 0xd5b   : > { %v2381_v1 = vadd.f32 %v2889_v63, %v2697_v62 }
 0xd5c   : > { %v2375_v3 = vpop.f32.mrf.mxu1 }
 0xd5d   : > { %v2376_v5 = vadd.f32 %v2697_v62, %v2375_v3  ;;  %v2385_v9 = vmax.f32 %v2381_v1, 0.0 }
 0xd5f   : > { %v2384_v6 = vmax.f32 %v2376_v5, 0.0 }
 0xd61   : > { %2922 = vmatprep.mubr.f32.mxu0 %v2384_v6 }
 0xd62   : > { %2923 = vmatmul.mubr.f32.vlgmr.msra.gmra.mxu0 %v2385_v9 }
 0xe22   : > { %v2924_v11 = vpop.f32.mrf.mxu0 }
 0xe23   : > { %v2464_v0 = vadd.f32 %v2924_v11, %v2700_v10 }
 0xe24   : > { %v2458_v14 = vpop.f32.mrf.mxu0 }
 0xe25   : > { %v2459_v15 = vadd.f32 %v2700_v10, %v2458_v14  ;;  %v2470_v16 = vadd.f32 %v2464_v0, %v2274_v57 }
 0xe27   : > { %v2474_v17 = vsel %vm647_vm1, %v2470_v16, 0.0  ;;  %v2469_v18 = vadd.f32 %v2459_v15, %v2273_v55 }
 0xe28   : > { %2475 = vadd.xlane.f32.xlu0 %v2474_v17 }
 0xe29   : > { %v2471_v19 = vsel %vm647_vm1, %v2469_v18, 0.0 }
 0xe2a   : > { %2472 = vadd.xlane.f32.xlu1 %v2471_v19 }
 0xeb1   : > { %v2476_v2 = vpop.xlane.xlu0 %2475 }
 0xeb2   : > { %v2478_v20 = vmul.f32 0.03125, %v2476_v2 }
 0xeb3   : > { %v2473_v21 = vpop.xlane.xlu1 %2472 }
 0xeb4   : > { %v2480_v22 = vsub.f32 %v2470_v16, %v2478_v20  ;;  %v2477_v23 = vmul.f32 0.03125, %v2473_v21 }
 0xeb6   : > { %v2479_v24 = vsub.f32 %v2469_v18, %v2477_v23  ;;  %v2482_v25 = vmul.f32 %v2480_v22, %v2480_v22 }
 0xeb8   : > { %v2486_v26 = vsel %vm647_vm1, %v2482_v25, 0.0  ;;  %v2481_v7 = vmul.f32 %v2479_v24, %v2479_v24 }
 0xeb9   : > { %2487 = vadd.xlane.f32.xlu0 %v2486_v26 }
 0xeba   : > { %v2483_v4 = vsel %vm647_vm1, %v2481_v7, 0.0 }
 0xebb   : > { %2484 = vadd.xlane.f32.xlu1 %v2483_v4 }
 0xf42   : > { %v2488_v27 = vpop.xlane.xlu0 %2487 }
 0xf43   : > { %v2490_v28 = vmul.f32 0.03125, %v2488_v27 }
 0xf44   : > { %v2485_v30 = vpop.xlane.xlu1 %2484 }
 0xf45   : > { %v2492_v32 = vadd.f32 1e-05, %v2490_v28  ;;  %v2489_v33 = vmul.f32 0.03125, %v2485_v30 }
 0xf47   : > { %2987 = vrsqrt.f32 %v2492_v32  ;;  %v2491_v34 = vadd.f32 1e-05, %v2489_v33 }
 0xf49   : > { %2989 = vrsqrt.f32 %v2491_v34 }
 0xf54   : > { %v2988_v35 = vpop.eup %2987 }
 0xf55   : > { %v2496_v8 = vmul.f32 %v2988_v35, %v2480_v22 }
 0xf56   : > { %v2990_v29 = vpop.eup %2989 }
 0xf57   : > { %v2504_v31 = vmul.f32 %v2701_v36, %v2496_v8  ;;  %v2495_v38 = vmul.f32 %v2990_v29, %v2479_v24 }
 0xf59   : > { %v2512_v39 = vadd.f32 %v2702_v37, %v2504_v31  ;;  %v2503_v40 = vmul.f32 %v2701_v36, %v2495_v38 }
 0xf5b   : > { %2514 = vst.msk [vmem:[%s3465_s20 + $0x8] sm:$0xff] %vm647_vm1, %v2512_v39  ;;  %v2511_v41 = vadd.f32 %v2702_v37, %v2503_v40 }
 0xf5d   : > { %2513 = vst.msk [vmem:[%s3465_s20] sm:$0xff] %vm647_vm1, %v2511_v41 }
 0xf5e PF: > { %s3472_s26 = sld [smem:[#allocation2_spill]] }
 0xf64   : > { %s24_s29 = sadd.s32 1, %s3472_s26  }
 0xf65   : > { %p21_p5 = scmp.ge.s32.totalorder %s24_s29, 4  }
 0xf67   :  { %23 = sbr.rel (!%p21_p5) target bundleno = 6 (0x6), region = 139 }

// kernel: transformer_forward.3
= control target key start
LH: loop header
LB: loop body
LE: loop exit
PB: predicated region body
PF: predicated region fallthrough
CT: control target
= control target key end

     0   :  { %s5710_s29 = smov 0   ;;  %s6378_s0 = inlined_call_operand.vmem [shape: f32[2,8,32], index: 0, kind: input, shape index: {}]   ;;  %s6379_s1 = inlined_call_operand.vmem [shape: f32[2,8,32], index: 1, kind: input, shape index: {}]   ;;  %s6380_s2 = inlined_call_operand.vmem [shape: f32[2,8], index: 2, kind: input, shape index: {}]   ;;  %s6381_s3 = inlined_call_operand.vmem [shape: f32[2,32,96], index: 3, kind: input, shape index: {}]   ;;  %s6382_s4 = inlined_call_operand.vmem [shape: f32[2,1,96], index: 4, kind: input, shape index: {}]   ;;  %s6383_s5 = inlined_call_operand.vmem [shape: f32[2,32,32], index: 5, kind: input, shape index: {}]   ;;  %s6384_s6 = inlined_call_operand.vmem [shape: f32[2,1,32], index: 6, kind: input, shape index: {}]   ;;  %s6385_s7 = inlined_call_operand.vmem [shape: f32[2,1,32], index: 7, kind: input, shape index: {}]   ;;  %s6386_s8 = inlined_call_operand.vmem [shape: f32[2,1,32], index: 8, kind: input, shape index: {}]   ;;  %s6387_s9 = inlined_call_operand.vmem [shape: f32[2,32,32], index: 9, kind: input, shape index: {}]   ;;  %s6388_s10 = inlined_call_operand.vmem [shape: f32[2,1,32], index: 10, kind: input, shape index: {}]   ;;  %s6389_s11 = inlined_call_operand.vmem [shape: f32[2,32,64], index: 11, kind: input, shape index: {}]   ;;  %s6390_s12 = inlined_call_operand.vmem [shape: f32[2,1,64], index: 12, kind: input, shape index: {}]   ;;  %s6391_s13 = inlined_call_operand.vmem [shape: f32[2,32,32], index: 13, kind: input, shape index: {}]   ;;  %s6392_s14 = inlined_call_operand.vmem [shape: f32[2,1,32], index: 14, kind: input, shape index: {}]   ;;  %s6393_s15 = inlined_call_operand.vmem [shape: f32[2,1,32], index: 15, kind: input, shape index: {}]   ;;  %s6394_s16 = inlined_call_operand.vmem [shape: f32[2,1,32], index: 16, kind: input, shape index: {}]   ;;  %s6395_s17 = inlined_call_operand.vmem [shape: f32[2,1,32], index: 17, kind: input, shape index: {}]   ;;  %s6396_s18 = inlined_call_operand.vmem [shape: f32[2,1,32], index: 18, kind: input, shape index: {}]   ;;  %s6397_s19 = inlined_call_operand.vmem [shape: f32[2,32,128], index: 19, kind: input, shape index: {}]   ;;  %s6398_s20 = inlined_call_operand.vmem [shape: f32[2,1,128], index: 20, kind: input, shape index: {}]   ;;  %s6399_s21 = inlined_call_operand.vmem [shape: f32[2,128,32], index: 21, kind: input, shape index: {}]   ;;  %s6400_s22 = inlined_call_operand.vmem [shape: f32[2,1,32], index: 22, kind: input, shape index: {}]   ;;  %s6401_s23 = inlined_call_operand.vmem [shape: f32[32,128], index: 23, kind: input, shape index: {}]   ;;  %s6402_s24 = inlined_call_operand.vmem [shape: f32[1,128], index: 24, kind: input, shape index: {}]   ;;  %s6403_s25 = inlined_call_operand.vmem [shape: f32[16,128], index: 25, kind: output, shape index: {}]  }
   0x1   :  { %6416 = sst [smem:[#allocation7_spill]] %s6378_s0 }
   0x2   :  { %6417 = sst [smem:[#allocation8_spill]] %s6379_s1 }
   0x3   :  { %6418 = sst [smem:[#allocation9_spill]] %s6380_s2 }
   0x4   :  { %6419 = sst [smem:[#allocation10_spill]] %s6381_s3 }
   0x5   :  { %6420 = sst [smem:[#allocation11_spill]] %s6382_s4 }
   0x6   :  { %6421 = sst [smem:[#allocation12_spill]] %s6383_s5 }
   0x7   :  { %6422 = sst [smem:[#allocation13_spill]] %s6384_s6 }
   0x8   :  { %6423 = sst [smem:[#allocation14_spill]] %s6385_s7 }
   0x9   :  { %6424 = sst [smem:[#allocation15_spill]] %s6386_s8 }
   0xa   :  { %6425 = sst [smem:[#allocation16_spill]] %s6387_s9 }
   0xb   :  { %6426 = sst [smem:[#allocation17_spill]] %s6389_s11 }
   0xc   :  { %6427 = sst [smem:[#allocation18_spill]] %s6391_s13 }
   0xd   :  { %6428 = sst [smem:[#allocation19_spill]] %s6399_s21 }
   0xe   :  { %6429 = sst [smem:[#allocation20_spill]] %s6400_s22 }
   0xf   :  { %6430 = sst [smem:[#allocation21_spill]] %s6401_s23 }
  0x10   :  { %6431 = sst [smem:[#allocation22_spill]] %s6402_s24 }
  0x11   :  { %6432 = sst [smem:[#allocation23_spill]] %s6403_s25 }
  0x12 LB: > { %6433 = sst [smem:[#allocation3_spill]] %s5560_s29  ;;  %s5716_s2 = sadd.s32 4294967295, %s5560_s29   ;;  %s5560_s29 = sphi %s5710_s29, %s35_s29  }
  0x13   : > { %6434 = sst [smem:[#allocation4_spill]] %s5716_s2  ;;  %p4953_p0 = scmp.ge.s32.totalorder %s5560_s29, 1 }
  0x14   : > { %p846_p1 = scmp.lt.s32.totalorder %s5560_s29, 3 }
  0x16   : > { %p847_p2 = pnand %p4953_p0, %p846_p1 }
  0x18   : > { %850 = sbr.rel (%p847_p2) target bundleno = 7231 (0x1c3f), region = 120 }
  0x1d   : > { %p978_p3 = scmp.lt.s32.totalorder %s5716_s2, 1  ;;  %s6436_s4 = sld [smem:[#allocation10_spill]] }
  0x1e   : > { %s6438_s0 = sld [smem:[#allocation12_spill]] }
  0x1f   : > { %s5722_s6 = scalar_select %p978_p3, %s5716_s2, 1 }
  0x20   : > { %s6443_s9 = sld [smem:[#allocation16_spill]] }
  0x21   : > { %s5049_s30 = sshll.u32 %s5722_s6, 5  ;;  %s6444_s11 = sld [smem:[#allocation17_spill]] }
  0x22   : > { %s6445_s13 = sld [smem:[#allocation18_spill]]  ;;  %s5055_s24 = sshll.u32 %s5722_s6, 7 }
  0x23   : > { %s5732_s28 = scalar_lea.vmem %s6436_s4, %s5049_s30  ;;  %s6446_s27 = sld [smem:[#allocation19_spill]] }
  0x24   : > { %6437 = sst [smem:[#allocation5_spill]] %s5732_s28  ;;  %s5737_s29 = scalar_lea.vmem %s6438_s0, %s5049_s30 }
  0x25   : > { %6439 = sst [smem:[#allocation6_spill]] %s5737_s29  ;;  %s5797_s28 = scalar_lea.vmem %s6397_s19, %s5049_s30 }
  0x26   : > { %s5754_s5 = scalar_lea.vmem %s6443_s9, %s5049_s30  ;;  %s6448_s1 = sld [smem:[#allocation4_spill]] }
  0x27   : > { %s5763_s2 = scalar_lea.vmem %s6444_s11, %s5049_s30 }
  0x28   : > { %s5772_s8 = scalar_lea.vmem %s6445_s13, %s5049_s30 }
  0x29   : > { %s5807_s9 = scalar_lea.vmem %s6446_s27, %s5055_s24 }
  0x2c   : > { %p4968_p4 = scmp.ne.s32.totalorder %s6448_s1, 0 }
  0x2d   : > { %s6449_s30 = sld [smem:[#allocation7_spill]] (!%p4968_p4) }
  0x2e   : > { %1055 = sbr.rel (%p4968_p4) target bundleno = 53 (0x35), region = 124 }
  0x33   : > { %v1056_v0 = vld [vmem:[%s6449_s30] sm:$0xff]  ;;  %vm1058_vm0 = vcmask 261120   ;;  %v1057_v1 = vld [vmem:[%s6449_s30 + $0x8] sm:$0xff] }
  0x34   : > { %1059 = vst.msk [vmem:[#allocation2] sm:$0xff] %vm1058_vm0, %v1056_v0  ;;  %1060 = vst.msk [vmem:[#allocation2 + $0x8] sm:$0xff] %vm1058_vm0, %v1057_v1 }
  0x35 PF: > { %s6450_s27 = sld [smem:[#allocation5_spill]]  ;;  %vm1074_vm1 = vcmask 261120   ;;  %v5562_v8 = vmov 0.0   ;;  %vm5563_vm2 = vmmov 0   ;;  %s5564_s26 = smov 96   ;;  %vm1171_vm3 = vcmask 64512  }
  0x36   : > { %5201 = vmatprep.subr.mxu0 %v5562_v8  ;;  %5203 = vmatprep.mubr.msk.f32.mxu0 %vm5563_vm2, %v5562_v8  ;;  %s6451_s25 = sld [smem:[#allocation11_spill]]  ;;  %v1156_v16 = vlaneseq  ;;  %s5565_s22 = smov 64   ;;  %vm2532_vm5 = vcmask 195584   ;;  %vm2529_vm6 = vcmask 130048  }
  0x37   : > { %s5566_s1 = smov 88   ;;  %s5567_s11 = smov 120  }
  0x38   : > { %v5863_v17 = vshrl.u32 %v1156_v16, 7  ;;  %v1159_v18 = vand.u32 127, %v1156_v16  ;;  %s5568_s13 = smov 56   ;;  %s5569_s4 = smov 80  }
  0x39   : > { %s5570_s29 = smov 112   ;;  %s5572_s24 = smov 72  }
  0x3a   : > { %vm5866_vm4 = vcmp.ge.s32.totalorder %v5863_v17, %v1159_v18  ;;  %s5573_s7 = smov 104   ;;  %s6456_s3 = sld [smem:[#allocation13_spill]] }
  0x3b   : > { %v1066_v2 = vld [vmem:[%s6450_s27 + $0x18] sm:$0xff]  ;;  %v1065_v3 = vld [vmem:[%s6450_s27 + $0x10] sm:$0xff]  ;;  %v5822_v4 = vld [vmem:[#allocation2] sm:$0xff] }
  0x3c   : > { %5180 = vmatprep.subr.mxu1 %v1066_v2  ;;  %v1064_v5 = vld [vmem:[%s6450_s27 + $0x8] sm:$0xff]  ;;  %5188 = vmatprep.mubr.msk.f32.mxu1 %vm1074_vm1, %v5822_v4  ;;  %v1063_v6 = vld [vmem:[%s6450_s27] sm:$0xff]  ;;  %s6452_s23 = scalar_lea.vmem %s6451_s25, %s5722_s6  ;;  %s5571_s27 = smov 48  }
  0x3d   : > { %5181 = vmatpush3.msra.mxu1 %v1066_v2  ;;  %v5828_v7 = vld [vmem:[#allocation2 + $0x8] sm:$0xff]  ;;  %v4969_v10 = vld [vmem:[%s6452_s23] ss:$0 sm:$0xff]  ;;  %s5574_s25 = smov 40   ;;  %s5575_s23 = smov 8  }
  0x3e   : > { %5182 = vmatprep.subr.mxu1 %v1065_v3 }
  0x3f   : > { %5183 = vmatpush3.msra.mxu1 %v1065_v3 }
  0x40   : > { %5184 = vmatprep.subr.mxu1 %v1064_v5  ;;  %s6457_s21 = scalar_lea.vmem %s6456_s3, %s5722_s6  ;;  %s6459_s3 = sld [smem:[#allocation14_spill]] }
  0x41   : > { %5185 = vmatpush3.msra.mxu1 %v1064_v5 }
  0x42   : > { %5186 = vmatprep.subr.mxu1 %v1063_v6 }
  0x43   : > { %5187 = vmatpush3.msra.mxu1 %v1063_v6 }
  0x44   : > { %5189 = vmatmul.mubr.msk.f32.vlgmr.msra.gmra.mxu1 %vm1074_vm1, %v5828_v7  ;;  %5191 = vmatprep.subr.mxu1 %v5562_v8 }
  0x45   : > { %5193 = vmatprep.mubr.msk.f32.mxu1 %vm5563_vm2, %v5562_v8 }
 0x104   : > { %v5190_v9 = vpop.f32.mrf.mxu1 }
 0x105   : > { %v5847_v13 = vadd.f32 %v5190_v9, %v4969_v10 }
 0x106   : > { %v1147_v11 = vpop.f32.mrf.mxu1 }
 0x107   : > { %v5843_v12 = vadd.f32 %v4969_v10, %v1147_v11 }
 0x109   : > { %1169 = vrot.lane.b32.xlu0 %v5843_v12, %s5564_s26 }
 0x10d   : > { %1247 = vrot.lane.b32.xlu0 %v5847_v13, %s5564_s26 }
 0x17b   : > { %v1170_v14 = vpop.permute.xlu0 %1169 }
 0x17c   : > { %5192 = vmatpush3.xpose.msk.msra.mxu1 %vm1171_vm3, %v1170_v14 }
 0x17d   : > { %5196 = vmatprep.subr.mxu1 %v5562_v8 }
 0x17f   : > { %5194 = vmatmul.mubr.msk.f32.vlgmr.msra.gmra.mxu1 %vm1171_vm3, %v5843_v12  ;;  %v1248_v15 = vpop.permute.xlu0 %1247 }
 0x180   : > { %5197 = vmatpush3.xpose.msk.msra.mxu1 %vm1171_vm3, %v1248_v15  ;;  %5198 = vmatprep.mubr.msk.f32.mxu1 %vm5563_vm2, %v5562_v8 }
 0x181   : > { %5206 = vmatprep.subr.mxu1 %v5562_v8 }
 0x183   : > { %5199 = vmatmul.mubr.msk.f32.vlgmr.msra.gmra.mxu1 %vm1171_vm3, %v5847_v13 }
 0x184   : > { %5208 = vmatprep.mubr.msk.f32.mxu1 %vm5563_vm2, %v5562_v8 }
 0x23f   : > { %v1242_v20 = vpop.f32.mrf.mxu1 }
 0x240   : > { %v1323_v21 = vsel %vm5866_vm4, %v1242_v20, -1e+20 }
 0x241   : > { %v1325_v22 = vmul.f32 0.17677669, %v1323_v21  ;;  %v5195_v23 = vpop.f32.mrf.mxu1 }
 0x243   : > { %v1319_v24 = vpop.f32.mrf.mxu1  ;;  %v1327_v25 = vsel %vm1171_vm3, %v1325_v22, -inf }
 0x244   : > { %v1324_v26 = vsel %vm5866_vm4, %v1319_v24, -1e+20  ;;  %1328 = vmax.xlane.f32.xlu1 %v1327_v25 }
 0x245   : > { %v1326_v27 = vmul.f32 0.17677669, %v1324_v26  ;;  %v5200_v28 = vpop.f32.mrf.mxu1 }
 0x247   : > { %v1330_v29 = vsel %vm1171_vm3, %v1326_v27, -inf }
 0x248   : > { %1331 = vmax.xlane.f32.xlu1 %v1330_v29 }
 0x259   : > { %1349 = vrot.lane.b32.xlu1 %v5843_v12, %s5565_s22 }
 0x25d   : > { %1425 = vrot.lane.b32.xlu1 %v5847_v13, %s5565_s22  ;;  %s6414_s22 = smov 16  }
 0x261   : > { %1503 = vrot.lane.b32.xlu1 %v5843_v12, %s5566_s1 }
 0x265   : > { %1581 = vrot.lane.b32.xlu1 %v5847_v13, %s5566_s1 }
 0x2cd   : > { %v1329_v30 = vpop.xlane.xlu1 %1328 }
 0x2ce   : > { %v1333_v31 = vsub.f32 %v1325_v22, %v1329_v30 }
 0x2d0   : > { %v1335_v32 = vmul.f32 1.442695, %v1333_v31 }
 0x2d1   : > { %v1332_v33 = vpop.xlane.xlu1 %1331 }
 0x2d2   : > { %5478 = vpow2.f32 %v1335_v32  ;;  %v1334_v34 = vsub.f32 %v1326_v27, %v1332_v33 }
 0x2d4   : > { %v1337_v35 = vmul.f32 1.442695, %v1334_v34 }
 0x2d5   : > { %v1350_v36 = vpop.permute.xlu1 %1349 }
 0x2d6   : > { %5480 = vpow2.f32 %v1337_v35  ;;  %5202 = vmatpush3.msra.mxu0 %v1350_v36 }
 0x2d7   : > { %5211 = vmatprep.subr.mxu0 %v5562_v8 }
 0x2d9   : > { %v1426_v37 = vpop.permute.xlu1 %1425 }
 0x2da   : > { %5207 = vmatpush3.msra.mxu1 %v1426_v37 }
 0x2db   : > { %5216 = vmatprep.subr.mxu1 %v5562_v8 }
 0x2dd   : > { %v1504_v42 = vpop.permute.xlu1 %1503 }
 0x2df   : > { %v5479_v38 = vpop.eup %5478 }
 0x2e0   : > { %v1339_v39 = vsel %vm1171_vm3, %v5479_v38, 0.0 }
 0x2e1   : > { %1340 = vadd.xlane.f32.xlu0 %v1339_v39  ;;  %v1582_v43 = vpop.permute.xlu1 %1581 }
 0x2e3   : > { %v5481_v40 = vpop.eup %5480 }
 0x2e4   : > { %v1342_v41 = vsel %vm1171_vm3, %v5481_v40, 0.0 }
 0x2e5   : > { %1343 = vadd.xlane.f32.xlu1 %v1342_v41 }
 0x2f6   : > { %1579 = vrot.lane.b32.xlu1 %v5847_v13, %s5567_s11 }
 0x2f7   : > { %1501 = vrot.lane.b32.xlu0 %v5843_v12, %s5567_s11 }
 0x36a   : > { %v1341_v44 = vpop.xlane.xlu0 %1340 }
 0x36b   : > { %5482 = vrcp.f32 %v1341_v44 }
 0x36e   : > { %v1344_v45 = vpop.xlane.xlu1 %1343  ;;  %v1502_v50 = vpop.permute.xlu0 %1501 }
 0x36f   : > { %5484 = vrcp.f32 %v1344_v45 }
 0x372   : > { %v1580_v51 = vpop.permute.xlu1 %1579 }
 0x378   : > { %v5483_v46 = vpop.eup %5482 }
 0x379   : > { %v1347_v47 = vmul.f32 %v5483_v46, %v5479_v38 }
 0x37b   : > { %5204 = vmatmul.mubr.msk.f32.vlgmr.msra.gmra.mxu0 %vm1171_vm3, %v1347_v47 }
 0x37c   : > { %v5485_v48 = vpop.eup %5484  ;;  %5212 = vmatpush3.xpose.msk.msra.mxu0 %vm1171_vm3, %v1504_v42  ;;  %5213 = vmatprep.mubr.msk.f32.mxu0 %vm5563_vm2, %v5562_v8 }
 0x37d   : > { %v1348_v49 = vmul.f32 %v5485_v48, %v5481_v40  ;;  %5221 = vmatprep.subr.mxu0 %v5562_v8 }
 0x37f   : > { %5209 = vmatmul.mubr.msk.f32.vlgmr.msra.gmra.mxu1 %vm1171_vm3, %v1348_v49  ;;  %5214 = vmatmul.mubr.msk.f32.vlgmr.msra.gmra.mxu0 %vm1171_vm3, %v1502_v50 }
 0x380   : > { %5217 = vmatpush3.xpose.msk.msra.mxu1 %vm1171_vm3, %v1582_v43  ;;  %5218 = vmatprep.mubr.msk.f32.mxu1 %vm5563_vm2, %v5562_v8 }
 0x381   : > { %5226 = vmatprep.subr.mxu1 %v5562_v8  ;;  %5223 = vmatprep.mubr.msk.f32.mxu0 %vm5563_vm2, %v5562_v8 }
 0x383   : > { %5219 = vmatmul.mubr.msk.f32.vlgmr.msra.gmra.mxu1 %vm1171_vm3, %v1580_v51 }
 0x384   : > { %5228 = vmatprep.mubr.msk.f32.mxu1 %vm5563_vm2, %v5562_v8 }
 0x43b   : > { %v5906_v52 = vpop.f32.mrf.mxu0 }
 0x43d   : > { %v5205_v53 = vpop.f32.mrf.mxu0 }
 0x43f   : > { %v5908_v54 = vpop.f32.mrf.mxu1  ;;  %v1575_v55 = vpop.f32.mrf.mxu0 }
 0x440   : > { %v1657_v56 = vsel %vm5866_vm4, %v1575_v55, -1e+20 }
 0x441   : > { %v1659_v57 = vmul.f32 0.17677669, %v1657_v56  ;;  %v5210_v58 = vpop.f32.mrf.mxu1  ;;  %v5215_v59 = vpop.f32.mrf.mxu0 }
 0x443   : > { %v1653_v60 = vpop.f32.mrf.mxu1  ;;  %v1661_v61 = vsel %vm1171_vm3, %v1659_v57, -inf }
 0x444   : > { %v1658_v62 = vsel %vm5866_vm4, %v1653_v60, -1e+20  ;;  %1662 = vmax.xlane.f32.xlu1 %v1661_v61 }
 0x445   : > { %v1660_v63 = vmul.f32 0.17677669, %v1658_v62  ;;  %v5220_v0 = vpop.f32.mrf.mxu1 }
 0x447   : > { %v1664_v1 = vsel %vm1171_vm3, %v1660_v63, -inf }
 0x448   : > { %1665 = vmax.xlane.f32.xlu0 %v1664_v1 }
 0x455   : > { %1683 = vrot.lane.b32.xlu1 %v5843_v12, %s5568_s13 }
 0x459   : > { %1837 = vrot.lane.b32.xlu1 %v5843_v12, %s5569_s4 }
 0x45d   : > { %1915 = vrot.lane.b32.xlu1 %v5847_v13, %s5569_s4 }
 0x45e   : > { %1759 = vrot.lane.b32.xlu0 %v5847_v13, %s5568_s13  ;;  %s6455_s13 = sld [smem:[#allocation6_spill]] }
 0x462   : > { %1835 = vrot.lane.b32.xlu0 %v5843_v12, %s5570_s29 }
 0x4cd   : > { %v1663_v2 = vpop.xlane.xlu1 %1662 }
 0x4ce   : > { %v1667_v3 = vsub.f32 %v1659_v57, %v1663_v2 }
 0x4d0   : > { %v1669_v5 = vmul.f32 1.442695, %v1667_v3 }
 0x4d1   : > { %v1684_v6 = vpop.permute.xlu1 %1683  ;;  %v1666_v9 = vpop.xlane.xlu0 %1665 }
 0x4d2   : > { %5486 = vpow2.f32 %v1669_v5  ;;  %v1668_v10 = vsub.f32 %v1660_v63, %v1666_v9  ;;  %5222 = vmatpush3.msra.mxu0 %v1684_v6 }
 0x4d3   : > { %5231 = vmatprep.subr.mxu0 %v5562_v8 }
 0x4d4   : > { %v1671_v11 = vmul.f32 1.442695, %v1668_v10 }
 0x4d5   : > { %v1760_v14 = vpop.permute.xlu0 %1759  ;;  %v1838_v21 = vpop.permute.xlu1 %1837 }
 0x4d6   : > { %5488 = vpow2.f32 %v1671_v11  ;;  %5227 = vmatpush3.msra.mxu1 %v1760_v14 }
 0x4d7   : > { %5236 = vmatprep.subr.mxu1 %v5562_v8 }
 0x4d9   : > { %v1916_v22 = vpop.permute.xlu1 %1915  ;;  %v1836_v29 = vpop.permute.xlu0 %1835 }
 0x4df   : > { %v5487_v15 = vpop.eup %5486 }
 0x4e0   : > { %v1673_v16 = vsel %vm1171_vm3, %v5487_v15, 0.0 }
 0x4e1   : > { %1674 = vadd.xlane.f32.xlu1 %v1673_v16 }
 0x4e3   : > { %v5489_v18 = vpop.eup %5488 }
 0x4e4   : > { %v1676_v20 = vsel %vm1171_vm3, %v5489_v18, 0.0 }
 0x4e5   : > { %1677 = vadd.xlane.f32.xlu1 %v1676_v20 }
 0x4f6   : > { %1913 = vrot.lane.b32.xlu1 %v5847_v13, %s5570_s29 }
 0x56a   : > { %v1675_v23 = vpop.xlane.xlu1 %1674 }
 0x56b   : > { %5490 = vrcp.f32 %v1675_v23 }
 0x56e   : > { %v1678_v24 = vpop.xlane.xlu1 %1677 }
 0x56f   : > { %5492 = vrcp.f32 %v1678_v24 }
 0x572   : > { %v1914_v30 = vpop.permute.xlu1 %1913 }
 0x578   : > { %v5491_v25 = vpop.eup %5490 }
 0x579   : > { %v1681_v26 = vmul.f32 %v5491_v25, %v5487_v15 }
 0x57b   : > { %5224 = vmatmul.mubr.msk.f32.vlgmr.msra.gmra.mxu0 %vm1171_vm3, %v1681_v26 }
 0x57c   : > { %v5493_v27 = vpop.eup %5492  ;;  %5232 = vmatpush3.xpose.msk.msra.mxu0 %vm1171_vm3, %v1838_v21  ;;  %5233 = vmatprep.mubr.msk.f32.mxu0 %vm5563_vm2, %v5562_v8 }
 0x57d   : > { %v1682_v28 = vmul.f32 %v5493_v27, %v5489_v18  ;;  %5241 = vmatprep.subr.mxu0 %v5562_v8 }
 0x57f   : > { %5229 = vmatmul.mubr.msk.f32.vlgmr.msra.gmra.mxu1 %vm1171_vm3, %v1682_v28  ;;  %5234 = vmatmul.mubr.msk.f32.vlgmr.msra.gmra.mxu0 %vm1171_vm3, %v1836_v29 }
 0x580   : > { %5237 = vmatpush3.xpose.msk.msra.mxu1 %vm1171_vm3, %v1916_v22  ;;  %5238 = vmatprep.mubr.msk.f32.mxu1 %vm5563_vm2, %v5562_v8 }
 0x581   : > { %5246 = vmatprep.subr.mxu1 %v5562_v8  ;;  %5243 = vmatprep.mubr.msk.f32.mxu0 %vm5563_vm2, %v5562_v8 }
 0x583   : > { %5239 = vmatmul.mubr.msk.f32.vlgmr.msra.gmra.mxu1 %vm1171_vm3, %v1914_v30 }
 0x584   : > { %5248 = vmatprep.mubr.msk.f32.mxu1 %vm5563_vm2, %v5562_v8 }
 0x63b   : > { %v5946_v31 = vpop.f32.mrf.mxu0 }
 0x63d   : > { %v5225_v32 = vpop.f32.mrf.mxu0 }
 0x63f   : > { %v5948_v33 = vpop.f32.mrf.mxu1  ;;  %v1909_v34 = vpop.f32.mrf.mxu0 }
 0x640   : > { %v1991_v35 = vsel %vm5866_vm4, %v1909_v34, -1e+20 }
 0x641   : > { %v1993_v36 = vmul.f32 0.17677669, %v1991_v35  ;;  %v5230_v37 = vpop.f32.mrf.mxu1  ;;  %v5235_v38 = vpop.f32.mrf.mxu0 }
 0x643   : > { %v1987_v39 = vpop.f32.mrf.mxu1  ;;  %v1995_v40 = vsel %vm1171_vm3, %v1993_v36, -inf }
 0x644   : > { %v1992_v41 = vsel %vm5866_vm4, %v1987_v39, -1e+20  ;;  %1996 = vmax.xlane.f32.xlu0 %v1995_v40 }
 0x645   : > { %v1994_v42 = vmul.f32 0.17677669, %v1992_v41  ;;  %v5240_v43 = vpop.f32.mrf.mxu1 }
 0x646   : > { %v1164_v43 = vld [vmem:[%s6455_s13 + $0x8] sm:$0xff] }
 0x647   : > { %v1998_v44 = vsel %vm1171_vm3, %v1994_v42, -inf }
 0x648   : > { %1999 = vmax.xlane.f32.xlu1 %v1998_v44  ;;  %v1163_v44 = vld [vmem:[%s6455_s13] sm:$0xff] }
 0x659   : > { %2017 = vrot.lane.b32.xlu1 %v5843_v12, %s5571_s27 }
 0x65a   : > { %2093 = vrot.lane.b32.xlu0 %v5847_v13, %s5571_s27  ;;  %s6412_s27 = smov 24  }
 0x65d   : > { %2171 = vrot.lane.b32.xlu1 %v5843_v12, %s5572_s24 }
 0x661   : > { %2249 = vrot.lane.b32.xlu1 %v5847_v13, %s5572_s24 }
 0x665   : > { %2247 = vrot.lane.b32.xlu1 %v5847_v13, %s5573_s7 }
 0x6cd   : > { %v1997_v45 = vpop.xlane.xlu0 %1996 }
 0x6ce   : > { %v2001_v46 = vsub.f32 %v1993_v36, %v1997_v45 }
 0x6d0   : > { %v2003_v47 = vmul.f32 1.442695, %v2001_v46 }
 0x6d1   : > { %v2000_v48 = vpop.xlane.xlu1 %1999  ;;  %v2094_v49 = vpop.permute.xlu0 %2093 }
 0x6d2   : > { %5494 = vpow2.f32 %v2003_v47  ;;  %v2002_v50 = vsub.f32 %v1994_v42, %v2000_v48  ;;  %5247 = vmatpush3.msra.mxu1 %v2094_v49  ;;  %v1166_v42 = vld [vmem:[%s6455_s13 + $0x18] sm:$0xff] }
 0x6d3   : > { %5256 = vmatprep.subr.mxu1 %v5562_v8 }
 0x6d4   : > { %v2005_v51 = vmul.f32 1.442695, %v2002_v50 }
 0x6d5   : > { %v2018_v53 = vpop.permute.xlu1 %2017 }
 0x6d6   : > { %5496 = vpow2.f32 %v2005_v51  ;;  %5242 = vmatpush3.msra.mxu0 %v2018_v53 }
 0x6d7   : > { %5251 = vmatprep.subr.mxu0 %v5562_v8 }
 0x6d9   : > { %v2172_v61 = vpop.permute.xlu1 %2171 }
 0x6dd   : > { %v2250_v1 = vpop.permute.xlu1 %2249 }
 0x6df   : > { %v5495_v55 = vpop.eup %5494 }
 0x6e0   : > { %v2007_v56 = vsel %vm1171_vm3, %v5495_v55, 0.0 }
 0x6e1   : > { %2008 = vadd.xlane.f32.xlu0 %v2007_v56  ;;  %v2248_v5 = vpop.permute.xlu1 %2247 }
 0x6e3   : > { %v5497_v57 = vpop.eup %5496 }
 0x6e4   : > { %v2010_v58 = vsel %vm1171_vm3, %v5497_v57, 0.0 }
 0x6e5   : > { %2011 = vadd.xlane.f32.xlu0 %v2010_v58 }
 0x6fb   : > { %2169 = vrot.lane.b32.xlu0 %v5843_v12, %s5573_s7 }
 0x76a   : > { %v2009_v59 = vpop.xlane.xlu0 %2008 }
 0x76b   : > { %5498 = vrcp.f32 %v2009_v59 }
 0x76e   : > { %v2012_v60 = vpop.xlane.xlu0 %2011 }
 0x76f   : > { %5500 = vrcp.f32 %v2012_v60 }
 0x772   : > { %v2170_v3 = vpop.permute.xlu0 %2169 }
 0x778   : > { %v5499_v62 = vpop.eup %5498 }
 0x779   : > { %v2015_v63 = vmul.f32 %v5499_v62, %v5495_v55 }
 0x77b   : > { %5244 = vmatmul.mubr.msk.f32.vlgmr.msra.gmra.mxu0 %vm1171_vm3, %v2015_v63 }
 0x77c   : > { %v5501_v0 = vpop.eup %5500  ;;  %5252 = vmatpush3.xpose.msk.msra.mxu0 %vm1171_vm3, %v2172_v61  ;;  %5253 = vmatprep.mubr.msk.f32.mxu0 %vm5563_vm2, %v5562_v8 }
 0x77d   : > { %v2016_v2 = vmul.f32 %v5501_v0, %v5497_v57  ;;  %5261 = vmatprep.subr.mxu0 %v5562_v8 }
 0x77f   : > { %5249 = vmatmul.mubr.msk.f32.vlgmr.msra.gmra.mxu1 %vm1171_vm3, %v2016_v2  ;;  %5254 = vmatmul.mubr.msk.f32.vlgmr.msra.gmra.mxu0 %vm1171_vm3, %v2170_v3 }
 0x780   : > { %5257 = vmatpush3.xpose.msk.msra.mxu1 %vm1171_vm3, %v2250_v1  ;;  %5258 = vmatprep.mubr.msk.f32.mxu1 %vm5563_vm2, %v5562_v8 }
 0x781   : > { %5266 = vmatprep.subr.mxu1 %v5562_v8  ;;  %5263 = vmatprep.mubr.msk.f32.mxu0 %vm5563_vm2, %v5562_v8 }
 0x783   : > { %5259 = vmatmul.mubr.msk.f32.vlgmr.msra.gmra.mxu1 %vm1171_vm3, %v2248_v5 }
 0x784   : > { %5268 = vmatprep.mubr.msk.f32.mxu1 %vm5563_vm2, %v5562_v8 }
 0x83b   : > { %v2089_v6 = vpop.f32.mrf.mxu0 }
 0x83d   : > { %v5245_v9 = vpop.f32.mrf.mxu0 }
 0x83f   : > { %v2165_v10 = vpop.f32.mrf.mxu1  ;;  %v2243_v11 = vpop.f32.mrf.mxu0 }
 0x840   : > { %v2325_v14 = vsel %vm5866_vm4, %v2243_v11, -1e+20 }
 0x841   : > { %v2327_v15 = vmul.f32 0.17677669, %v2325_v14  ;;  %v5250_v16 = vpop.f32.mrf.mxu1  ;;  %v5255_v18 = vpop.f32.mrf.mxu0 }
 0x843   : > { %v2321_v20 = vpop.f32.mrf.mxu1  ;;  %v2329_v21 = vsel %vm1171_vm3, %v2327_v15, -inf }
 0x844   : > { %v2326_v22 = vsel %vm5866_vm4, %v2321_v20, -1e+20  ;;  %2330 = vmax.xlane.f32.xlu0 %v2329_v21  ;;  %v2766_v21 = vld [vmem:[%s5763_s2 + $0x18] sm:$0xff] }
 0x845   : > { %v2328_v23 = vmul.f32 0.17677669, %v2326_v22  ;;  %v5260_v24 = vpop.f32.mrf.mxu1  ;;  %v2765_v22 = vld [vmem:[%s5763_s2 + $0x10] sm:$0xff] }
 0x846   : > { %v2673_v24 = vld [vmem:[%s5754_s5 + $0x10] sm:$0xff] }
 0x847   : > { %v2332_v25 = vsel %vm1171_vm3, %v2328_v23, -inf }
 0x848   : > { %2333 = vmax.xlane.f32.xlu1 %v2332_v25  ;;  %v2764_v25 = vld [vmem:[%s5763_s2 + $0x8] sm:$0xff] }
 0x859   : > { %2351 = vrot.lane.b32.xlu1 %v5843_v12, %s5574_s25 }
 0x85d   : > { %2505 = vrot.lane.b32.xlu1 %v5946_v31, %s5575_s23 }
 0x861   : > { %2507 = vrot.lane.b32.xlu1 %v5948_v33, %s5575_s23 }
 0x865   : > { %2515 = vrot.lane.b32.xlu1 %v2165_v10, %s6414_s22 }
 0x8cd   : > { %v2331_v19 = vpop.xlane.xlu0 %2330 }
 0x8ce   : > { %v2335_v26 = vsub.f32 %v2327_v15, %v2331_v19 }
 0x8d0   : > { %v2337_v27 = vmul.f32 1.442695, %v2335_v26  ;;  %v2763_v26 = vld [vmem:[%s5763_s2] sm:$0xff]  ;;  %s6463_s2 = scalar_lea.vmem %s6390_s12, %s5722_s6 }
 0x8d1   : > { %v2334_v28 = vpop.xlane.xlu1 %2333 }
 0x8d2   : > { %5502 = vpow2.f32 %v2337_v27  ;;  %v2336_v29 = vsub.f32 %v2328_v23, %v2334_v28  ;;  %v2674_v23 = vld [vmem:[%s5754_s5 + $0x18] sm:$0xff]  ;;  %v2672_v27 = vld [vmem:[%s5754_s5 + $0x8] sm:$0xff] }
 0x8d4   : > { %v2339_v30 = vmul.f32 1.442695, %v2336_v29  ;;  %v2671_v29 = vld [vmem:[%s5754_s5] sm:$0xff] }
 0x8d5   : > { %v2352_v32 = vpop.permute.xlu1 %2351 }
 0x8d6   : > { %5504 = vpow2.f32 %v2339_v30  ;;  %5262 = vmatpush3.msra.mxu0 %v2352_v32 }
 0x8d7   : > { %5293 = vmatprep.subr.mxu0 %v2766_v21 }
 0x8d9   : > { %v2506_v49 = vpop.permute.xlu1 %2505 }
 0x8da   : > { %v2527_v53 = vsel %vm1171_vm3, %v5906_v52, %v2506_v49  ;;  %v4996_v52 = vld [vmem:[%s6457_s21] ss:$0 sm:$0xff]  ;;  %s6460_s21 = scalar_lea.vmem %s6459_s3, %s5722_s6  ;;  %s6471_s3 = scalar_lea.vmem %s6398_s20, %s5722_s6 }
 0x8dd   : > { %v2508_v50 = vpop.permute.xlu1 %2507 }
 0x8de   : > { %v2528_v59 = vsel %vm1171_vm3, %v5908_v54, %v2508_v50 }
 0x8df   : > { %v5503_v12 = vpop.eup %5502 }
 0x8e0   : > { %v2341_v34 = vsel %vm1171_vm3, %v5503_v12, 0.0 }
 0x8e1   : > { %2342 = vadd.xlane.f32.xlu0 %v2341_v34  ;;  %v2516_v55 = vpop.permute.xlu1 %2515 }
 0x8e2   : > { %v2531_v60 = vsel %vm2529_vm6, %v2528_v59, %v2516_v55 }
 0x8e3   : > { %v5505_v31 = vpop.eup %5504 }
 0x8e4   : > { %v2344_v33 = vsel %vm1171_vm3, %v5505_v31, 0.0 }
 0x8e5   : > { %2345 = vadd.xlane.f32.xlu0 %v2344_v33 }
 0x8fb   : > { %2427 = vrot.lane.b32.xlu0 %v5847_v13, %s5574_s25  ;;  %v1165_v13 = vld [vmem:[%s6455_s13 + $0x10] sm:$0xff]  ;;  %s6458_s25 = sld [smem:[#allocation8_spill]] }
 0x8fc   : > { %s6472_s13 = sld [smem:[#allocation20_spill]] }
 0x8ff   : > { %2513 = vrot.lane.b32.xlu0 %v2089_v6, %s6414_s22 }
 0x901   : > { %v2669_v19 = vld [vmem:[%s6458_s25] sm:$0xff]  ;;  %v2670_v28 = vld [vmem:[%s6458_s25 + $0x8] sm:$0xff] }
 0x96a   : > { %v2343_v35 = vpop.xlane.xlu0 %2342 }
 0x96b   : > { %5506 = vrcp.f32 %v2343_v35 }
 0x96e   : > { %v2346_v36 = vpop.xlane.xlu0 %2345 }
 0x96f   : > { %5508 = vrcp.f32 %v2346_v36  ;;  %v4999_v36 = vld [vmem:[%s6460_s21] ss:$0 sm:$0xff]  ;;  %s6464_s21 = scalar_lea.vmem %s6388_s10, %s5722_s6 }
 0x970   : > { %v5001_v50 = vld [vmem:[%s6464_s21] ss:$0 sm:$0xff] }
 0x972   : > { %v2428_v37 = vpop.permute.xlu0 %2427 }
 0x973   : > { %5267 = vmatpush3.msra.mxu1 %v2428_v37 }
 0x974   : > { %5271 = vmatprep.subr.mxu1 %v1166_v42 }
 0x976   : > { %v2514_v51 = vpop.permute.xlu0 %2513 }
 0x977   : > { %v2530_v56 = vsel %vm2529_vm6, %v2527_v53, %v2514_v51 }
 0x978   : > { %v5507_v38 = vpop.eup %5506 }
 0x979   : > { %v2349_v39 = vmul.f32 %v5507_v38, %v5503_v12 }
 0x97b   : > { %5264 = vmatmul.mubr.msk.f32.vlgmr.msra.gmra.mxu0 %vm1171_vm3, %v2349_v39 }
 0x97c   : > { %v5509_v40 = vpop.eup %5508  ;;  %5294 = vmatpush3.msra.mxu0 %v2766_v21  ;;  %5301 = vmatprep.mubr.msk.f32.mxu0 %vm1074_vm1, %v2669_v19 }
 0x97d   : > { %v2350_v41 = vmul.f32 %v5509_v40, %v5505_v31  ;;  %5295 = vmatprep.subr.mxu0 %v2765_v22 }
 0x97e   : > { %5296 = vmatpush3.msra.mxu0 %v2765_v22 }
 0x97f   : > { %5269 = vmatmul.mubr.msk.f32.vlgmr.msra.gmra.mxu1 %vm1171_vm3, %v2350_v41  ;;  %5297 = vmatprep.subr.mxu0 %v2764_v25 }
 0x980   : > { %5272 = vmatpush3.msra.mxu1 %v1166_v42  ;;  %5298 = vmatpush3.msra.mxu0 %v2764_v25 }
 0x981   : > { %5273 = vmatprep.subr.mxu1 %v1165_v13  ;;  %5299 = vmatprep.subr.mxu0 %v2763_v26 }
 0x982   : > { %5274 = vmatpush3.msra.mxu1 %v1165_v13  ;;  %5300 = vmatpush3.msra.mxu0 %v2763_v26 }
 0x983   : > { %5275 = vmatprep.subr.mxu1 %v1164_v43  ;;  %5302 = vmatmul.mubr.msk.f32.vlgmr.msra.gmra.mxu0 %vm1074_vm1, %v2670_v28 }
 0x984   : > { %5276 = vmatpush3.msra.mxu1 %v1164_v43  ;;  %5314 = vmatprep.subr.mxu0 %v5562_v8 }
 0x985   : > { %5277 = vmatprep.subr.mxu1 %v1163_v44  ;;  %5316 = vmatprep.mubr.msk.f32.mxu0 %vm5563_vm2, %v5562_v8 }
 0x986   : > { %5278 = vmatpush3.msra.mxu1 %v1163_v44  ;;  %v5004_v44 = vld [vmem:[%s6463_s2] ss:$0 sm:$0xff] }
 0x987   : > { %5282 = vmatprep.subr.mxu1 %v2674_v23 }
 0xa3b   : > { %v2423_v45 = vpop.f32.mrf.mxu0 }
 0xa3c   : > { %2521 = vrot.lane.b32.xlu0 %v2423_v45, %s6412_s27 }
 0xa3d   : > { %v5265_v46 = vpop.f32.mrf.mxu0 }
 0xa3f   : > { %v2499_v47 = vpop.f32.mrf.mxu1 }
 0xa40   : > { %2523 = vrot.lane.b32.xlu1 %v2499_v47, %s6412_s27  ;;  %s6461_s27 = sld [smem:[#allocation15_spill]] }
 0xa41   : > { %v5270_v48 = vpop.f32.mrf.mxu1 }
 0xa43   : > { %v5303_v45 = vpop.f32.mrf.mxu0 }
 0xa44   : > { %v6076_v46 = vadd.f32 %v5303_v45, %v5004_v44 }
 0xa45   : > { %v2846_v47 = vpop.f32.mrf.mxu0 }
 0xa46   : > { %s6462_s22 = scalar_lea.vmem %s6461_s27, %s5722_s6  ;;  %v6078_v48 = vadd.f32 %v5004_v44, %v2846_v47  ;;  %s6465_s27 = sld [smem:[#allocation9_spill]] }
 0xa47   : > { %v5000_v38 = vld [vmem:[%s6462_s22] ss:$0 sm:$0xff]  ;;  %s6470_s22 = scalar_lea.vmem %s6394_s16, %s5722_s6 }
 0xaae   : > { %v2522_v57 = vpop.permute.xlu0 %2521 }
 0xaaf   : > { %v2533_v58 = vsel %vm2532_vm5, %v2530_v56, %v2522_v57  ;;  %v5578_v56 = vmov 1966171168  }
 0xab0   : > { %5279 = vmatprep.mubr.msk.f32.mxu1 %vm1074_vm1, %v2533_v58  ;;  %v2866_v57 = vunpack.c.l.s4 %v5578_v56 }
 0xab2   : > { %v2524_v61 = vpop.permute.xlu1 %2523  ;;  %v2867_v58 = vunpack.c.0.s8 %v2866_v57 }
 0xab3   : > { %v2534_v62 = vsel %vm2532_vm5, %v2531_v60, %v2524_v61  ;;  %v5007_v60 = vld.sshfl [vmem:[%s6465_s27] sm:$0x11 pattern:$0x75316420] }
 0xab4   : > { %5280 = vmatmul.mubr.msk.f32.vlgmr.msra.gmra.mxu1 %vm1074_vm1, %v2534_v62  ;;  %v2870_v59 = vsub.s32 %v2867_v58, %v5863_v17  ;;  %v2864_v62 = vcombine.high %v5007_v60, %v5007_v60 }
 0xab5   : > { %5283 = vmatpush3.msra.mxu1 %v2674_v23 }
 0xab6   : > { %5284 = vmatprep.subr.mxu1 %v2673_v24  ;;  %v2871_v61 = vrot.slane %v5007_v60, %v2870_v59 }
 0xab7   : > { %5285 = vmatpush3.msra.mxu1 %v2673_v24 }
 0xab8   : > { %5286 = vmatprep.subr.mxu1 %v2672_v27  ;;  %vm2881_vm7 = vcmp.ne.f32.partialorder %v2871_v61, 0.0 }
 0xab9   : > { %5287 = vmatpush3.msra.mxu1 %v2672_v27 }
 0xaba   : > { %5288 = vmatprep.subr.mxu1 %v2671_v29 }
 0xabb   : > { %5289 = vmatpush3.msra.mxu1 %v2671_v29 }
 0xabc   : > { %5304 = vmatprep.subr.mxu1 %v5562_v8 }
 0xb74   : > { %v5281_v63 = vpop.f32.mrf.mxu1 }
 0xb75   : > { %v2619_v0 = vadd.f32 %v5281_v63, %v4996_v52  ;;  %v2887_v63 = vsub.s32 0, %v5863_v17 }
 0xb76   : > { %v2613_v1 = vpop.f32.mrf.mxu1 }
 0xb77   : > { %v2614_v2 = vadd.f32 %v4996_v52, %v2613_v1  ;;  %v2625_v3 = vadd.f32 %v2619_v0, %v5828_v7  ;;  %v2878_v52 = vrot.slane %v2864_v62, %v2870_v59  ;;  %v5579_v0 = vmov 0  }
 0xb78   : > { %v2883_v1 = vsel %vm2881_vm7, 1, %v5579_v0 }
 0xb79   : > { %v2629_v54 = vsel %vm1074_vm1, %v2625_v3, 0.0  ;;  %v2624_v5 = vadd.f32 %v2614_v2, %v5822_v4  ;;  %vm2882_vm8 = vcmp.ne.f32.partialorder %v2878_v52, 0.0  ;;  %v6108_v2 = vrot.slane %v2883_v1, %v2887_v63 }
 0xb7a   : > { %2630 = vadd.xlane.f32.xlu1 %v2629_v54 }
 0xb7b   : > { %v2626_v6 = vsel %vm1074_vm1, %v2624_v5, 0.0  ;;  %vm2893_vm9 = vcmp.eq.s32.totalorder %v6108_v2, 1 }
 0xb7c   : > { %2627 = vadd.xlane.f32.xlu0 %v2626_v6 }
 0xc03   : > { %v2631_v9 = vpop.xlane.xlu1 %2630 }
 0xc04   : > { %v2634_v10 = vmul.f32 0.03125, %v2631_v9 }
 0xc05   : > { %v2628_v11 = vpop.xlane.xlu0 %2627 }
 0xc06   : > { %v2633_v14 = vmul.f32 0.03125, %v2628_v11  ;;  %v2636_v15 = vsub.f32 %v2625_v3, %v2634_v10  ;;  %v2884_v3 = vsel %vm2882_vm8, 1, %v5579_v0 }
 0xc07   : > { %v6111_v54 = vrot.slane %v2884_v3, %v2887_v63 }
 0xc08   : > { %v2635_v16 = vsub.f32 %v2624_v5, %v2633_v14  ;;  %v2638_v20 = vmul.f32 %v2636_v15, %v2636_v15 }
 0xc09   : > { %vm2894_vm10 = vcmp.eq.s32.totalorder %v6111_v54, 1 }
 0xc0a   : > { %v2637_v7 = vmul.f32 %v2635_v16, %v2635_v16  ;;  %v2642_v4 = vsel %vm1074_vm1, %v2638_v20, 0.0 }
 0xc0c   : > { %v2639_v18 = vsel %vm1074_vm1, %v2637_v7, 0.0 }
 0xc0d   : > { %2640 = vadd.xlane.f32.xlu0 %v2639_v18 }
 0xc11   : > { %2643 = vadd.xlane.f32.xlu0 %v2642_v4 }
 0xc96   : > { %v2641_v30 = vpop.xlane.xlu0 %2640 }
 0xc97   : > { %v2645_v32 = vmul.f32 0.03125, %v2641_v30 }
 0xc99   : > { %v2647_v12 = vadd.f32 1e-05, %v2645_v32 }
 0xc9a   : > { %v2644_v34 = vpop.xlane.xlu0 %2643 }
 0xc9b   : > { %5510 = vrsqrt.f32 %v2647_v12  ;;  %v2646_v31 = vmul.f32 0.03125, %v2644_v34 }
 0xc9d   : > { %v2648_v33 = vadd.f32 1e-05, %v2646_v31 }
 0xc9f   : > { %5512 = vrsqrt.f32 %v2648_v33 }
 0xca8   : > { %v5511_v35 = vpop.eup %5510 }
 0xca9   : > { %v2651_v37 = vmul.f32 %v5511_v35, %v2635_v16 }
 0xcab   : > { %v2659_v39 = vmul.f32 %v4999_v36, %v2651_v37 }
 0xcac   : > { %v5513_v40 = vpop.eup %5512 }
 0xcad   : > { %v2652_v41 = vmul.f32 %v5513_v40, %v2636_v15  ;;  %v6061_v42 = vadd.f32 %v5000_v38, %v2659_v39 }
 0xcaf   : > { %v2660_v13 = vmul.f32 %v4999_v36, %v2652_v41  ;;  %5290 = vmatprep.mubr.msk.f32.mxu1 %vm1074_vm1, %v6061_v42 }
 0xcb1   : > { %v6065_v43 = vadd.f32 %v5000_v38, %v2660_v13 }
 0xcb3   : > { %5291 = vmatmul.mubr.msk.f32.vlgmr.msra.gmra.mxu1 %vm1074_vm1, %v6065_v43 }
 0xcb4   : > { %5306 = vmatprep.mubr.msk.f32.mxu1 %vm5563_vm2, %v5562_v8  ;;  %5305 = vmatpush3.xpose.msk.msra.mxu1 %vm1171_vm3, %v6078_v48 }
 0xcb5   : > { %5309 = vmatprep.subr.mxu1 %v5562_v8 }
 0xd73   : > { %v5292_v49 = vpop.f32.mrf.mxu1 }
 0xd74   : > { %v6096_v55 = vadd.f32 %v5292_v49, %v5001_v50 }
 0xd75   : > { %v2754_v51 = vpop.f32.mrf.mxu1 }
 0xd76   : > { %v6088_v53 = vadd.f32 %v5001_v50, %v2754_v51 }
 0xd78   : > { %5307 = vmatmul.mubr.msk.f32.vlgmr.msra.gmra.mxu1 %vm1171_vm3, %v6088_v53 }
 0xd79   : > { %5310 = vmatpush3.xpose.msk.msra.mxu1 %vm1171_vm3, %v6076_v46  ;;  %5311 = vmatprep.mubr.msk.f32.mxu1 %vm5563_vm2, %v5562_v8 }
 0xd7a   : > { %5319 = vmatprep.subr.mxu1 %v5562_v8 }
 0xd7c   : > { %5312 = vmatmul.mubr.msk.f32.vlgmr.msra.gmra.mxu1 %vm1171_vm3, %v6096_v55 }
 0xd7d   : > { %5321 = vmatprep.mubr.msk.f32.mxu1 %vm5563_vm2, %v5562_v8 }
 0xe38   : > { %v2972_v5 = vpop.f32.mrf.mxu1 }
 0xe39   : > { %v3052_v6 = vsel %vm2893_vm9, %v2972_v5, -1e+20 }
 0xe3a   : > { %v3054_v9 = vmul.f32 0.17677669, %v3052_v6  ;;  %v5308_v10 = vpop.f32.mrf.mxu1 }
 0xe3c   : > { %v3048_v11 = vpop.f32.mrf.mxu1  ;;  %v3056_v17 = vsel %vm1171_vm3, %v3054_v9, -inf }
 0xe3d   : > { %v3053_v14 = vsel %vm2894_vm10, %v3048_v11, -1e+20  ;;  %3057 = vmax.xlane.f32.xlu1 %v3056_v17 }
 0xe3e   : > { %v3055_v15 = vmul.f32 0.17677669, %v3053_v14  ;;  %v5313_v16 = vpop.f32.mrf.mxu1 }
 0xe40   : > { %v3059_v7 = vsel %vm1171_vm3, %v3055_v15, -inf }
 0xe41   : > { %3060 = vmax.xlane.f32.xlu0 %v3059_v7 }
 0xe4e   : > { %3078 = vrot.lane.b32.xlu1 %v6078_v48, %s5564_s26 }
 0xe52   : > { %3232 = vrot.lane.b32.xlu1 %v6078_v48, %s5567_s11 }
 0xe56   : > { %3310 = vrot.lane.b32.xlu1 %v6076_v46, %s5567_s11 }
 0xe57   : > { %3154 = vrot.lane.b32.xlu0 %v6076_v46, %s5564_s26  ;;  %s6466_s26 = smov 16  }
 0xec6   : > { %v3058_v18 = vpop.xlane.xlu1 %3057 }
 0xec7   : > { %v3062_v20 = vsub.f32 %v3054_v9, %v3058_v18 }
 0xec9   : > { %v3064_v4 = vmul.f32 1.442695, %v3062_v20 }
 0xeca   : > { %v3079_v21 = vpop.permute.xlu1 %3078  ;;  %v3061_v22 = vpop.xlane.xlu0 %3060 }
 0xecb   : > { %5514 = vpow2.f32 %v3064_v4  ;;  %v3063_v23 = vsub.f32 %v3055_v15, %v3061_v22  ;;  %5315 = vmatpush3.msra.mxu0 %v3079_v21 }
 0xecc   : > { %5324 = vmatprep.subr.mxu0 %v5562_v8 }
 0xecd   : > { %v3066_v24 = vmul.f32 1.442695, %v3063_v23 }
 0xece   : > { %v3155_v25 = vpop.permute.xlu0 %3154  ;;  %v3233_v29 = vpop.permute.xlu1 %3232 }
 0xecf   : > { %5516 = vpow2.f32 %v3066_v24  ;;  %5320 = vmatpush3.msra.mxu1 %v3155_v25 }
 0xed0   : > { %5329 = vmatprep.subr.mxu1 %v5562_v8 }
 0xed2   : > { %v3311_v30 = vpop.permute.xlu1 %3310 }
 0xed8   : > { %v5515_v19 = vpop.eup %5514 }
 0xed9   : > { %v3068_v26 = vsel %vm1171_vm3, %v5515_v19, 0.0 }
 0xeda   : > { %3069 = vadd.xlane.f32.xlu1 %v3068_v26 }
 0xedc   : > { %v5517_v27 = vpop.eup %5516 }
 0xedd   : > { %v3071_v28 = vsel %vm1171_vm3, %v5517_v27, 0.0 }
 0xede   : > { %3072 = vadd.xlane.f32.xlu0 %v3071_v28 }
 0xeeb   : > { %3308 = vrot.lane.b32.xlu1 %v6096_v55, %s5567_s11 }
 0xef4   : > { %3230 = vrot.lane.b32.xlu0 %v6088_v53, %s5567_s11 }
 0xf63   : > { %v3070_v32 = vpop.xlane.xlu1 %3069 }
 0xf64   : > { %5518 = vrcp.f32 %v3070_v32 }
 0xf67   : > { %v3073_v12 = vpop.xlane.xlu0 %3072  ;;  %v3309_v37 = vpop.permute.xlu1 %3308 }
 0xf68   : > { %5520 = vrcp.f32 %v3073_v12 }
 0xf6b   : > { %v3231_v36 = vpop.permute.xlu0 %3230 }
 0xf71   : > { %v5519_v34 = vpop.eup %5518 }
 0xf72   : > { %v3076_v31 = vmul.f32 %v5519_v34, %v5515_v19 }
 0xf74   : > { %5317 = vmatmul.mubr.msk.f32.vlgmr.msra.gmra.mxu0 %vm1171_vm3, %v3076_v31 }
 0xf75   : > { %v5521_v33 = vpop.eup %5520  ;;  %5325 = vmatpush3.xpose.msk.msra.mxu0 %vm1171_vm3, %v3233_v29  ;;  %5326 = vmatprep.mubr.msk.f32.mxu0 %vm5563_vm2, %v5562_v8 }
 0xf76   : > { %v3077_v35 = vmul.f32 %v5521_v33, %v5517_v27  ;;  %5334 = vmatprep.subr.mxu0 %v5562_v8 }
 0xf78   : > { %5322 = vmatmul.mubr.msk.f32.vlgmr.msra.gmra.mxu1 %vm1171_vm3, %v3077_v35  ;;  %5327 = vmatmul.mubr.msk.f32.vlgmr.msra.gmra.mxu0 %vm1171_vm3, %v3231_v36 }
 0xf79   : > { %5330 = vmatpush3.xpose.msk.msra.mxu1 %vm1171_vm3, %v3311_v30  ;;  %5331 = vmatprep.mubr.msk.f32.mxu1 %vm5563_vm2, %v5562_v8 }
 0xf7a   : > { %5339 = vmatprep.subr.mxu1 %v5562_v8  ;;  %5336 = vmatprep.mubr.msk.f32.mxu0 %vm5563_vm2, %v5562_v8 }
 0xf7c   : > { %5332 = vmatmul.mubr.msk.f32.vlgmr.msra.gmra.mxu1 %vm1171_vm3, %v3309_v37 }
 0xf7d   : > { %5341 = vmatprep.mubr.msk.f32.mxu1 %vm5563_vm2, %v5562_v8 }
0x1034   : > { %v6152_v38 = vpop.f32.mrf.mxu0 }
0x1036   : > { %v5318_v39 = vpop.f32.mrf.mxu0 }
0x1038   : > { %v6154_v40 = vpop.f32.mrf.mxu1  ;;  %v3304_v41 = vpop.f32.mrf.mxu0 }
0x1039   : > { %v3386_v13 = vsel %vm2893_vm9, %v3304_v41, -1e+20 }
0x103a   : > { %v3388_v44 = vmul.f32 0.17677669, %v3386_v13  ;;  %v5323_v45 = vpop.f32.mrf.mxu1  ;;  %v5328_v47 = vpop.f32.mrf.mxu0 }
0x103c   : > { %v3382_v49 = vpop.f32.mrf.mxu1  ;;  %v3390_v50 = vsel %vm1171_vm3, %v3388_v44, -inf }
0x103d   : > { %v3387_v51 = vsel %vm2894_vm10, %v3382_v49, -1e+20  ;;  %3391 = vmax.xlane.f32.xlu0 %v3390_v50 }
0x103e   : > { %v3389_v56 = vmul.f32 0.17677669, %v3387_v51  ;;  %v5333_v57 = vpop.f32.mrf.mxu1 }
0x1040   : > { %v3393_v58 = vsel %vm1171_vm3, %v3389_v56, -inf }
0x1041   : > { %3394 = vmax.xlane.f32.xlu1 %v3393_v58 }
0x1052   : > { %3412 = vrot.lane.b32.xlu1 %v6078_v48, %s5566_s1 }
0x1053   : > { %3488 = vrot.lane.b32.xlu0 %v6076_v46, %s5566_s1  ;;  %s6467_s1 = smov 24  }
0x1056   : > { %3566 = vrot.lane.b32.xlu1 %v6078_v48, %s5570_s29 }
0x105a   : > { %3644 = vrot.lane.b32.xlu1 %v6076_v46, %s5570_s29 }
0x105e   : > { %3642 = vrot.lane.b32.xlu1 %v6096_v55, %s5570_s29 }
0x10c6   : > { %v3392_v59 = vpop.xlane.xlu0 %3391 }
0x10c7   : > { %v3396_v60 = vsub.f32 %v3388_v44, %v3392_v59 }
0x10c9   : > { %v3398_v61 = vmul.f32 1.442695, %v3396_v60 }
0x10ca   : > { %v3489_v62 = vpop.permute.xlu0 %3488  ;;  %v3395_v52 = vpop.xlane.xlu1 %3394 }
0x10cb   : > { %5522 = vpow2.f32 %v3398_v61  ;;  %v3397_v63 = vsub.f32 %v3389_v56, %v3395_v52  ;;  %5340 = vmatpush3.msra.mxu1 %v3489_v62 }
0x10cc   : > { %5349 = vmatprep.subr.mxu1 %v5562_v8 }
0x10cd   : > { %v3400_v0 = vmul.f32 1.442695, %v3397_v63 }
0x10ce   : > { %v3413_v1 = vpop.permute.xlu1 %3412 }
0x10cf   : > { %5524 = vpow2.f32 %v3400_v0  ;;  %5335 = vmatpush3.msra.mxu0 %v3413_v1 }
0x10d0   : > { %5344 = vmatprep.subr.mxu0 %v5562_v8 }
0x10d2   : > { %v3567_v17 = vpop.permute.xlu1 %3566 }
0x10d6   : > { %v3645_v7 = vpop.permute.xlu1 %3644 }
0x10d8   : > { %v5523_v3 = vpop.eup %5522 }
0x10d9   : > { %v3402_v5 = vsel %vm1171_vm3, %v5523_v3, 0.0 }
0x10da   : > { %3403 = vadd.xlane.f32.xlu0 %v3402_v5  ;;  %v3643_v4 = vpop.permute.xlu1 %3642 }
0x10dc   : > { %v5525_v6 = vpop.eup %5524 }
0x10dd   : > { %v3405_v9 = vsel %vm1171_vm3, %v5525_v6, 0.0 }
0x10de   : > { %3406 = vadd.xlane.f32.xlu0 %v3405_v9 }
0x10f4   : > { %3564 = vrot.lane.b32.xlu0 %v6088_v53, %s5570_s29 }
0x1163   : > { %v3404_v10 = vpop.xlane.xlu0 %3403 }
0x1164   : > { %5526 = vrcp.f32 %v3404_v10 }
0x1167   : > { %v3407_v11 = vpop.xlane.xlu0 %3406 }
0x1168   : > { %5528 = vrcp.f32 %v3407_v11 }
0x116b   : > { %v3565_v20 = vpop.permute.xlu0 %3564 }
0x1171   : > { %v5527_v14 = vpop.eup %5526 }
0x1172   : > { %v3410_v15 = vmul.f32 %v5527_v14, %v5523_v3 }
0x1174   : > { %5337 = vmatmul.mubr.msk.f32.vlgmr.msra.gmra.mxu0 %vm1171_vm3, %v3410_v15 }
0x1175   : > { %v5529_v16 = vpop.eup %5528  ;;  %5345 = vmatpush3.xpose.msk.msra.mxu0 %vm1171_vm3, %v3567_v17  ;;  %5346 = vmatprep.mubr.msk.f32.mxu0 %vm5563_vm2, %v5562_v8 }
0x1176   : > { %v3411_v18 = vmul.f32 %v5529_v16, %v5525_v6  ;;  %5354 = vmatprep.subr.mxu0 %v5562_v8 }
0x1178   : > { %5342 = vmatmul.mubr.msk.f32.vlgmr.msra.gmra.mxu1 %vm1171_vm3, %v3411_v18  ;;  %5347 = vmatmul.mubr.msk.f32.vlgmr.msra.gmra.mxu0 %vm1171_vm3, %v3565_v20 }
0x1179   : > { %5350 = vmatpush3.xpose.msk.msra.mxu1 %vm1171_vm3, %v3645_v7  ;;  %5351 = vmatprep.mubr.msk.f32.mxu1 %vm5563_vm2, %v5562_v8 }
0x117a   : > { %5359 = vmatprep.subr.mxu1 %v5562_v8  ;;  %5356 = vmatprep.mubr.msk.f32.mxu0 %vm5563_vm2, %v5562_v8 }
0x117c   : > { %5352 = vmatmul.mubr.msk.f32.vlgmr.msra.gmra.mxu1 %vm1171_vm3, %v3643_v4 }
0x117d   : > { %5361 = vmatprep.mubr.msk.f32.mxu1 %vm5563_vm2, %v5562_v8 }
0x1234   : > { %v6194_v21 = vpop.f32.mrf.mxu0 }
0x1236   : > { %v5338_v22 = vpop.f32.mrf.mxu0 }
0x1238   : > { %v6196_v23 = vpop.f32.mrf.mxu1  ;;  %v3638_v24 = vpop.f32.mrf.mxu0 }
0x1239   : > { %v3720_v25 = vsel %vm2893_vm9, %v3638_v24, -1e+20 }
0x123a   : > { %v3722_v19 = vmul.f32 0.17677669, %v3720_v25  ;;  %v5343_v26 = vpop.f32.mrf.mxu1  ;;  %v5348_v27 = vpop.f32.mrf.mxu0 }
0x123c   : > { %v3716_v28 = vpop.f32.mrf.mxu1  ;;  %v3724_v29 = vsel %vm1171_vm3, %v3722_v19, -inf }
0x123d   : > { %v3721_v30 = vsel %vm2894_vm10, %v3716_v28, -1e+20  ;;  %3725 = vmax.xlane.f32.xlu0 %v3724_v29  ;;  %v2898_v29 = vld [vmem:[%s5772_s8 + $0x18] sm:$0xff] }
0x123e   : > { %v3723_v32 = vmul.f32 0.17677669, %v3721_v30  ;;  %v5353_v12 = vpop.f32.mrf.mxu1  ;;  %v2896_v30 = vld [vmem:[%s5772_s8 + $0x8] sm:$0xff] }
0x1240   : > { %v3727_v34 = vsel %vm1171_vm3, %v3723_v32, -inf }
0x1241   : > { %3728 = vmax.xlane.f32.xlu1 %v3727_v34 }
0x1252   : > { %3746 = vrot.lane.b32.xlu1 %v6078_v48, %s5569_s4 }
0x1253   : > { %3822 = vrot.lane.b32.xlu0 %v6076_v46, %s5569_s4  ;;  %s6468_s4 = scalar_lea.vmem %s6392_s14, %s5722_s6 }
0x1256   : > { %3900 = vrot.lane.b32.xlu1 %v6078_v48, %s5573_s7 }
0x125a   : > { %3978 = vrot.lane.b32.xlu1 %v6076_v46, %s5573_s7 }
0x125e   : > { %3976 = vrot.lane.b32.xlu1 %v6096_v55, %s5573_s7 }
0x12c6   : > { %v3726_v31 = vpop.xlane.xlu0 %3725 }
0x12c7   : > { %v3730_v33 = vsub.f32 %v3722_v19, %v3726_v31 }
0x12c9   : > { %v3732_v35 = vmul.f32 1.442695, %v3730_v33 }
0x12ca   : > { %v3823_v36 = vpop.permute.xlu0 %3822  ;;  %v3729_v37 = vpop.xlane.xlu1 %3728 }
0x12cb   : > { %5530 = vpow2.f32 %v3732_v35  ;;  %v3731_v39 = vsub.f32 %v3723_v32, %v3729_v37  ;;  %5360 = vmatpush3.msra.mxu1 %v3823_v36  ;;  %v2895_v32 = vld [vmem:[%s5772_s8] sm:$0xff] }
0x12cc   : > { %5369 = vmatprep.subr.mxu1 %v5562_v8 }
0x12cd   : > { %v3734_v41 = vmul.f32 1.442695, %v3731_v39 }
0x12ce   : > { %v3747_v13 = vpop.permute.xlu1 %3746 }
0x12cf   : > { %5532 = vpow2.f32 %v3734_v41  ;;  %5355 = vmatpush3.msra.mxu0 %v3747_v13 }
0x12d0   : > { %5364 = vmatprep.subr.mxu0 %v5562_v8 }
0x12d2   : > { %v3901_v51 = vpop.permute.xlu1 %3900 }
0x12d6   : > { %v3979_v59 = vpop.permute.xlu1 %3978 }
0x12d8   : > { %v5531_v44 = vpop.eup %5530 }
0x12d9   : > { %v3736_v45 = vsel %vm1171_vm3, %v5531_v44, 0.0 }
0x12da   : > { %3737 = vadd.xlane.f32.xlu0 %v3736_v45  ;;  %v3977_v61 = vpop.permute.xlu1 %3976 }
0x12dc   : > { %v5533_v55 = vpop.eup %5532 }
0x12dd   : > { %v3739_v47 = vsel %vm1171_vm3, %v5533_v55, 0.0 }
0x12de   : > { %3740 = vadd.xlane.f32.xlu0 %v3739_v47 }
0x12f4   : > { %3898 = vrot.lane.b32.xlu0 %v6088_v53, %s5573_s7 }
0x1363   : > { %v3738_v49 = vpop.xlane.xlu0 %3737 }
0x1364   : > { %5534 = vrcp.f32 %v3738_v49 }
0x1367   : > { %v3741_v50 = vpop.xlane.xlu0 %3740 }
0x1368   : > { %5536 = vrcp.f32 %v3741_v50 }
0x136b   : > { %v3899_v53 = vpop.permute.xlu0 %3898 }
0x1371   : > { %v5535_v56 = vpop.eup %5534 }
0x1372   : > { %v3744_v57 = vmul.f32 %v5535_v56, %v5531_v44 }
0x1374   : > { %5357 = vmatmul.mubr.msk.f32.vlgmr.msra.gmra.mxu0 %vm1171_vm3, %v3744_v57 }
0x1375   : > { %v5537_v58 = vpop.eup %5536  ;;  %5365 = vmatpush3.xpose.msk.msra.mxu0 %vm1171_vm3, %v3901_v51  ;;  %5366 = vmatprep.mubr.msk.f32.mxu0 %vm5563_vm2, %v5562_v8 }
0x1376   : > { %v3745_v60 = vmul.f32 %v5537_v58, %v5533_v55  ;;  %5374 = vmatprep.subr.mxu0 %v5562_v8 }
0x1378   : > { %5362 = vmatmul.mubr.msk.f32.vlgmr.msra.gmra.mxu1 %vm1171_vm3, %v3745_v60  ;;  %5367 = vmatmul.mubr.msk.f32.vlgmr.msra.gmra.mxu0 %vm1171_vm3, %v3899_v53 }
0x1379   : > { %5370 = vmatpush3.xpose.msk.msra.mxu1 %vm1171_vm3, %v3979_v59  ;;  %5371 = vmatprep.mubr.msk.f32.mxu1 %vm5563_vm2, %v5562_v8 }
0x137a   : > { %5379 = vmatprep.subr.mxu1 %v5562_v8  ;;  %5376 = vmatprep.mubr.msk.f32.mxu0 %vm5563_vm2, %v5562_v8 }
0x137c   : > { %5372 = vmatmul.mubr.msk.f32.vlgmr.msra.gmra.mxu1 %vm1171_vm3, %v3977_v61 }
0x137d   : > { %5381 = vmatprep.mubr.msk.f32.mxu1 %vm5563_vm2, %v5562_v8 }
0x1434   : > { %v3818_v62 = vpop.f32.mrf.mxu0 }
0x1436   : > { %v5358_v52 = vpop.f32.mrf.mxu0 }
0x1438   : > { %v3894_v63 = vpop.f32.mrf.mxu1  ;;  %v3972_v0 = vpop.f32.mrf.mxu0 }
0x1439   : > { %v4054_v1 = vsel %vm2893_vm9, %v3972_v0, -1e+20 }
0x143a   : > { %v4056_v3 = vmul.f32 0.17677669, %v4054_v1  ;;  %v5363_v5 = vpop.f32.mrf.mxu1  ;;  %v5368_v6 = vpop.f32.mrf.mxu0 }
0x143b   : > { %v4398_v6 = vld [vmem:[%s5797_s28 + $0x18] sm:$0xff] }
0x143c   : > { %v4050_v9 = vpop.f32.mrf.mxu1  ;;  %v4058_v10 = vsel %vm1171_vm3, %v4056_v3, -inf }
0x143d   : > { %v4055_v11 = vsel %vm2894_vm10, %v4050_v9, -1e+20  ;;  %4059 = vmax.xlane.f32.xlu0 %v4058_v10  ;;  %v4397_v9 = vld [vmem:[%s5797_s28 + $0x10] sm:$0xff]  ;;  %v4396_v10 = vld [vmem:[%s5797_s28 + $0x8] sm:$0xff] }
0x143e   : > { %v4057_v17 = vmul.f32 0.17677669, %v4055_v11  ;;  %v5373_v14 = vpop.f32.mrf.mxu1  ;;  %v4395_v11 = vld [vmem:[%s5797_s28] sm:$0xff]  ;;  %s6476_s28 = sld [smem:[#allocation4_spill]] }
0x143f   : > { %v4414_v14 = vld [vmem:[%s5807_s9 + $0x70] sm:$0xff] }
0x1440   : > { %v4061_v8 = vsel %vm1171_vm3, %v4057_v17, -inf }
0x1441   : > { %4062 = vmax.xlane.f32.xlu1 %v4061_v8  ;;  %v4413_v8 = vld [vmem:[%s5807_s9 + $0x68] sm:$0xff] }
0x1444   : > { %p5043_p5 = scmp.ne.s32.totalorder %s6476_s28, 1 }
0x1445   : > { %s6477_s7 = sld [smem:[#allocation21_spill]] (!%p5043_p5) }
0x1452   : > { %4080 = vrot.lane.b32.xlu1 %v6078_v48, %s5572_s24 }
0x1456   : > { %4234 = vrot.lane.b32.xlu1 %v6194_v21, %s5575_s23 }
0x145a   : > { %4236 = vrot.lane.b32.xlu1 %v6196_v23, %s5575_s23 }
0x145e   : > { %4244 = vrot.lane.b32.xlu1 %v3894_v63, %s6466_s26 }
0x14c6   : > { %v4060_v2 = vpop.xlane.xlu0 %4059 }
0x14c7   : > { %v4064_v54 = vsub.f32 %v4056_v3, %v4060_v2  ;;  %v4412_v2 = vld [vmem:[%s5807_s9 + $0x60] sm:$0xff] }
0x14c9   : > { %v4066_v15 = vmul.f32 1.442695, %v4064_v54  ;;  %v4411_v54 = vld [vmem:[%s5807_s9 + $0x58] sm:$0xff] }
0x14ca   : > { %v4063_v16 = vpop.xlane.xlu1 %4062 }
0x14cb   : > { %5538 = vpow2.f32 %v4066_v15  ;;  %v4065_v7 = vsub.f32 %v4057_v17, %v4063_v16  ;;  %v4415_v17 = vld [vmem:[%s5807_s9 + $0x78] sm:$0xff]  ;;  %v4410_v15 = vld [vmem:[%s5807_s9 + $0x50] sm:$0xff]  ;;  %v4409_v16 = vld [vmem:[%s5807_s9 + $0x48] sm:$0xff] }
0x14cd   : > { %v4068_v18 = vmul.f32 1.442695, %v4065_v7  ;;  %v4408_v7 = vld [vmem:[%s5807_s9 + $0x40] sm:$0xff] }
0x14ce   : > { %v4081_v20 = vpop.permute.xlu1 %4080 }
0x14cf   : > { %5540 = vpow2.f32 %v4068_v18  ;;  %5375 = vmatpush3.msra.mxu0 %v4081_v20  ;;  %v4407_v18 = vld [vmem:[%s5807_s9 + $0x38] sm:$0xff]  ;;  %v4406_v20 = vld [vmem:[%s5807_s9 + $0x30] sm:$0xff] }
0x14d0   : > { %5384 = vmatprep.subr.mxu0 %v2898_v29 }
0x14d2   : > { %v4235_v35 = vpop.permute.xlu1 %4234 }
0x14d3   : > { %v4256_v39 = vsel %vm1171_vm3, %v6152_v38, %v4235_v35  ;;  %v5032_v38 = vld [vmem:[%s6468_s4] ss:$0 sm:$0xff]  ;;  %v4402_v35 = vld [vmem:[%s5807_s9 + $0x10] sm:$0xff]  ;;  %s6475_s4 = scalar_lea.vmem %s6396_s18, %s5722_s6 }
0x14d6   : > { %v4237_v36 = vpop.permute.xlu1 %4236 }
0x14d7   : > { %v4257_v55 = vsel %vm1171_vm3, %v6154_v40, %v4237_v36  ;;  %v4401_v36 = vld [vmem:[%s5807_s9 + $0x8] sm:$0xff] }
0x14d8   : > { %v5539_v4 = vpop.eup %5538 }
0x14d9   : > { %v4070_v48 = vsel %vm1171_vm3, %v5539_v4, 0.0 }
0x14da   : > { %4071 = vadd.xlane.f32.xlu0 %v4070_v48  ;;  %v4245_v41 = vpop.permute.xlu1 %4244  ;;  %v4404_v48 = vld [vmem:[%s5807_s9 + $0x20] sm:$0xff] }
0x14db   : > { %v4259_v47 = vsel %vm2529_vm6, %v4257_v55, %v4245_v41 }
0x14dc   : > { %v5541_v21 = vpop.eup %5540 }
0x14dd   : > { %v4073_v22 = vsel %vm1171_vm3, %v5541_v21, 0.0 }
0x14de   : > { %4074 = vadd.xlane.f32.xlu0 %v4073_v22 }
0x14f4   : > { %4156 = vrot.lane.b32.xlu0 %v6076_v46, %s5572_s24  ;;  %v2897_v46 = vld [vmem:[%s5772_s8 + $0x10] sm:$0xff]  ;;  %s6469_s24 = scalar_lea.vmem %s6393_s15, %s5722_s6 }
0x14f8   : > { %4242 = vrot.lane.b32.xlu0 %v3818_v62, %s6466_s26  ;;  %s6479_s26 = sld [smem:[#allocation23_spill]] (!%p5043_p5) }
0x1563   : > { %v4072_v23 = vpop.xlane.xlu0 %4071 }
0x1564   : > { %5542 = vrcp.f32 %v4072_v23 }
0x1567   : > { %v4075_v24 = vpop.xlane.xlu0 %4074 }
0x1568   : > { %5544 = vrcp.f32 %v4075_v24 }
0x156b   : > { %v4157_v25 = vpop.permute.xlu0 %4156 }
0x156c   : > { %5380 = vmatpush3.msra.mxu1 %v4157_v25 }
0x156d   : > { %5395 = vmatprep.subr.mxu1 %v4398_v6 }
0x156f   : > { %v4243_v37 = vpop.permute.xlu0 %4242 }
0x1570   : > { %v4258_v13 = vsel %vm2529_vm6, %v4256_v39, %v4243_v37  ;;  %v4400_v37 = vld [vmem:[%s5807_s9] sm:$0xff] }
0x1571   : > { %v5543_v19 = vpop.eup %5542  ;;  %v5037_v39 = vld [vmem:[%s6471_s3] ss:$0 sm:$0xff] }
0x1572   : > { %v4078_v26 = vmul.f32 %v5543_v19, %v5539_v4  ;;  %v4405_v4 = vld [vmem:[%s5807_s9 + $0x28] sm:$0xff] }
0x1574   : > { %5377 = vmatmul.mubr.msk.f32.vlgmr.msra.gmra.mxu0 %vm1171_vm3, %v4078_v26 }
0x1575   : > { %v5545_v27 = vpop.eup %5544  ;;  %5385 = vmatpush3.msra.mxu0 %v2898_v29  ;;  %v5036_v29 = vld [vmem:[%s6470_s22] ss:$0 sm:$0xff] }
0x1576   : > { %v4079_v28 = vmul.f32 %v5545_v27, %v5541_v21  ;;  %5386 = vmatprep.subr.mxu0 %v2897_v46  ;;  %v5035_v27 = vld [vmem:[%s6469_s24] ss:$0 sm:$0xff] }
0x1577   : > { %5387 = vmatpush3.msra.mxu0 %v2897_v46 }
0x1578   : > { %5382 = vmatmul.mubr.msk.f32.vlgmr.msra.gmra.mxu1 %vm1171_vm3, %v4079_v28  ;;  %5388 = vmatprep.subr.mxu0 %v2896_v30 }
0x1579   : > { %5389 = vmatpush3.msra.mxu0 %v2896_v30  ;;  %5396 = vmatpush3.msra.mxu1 %v4398_v6 }
0x157a   : > { %5390 = vmatprep.subr.mxu0 %v2895_v32  ;;  %5397 = vmatprep.subr.mxu1 %v4397_v9 }
0x157b   : > { %5391 = vmatpush3.msra.mxu0 %v2895_v32  ;;  %5398 = vmatpush3.msra.mxu1 %v4397_v9 }
0x157c   : > { %5399 = vmatprep.subr.mxu1 %v4396_v10  ;;  %5406 = vmatprep.subr.mxu0 %v4415_v17 }
0x157d   : > { %5400 = vmatpush3.msra.mxu1 %v4396_v10 }
0x157e   : > { %5401 = vmatprep.subr.mxu1 %v4395_v11 }
0x157f   : > { %5402 = vmatpush3.msra.mxu1 %v4395_v11 }
0x1634   : > { %v4152_v12 = vpop.f32.mrf.mxu0 }
0x1635   : > { %4250 = vrot.lane.b32.xlu0 %v4152_v12, %s6467_s1 }
0x1636   : > { %v5378_v34 = vpop.f32.mrf.mxu0 }
0x1638   : > { %v4228_v31 = vpop.f32.mrf.mxu1 }
0x1639   : > { %4252 = vrot.lane.b32.xlu1 %v4228_v31, %s6467_s1  ;;  %s6474_s1 = scalar_lea.vmem %s6395_s17, %s5722_s6 }
0x163a   : > { %v5383_v33 = vpop.f32.mrf.mxu1 }
0x163b   : > { %v4403_v33 = vld [vmem:[%s5807_s9 + $0x18] sm:$0xff]  ;;  %s6473_s9 = scalar_lea.vmem %s6472_s13, %s5722_s6  ;;  %s6478_s13 = sld [smem:[#allocation22_spill]] (!%p5043_p5) }
0x16a7   : > { %v4251_v44 = vpop.permute.xlu0 %4250 }
0x16a8   : > { %v4260_v45 = vsel %vm2532_vm5, %v4258_v13, %v4251_v44 }
0x16a9   : > { %5392 = vmatprep.mubr.msk.f32.mxu0 %vm1074_vm1, %v4260_v45 }
0x16ab   : > { %v4253_v49 = vpop.permute.xlu1 %4252 }
0x16ac   : > { %v4261_v50 = vsel %vm2532_vm5, %v4259_v47, %v4253_v49  ;;  %v5040_v49 = vld [vmem:[%s6473_s9] ss:$0 sm:$0xff] }
0x16ad   : > { %5393 = vmatmul.mubr.msk.f32.vlgmr.msra.gmra.mxu0 %vm1074_vm1, %v4261_v50 }
0x16ae   : > { %5407 = vmatpush3.msra.mxu0 %v4415_v17 }
0x16af   : > { %5408 = vmatprep.subr.mxu0 %v4414_v14 }
0x16b0   : > { %5409 = vmatpush3.msra.mxu0 %v4414_v14  ;;  %v5041_v14 = vld [vmem:[%s6474_s1] ss:$0 sm:$0xff] }
0x16b1   : > { %5410 = vmatprep.subr.mxu0 %v4413_v8 }
0x16b2   : > { %5411 = vmatpush3.msra.mxu0 %v4413_v8 }
0x16b3   : > { %5412 = vmatprep.subr.mxu0 %v4412_v2 }
0x16b4   : > { %5413 = vmatpush3.msra.mxu0 %v4412_v2 }
0x16b5   : > { %5414 = vmatprep.subr.mxu0 %v4411_v54 }
0x16b6   : > { %5415 = vmatpush3.msra.mxu0 %v4411_v54  ;;  %v5042_v54 = vld [vmem:[%s6475_s4] ss:$0 sm:$0xff] }
0x16b7   : > { %5416 = vmatprep.subr.mxu0 %v4410_v15 }
0x16b8   : > { %5417 = vmatpush3.msra.mxu0 %v4410_v15 }
0x16b9   : > { %5418 = vmatprep.subr.mxu0 %v4409_v16 }
0x16ba   : > { %5419 = vmatpush3.msra.mxu0 %v4409_v16 }
0x16bb   : > { %5420 = vmatprep.subr.mxu0 %v4408_v7 }
0x16bc   : > { %5421 = vmatpush3.msra.mxu0 %v4408_v7 }
0x16bd   : > { %5422 = vmatprep.subr.mxu0 %v4407_v18 }
0x16be   : > { %5423 = vmatpush3.msra.mxu0 %v4407_v18 }
0x16bf   : > { %5424 = vmatprep.subr.mxu0 %v4406_v20 }
0x16c0   : > { %5425 = vmatpush3.msra.mxu0 %v4406_v20 }
0x16c1   : > { %5426 = vmatprep.subr.mxu0 %v4405_v4 }
0x16c2   : > { %5427 = vmatpush3.msra.mxu0 %v4405_v4 }
0x16c3   : > { %5428 = vmatprep.subr.mxu0 %v4404_v48 }
0x16c4   : > { %5429 = vmatpush3.msra.mxu0 %v4404_v48 }
0x16c5   : > { %5430 = vmatprep.subr.mxu0 %v4403_v33 }
0x16c6   : > { %5431 = vmatpush3.msra.mxu0 %v4403_v33 }
0x16c7   : > { %5432 = vmatprep.subr.mxu0 %v4402_v35 }
0x16c8   : > { %5433 = vmatpush3.msra.mxu0 %v4402_v35 }
0x16c9   : > { %5434 = vmatprep.subr.mxu0 %v4401_v36 }
0x16ca   : > { %5435 = vmatpush3.msra.mxu0 %v4401_v36 }
0x16cb   : > { %5436 = vmatprep.subr.mxu0 %v4400_v37 }
0x16cc   : > { %5437 = vmatpush3.msra.mxu0 %v4400_v37 }
0x176d   : > { %v5394_v51 = vpop.f32.mrf.mxu0 }
0x176e   : > { %v4346_v56 = vadd.f32 %v5394_v51, %v5032_v38 }
0x176f   : > { %v4340_v57 = vpop.f32.mrf.mxu0 }
0x1770   : > { %v4352_v58 = vadd.f32 %v4346_v56, %v6065_v43  ;;  %v4341_v59 = vadd.f32 %v5032_v38, %v4340_v57 }
0x1772   : > { %v4356_v40 = vsel %vm1074_vm1, %v4352_v58, 0.0  ;;  %v4351_v60 = vadd.f32 %v4341_v59, %v6061_v42 }
0x1773   : > { %4357 = vadd.xlane.f32.xlu1 %v4356_v40 }
0x1774   : > { %v4353_v53 = vsel %vm1074_vm1, %v4351_v60, 0.0 }
0x1775   : > { %4354 = vadd.xlane.f32.xlu0 %v4353_v53 }
0x17fc   : > { %v4358_v61 = vpop.xlane.xlu1 %4357 }
0x17fd   : > { %v4360_v62 = vmul.f32 0.03125, %v4358_v61 }
0x17fe   : > { %v4355_v52 = vpop.xlane.xlu0 %4354 }
0x17ff   : > { %v4359_v63 = vmul.f32 0.03125, %v4355_v52  ;;  %v6281_v0 = vsub.f32 %v4352_v58, %v4360_v62 }
0x1801   : > { %v6283_v1 = vsub.f32 %v4351_v60, %v4359_v63  ;;  %v4364_v3 = vmul.f32 %v6281_v0, %v6281_v0 }
0x1803   : > { %v4363_v43 = vmul.f32 %v6283_v1, %v6283_v1  ;;  %v4368_v5 = vsel %vm1074_vm1, %v4364_v3, 0.0 }
0x1805   : > { %v4365_v42 = vsel %vm1074_vm1, %v4363_v43, 0.0 }
0x1806   : > { %4366 = vadd.xlane.f32.xlu0 %v4365_v42 }
0x180a   : > { %4369 = vadd.xlane.f32.xlu0 %v4368_v5 }
0x188f   : > { %v4367_v21 = vpop.xlane.xlu0 %4366 }
0x1890   : > { %v4371_v22 = vmul.f32 0.03125, %v4367_v21 }
0x1892   : > { %v4373_v23 = vadd.f32 1e-05, %v4371_v22 }
0x1893   : > { %v4370_v24 = vpop.xlane.xlu0 %4369 }
0x1894   : > { %5546 = vrsqrt.f32 %v4373_v23  ;;  %v4372_v25 = vmul.f32 0.03125, %v4370_v24 }
0x1896   : > { %v4374_v19 = vadd.f32 1e-05, %v4372_v25 }
0x1898   : > { %5548 = vrsqrt.f32 %v4374_v19 }
0x18a1   : > { %v5547_v26 = vpop.eup %5546 }
0x18a2   : > { %v4377_v28 = vmul.f32 %v5547_v26, %v6283_v1 }
0x18a4   : > { %v4385_v46 = vmul.f32 %v5035_v27, %v4377_v28 }
0x18a5   : > { %v5549_v30 = vpop.eup %5548 }
0x18a6   : > { %v4378_v32 = vmul.f32 %v5549_v30, %v6281_v0  ;;  %v4393_v12 = vadd.f32 %v5036_v29, %v4385_v46 }
0x18a8   : > { %v4386_v34 = vmul.f32 %v5035_v27, %v4378_v32  ;;  %5403 = vmatprep.mubr.msk.f32.mxu1 %vm1074_vm1, %v4393_v12 }
0x18aa   : > { %v4394_v31 = vadd.f32 %v5036_v29, %v4386_v34 }
0x18ac   : > { %5404 = vmatmul.mubr.msk.f32.vlgmr.msra.gmra.mxu1 %vm1074_vm1, %v4394_v31 }
0x196c   : > { %v5405_v41 = vpop.f32.mrf.mxu1 }
0x196d   : > { %v4501_v13 = vadd.f32 %v5405_v41, %v5037_v39 }
0x196e   : > { %v4495_v44 = vpop.f32.mrf.mxu1 }
0x196f   : > { %v4496_v45 = vadd.f32 %v5037_v39, %v4495_v44  ;;  %v4505_v47 = vmax.f32 %v4501_v13, 0.0 }
0x1971   : > { %v4504_v55 = vmax.f32 %v4496_v45, 0.0 }
0x1973   : > { %5438 = vmatprep.mubr.f32.mxu0 %v4504_v55 }
0x1974   : > { %5439 = vmatmul.mubr.f32.vlgmr.msra.gmra.mxu0 %v4505_v47 }
0x1a34   : > { %v5440_v50 = vpop.f32.mrf.mxu0 }
0x1a35   : > { %v4584_v38 = vadd.f32 %v5440_v50, %v5040_v49 }
0x1a36   : > { %v4578_v51 = vpop.f32.mrf.mxu0 }
0x1a37   : > { %v4579_v56 = vadd.f32 %v5040_v49, %v4578_v51  ;;  %v4590_v57 = vadd.f32 %v4584_v38, %v4394_v31 }
0x1a39   : > { %v4589_v58 = vadd.f32 %v4579_v56, %v4393_v12  ;;  %v4594_v59 = vsel %vm1074_vm1, %v4590_v57, 0.0 }
0x1a3a   : > { %4595 = vadd.xlane.f32.xlu0 %v4594_v59 }
0x1a3b   : > { %v4591_v40 = vsel %vm1074_vm1, %v4589_v58, 0.0 }
0x1a3c   : > { %4592 = vadd.xlane.f32.xlu1 %v4591_v40 }
0x1ac3   : > { %v4596_v60 = vpop.xlane.xlu0 %4595 }
0x1ac4   : > { %v4598_v53 = vmul.f32 0.03125, %v4596_v60 }
0x1ac5   : > { %v4593_v61 = vpop.xlane.xlu1 %4592 }
0x1ac6   : > { %v4600_v62 = vsub.f32 %v4590_v57, %v4598_v53  ;;  %v4597_v52 = vmul.f32 0.03125, %v4593_v61 }
0x1ac8   : > { %v4599_v63 = vsub.f32 %v4589_v58, %v4597_v52  ;;  %v4602_v0 = vmul.f32 %v4600_v62, %v4600_v62 }
0x1aca   : > { %v4606_v1 = vsel %vm1074_vm1, %v4602_v0, 0.0  ;;  %v4601_v43 = vmul.f32 %v4599_v63, %v4599_v63 }
0x1acb   : > { %4607 = vadd.xlane.f32.xlu0 %v4606_v1 }
0x1acc   : > { %v4603_v42 = vsel %vm1074_vm1, %v4601_v43, 0.0 }
0x1acd   : > { %4604 = vadd.xlane.f32.xlu1 %v4603_v42 }
0x1b54   : > { %v4608_v3 = vpop.xlane.xlu0 %4607 }
0x1b55   : > { %v4610_v5 = vmul.f32 0.03125, %v4608_v3 }
0x1b56   : > { %v4605_v6 = vpop.xlane.xlu1 %4604 }
0x1b57   : > { %v4612_v9 = vadd.f32 1e-05, %v4610_v5  ;;  %v4609_v10 = vmul.f32 0.03125, %v4605_v6 }
0x1b59   : > { %5550 = vrsqrt.f32 %v4612_v9  ;;  %v4611_v11 = vadd.f32 1e-05, %v4609_v10 }
0x1b5b   : > { %5552 = vrsqrt.f32 %v4611_v11 }
0x1b66   : > { %v5551_v17 = vpop.eup %5550 }
0x1b67   : > { %v4616_v8 = vmul.f32 %v5551_v17, %v4600_v62 }
0x1b68   : > { %v5553_v2 = vpop.eup %5552 }
0x1b69   : > { %v4624_v15 = vmul.f32 %v5041_v14, %v4616_v8  ;;  %v4615_v16 = vmul.f32 %v5553_v2, %v4599_v63 }
0x1b6b   : > { %v4632_v7 = vadd.f32 %v5042_v54, %v4624_v15  ;;  %v4623_v18 = vmul.f32 %v5041_v14, %v4615_v16  ;;  %4638 = sbr.rel (%p5043_p5) target bundleno = 7231 (0x1c3f), region = 128 }
0x1b6d   : > { %4634 = vst.msk [vmem:[#allocation2 + $0x8] sm:$0xff] %vm1074_vm1, %v4632_v7  ;;  %v4631_v20 = vadd.f32 %v5042_v54, %v4623_v18 }
0x1b6f   : > { %4633 = vst.msk [vmem:[#allocation2] sm:$0xff] %vm1074_vm1, %v4631_v20 }
0x1b70   : > { %v4642_v4 = vld [vmem:[%s6477_s7 + $0x18] sm:$0xff]  ;;  %v4641_v48 = vld [vmem:[%s6477_s7 + $0x10] sm:$0xff]  ;;  %5449 = vmatprep.mubr.msk.f32.mxu0 %vm1074_vm1, %v4631_v20  ;;  %v4640_v21 = vld [vmem:[%s6477_s7 + $0x8] sm:$0xff] }
0x1b71   : > { %5441 = vmatprep.subr.mxu0 %v4642_v4  ;;  %v4639_v22 = vld [vmem:[%s6477_s7] sm:$0xff] }
0x1b72   : > { %5442 = vmatpush3.msra.mxu0 %v4642_v4  ;;  %v5044_v23 = vld [vmem:[%s6478_s13] ss:$0 sm:$0xff] }
0x1b73   : > { %5443 = vmatprep.subr.mxu0 %v4641_v48 }
0x1b74   : > { %5444 = vmatpush3.msra.mxu0 %v4641_v48 }
0x1b75   : > { %5445 = vmatprep.subr.mxu0 %v4640_v21 }
0x1b76   : > { %5446 = vmatpush3.msra.mxu0 %v4640_v21 }
0x1b77   : > { %5447 = vmatprep.subr.mxu0 %v4639_v22 }
0x1b78   : > { %5448 = vmatpush3.msra.mxu0 %v4639_v22 }
0x1b79   : > { %5450 = vmatmul.mubr.msk.f32.vlgmr.msra.gmra.mxu0 %vm1074_vm1, %v4632_v7 }
0x1c39   : > { %v5451_v24 = vpop.f32.mrf.mxu0 }
0x1c3a   : > { %v4728_v25 = vadd.f32 %v5451_v24, %v5044_v23 }
0x1c3b   : > { %v4722_v19 = vpop.f32.mrf.mxu0 }
0x1c3c   : > { %4732 = vst [vmem:[%s6479_s26 + $0x8] sm:$0xff] %v4728_v25  ;;  %v4723_v26 = vadd.f32 %v5044_v23, %v4722_v19 }
0x1c3e   : > { %4731 = vst [vmem:[%s6479_s26] sm:$0xff] %v4723_v26 }
0x1c3f PF: > { %s6480_s11 = sld [smem:[#allocation3_spill]] }
0x1c45   : > { %s35_s29 = sadd.s32 1, %s6480_s11  }
0x1c46   : > { %p32_p6 = scmp.ge.s32.totalorder %s35_s29, 4  }
0x1c48   :  { %34 = sbr.rel (!%p32_p6) target bundleno = 18 (0x12), region = 211 }

</bundles_post_ra>
